<compile_context>
chip_gen: v5e
topology: v5e:2x2
jax: 0.10.0
libtpu: 0.0.40
codegen_flags: <defaults>
</compile_context>

<pallas_src>
import functools

import jax
import jax.numpy as jnp
from jax import lax
from jax.experimental import pallas as pl
from jax.experimental.pallas import tpu as pltpu


# ---------------------------------------------------------------------------
# Fused ASPP kernel (one (batch, row-tile) grid point per invocation)
# ---------------------------------------------------------------------------
def _aspp_fused_kernel(pool_ref, x_ref, w0_ref, wr_ref, wproj_ref,
                       scale_ref, bias_ref, o_ref, *,
                       rates, tile_h, W, C_in, C_out, pad):
    n_rates = len(rates)
    D = pad
    M = tile_h * W
    # First padded row of this output tile inside the row/col zero-padded x.
    r0 = pl.multiple_of(pl.program_id(1) * tile_h, tile_h)

    # ---- branch 0: 1x1 conv -> BN -> ReLU, projected ----
    x0 = x_ref[0, pl.ds(D + r0, tile_h), D:D + W, :].reshape(M, C_in)  # bf16
    y0 = jnp.dot(x0, w0_ref[...], preferred_element_type=jnp.float32)
    y0 = jnp.maximum(y0 * scale_ref[0:1, :] + bias_ref[0:1, :], 0.0)
    acc = jnp.dot(y0.astype(jnp.bfloat16), wproj_ref[0:C_out, :],
                  preferred_element_type=jnp.float32)                 # (M, Cout)

    # ---- dilated 3x3 branches: 9 always-in-bounds taps each, projected ----
    # (column starts are static; the zero conv-padding lives in the padded x
    #  block itself, so no masks, no halo scratch, no casts.)
    # NOTE(v5e): column starts D + (dx-1)*d are not sublane-aligned; accepted
    # since the kernel is MXU-bound at real channel counts.
    for ri, d in enumerate(rates):
        conv = jnp.zeros((M, C_out), jnp.float32)
        for dy in range(3):
            row = D + r0 + (dy - 1) * d               # dynamic, always >= 0
            for dx in range(3):
                col = D + (dx - 1) * d                # static python int
                patch = x_ref[0, pl.ds(row, tile_h), col:col + W, :]
                conv = conv + jnp.dot(patch.reshape(M, C_in),
                                      wr_ref[ri, 3 * dy + dx],
                                      preferred_element_type=jnp.float32)
        yr = jnp.maximum(conv * scale_ref[1 + ri:2 + ri, :]
                         + bias_ref[1 + ri:2 + ri, :], 0.0)
        acc = acc + jnp.dot(yr.astype(jnp.bfloat16),
                            wproj_ref[(1 + ri) * C_out:(2 + ri) * C_out, :],
                            preferred_element_type=jnp.float32)

    # ---- pooled-branch contribution (precomputed, spatially constant) ----
    acc = acc + pool_ref[0]                                          # (1, Cout)

    # ---- projection BN + ReLU (Dropout(0.5) is identity in eval) ----
    out = jnp.maximum(acc * scale_ref[n_rates + 1:n_rates + 2, :]
                      + bias_ref[n_rates + 1:n_rates + 2, :], 0.0)
    o_ref[...] = out.reshape(1, tile_h, W, C_out).astype(o_ref.dtype)


# ---------------------------------------------------------------------------
# Wrapper: NCHW f32 in / NCHW f32 out, kernel runs in NHWC / bf16
# ---------------------------------------------------------------------------
def aspp_forward(x_nchw, params, atrous_rates, *, tile_h=8):
    rates = tuple(atrous_rates)
    n_rates = len(rates)
    N, C_in, H, W = x_nchw.shape

    w0, s0, b0 = params["b0"]
    wpool, sp, bp = params["pool"]
    wproj, sj, bj = params["proj"]
    C_out = w0.shape[1]

    D = max(rates) if rates else 0
    tile_h = max(1, min(tile_h, H))
    T = (H + tile_h - 1) // tile_h                 # ragged last tile supported
    Hp_out = T * tile_h                            # row-padded output height
    Hp = Hp_out + 2 * D                            # row-padded input height
    Wp = W + 2 * D                                 # col-padded input width

    # ---- hoisted global-average-pool branch (f32, tiny, once per image) ----
    mean = jnp.mean(x_nchw, axis=(2, 3))                             # (N, Cin)
    ypool = jnp.maximum(mean @ wpool * sp + bp, 0.0)                 # (N, Cout)
    wproj_pool = wproj[(n_rates + 1) * C_out:(n_rates + 2) * C_out]
    pool_c = (ypool @ wproj_pool).astype(jnp.float32)                # pre-proj-BN
    pool_c = pool_c.reshape(N, 1, C_out)
    # (bilinear upsample of a 1x1 map with align_corners=False == broadcast)

    # ---- NCHW -> NHWC, bf16, zero-pad rows/cols (conv padding + ragged) ----
    x = jnp.transpose(x_nchw, (0, 2, 3, 1)).astype(jnp.bfloat16)
    x = jnp.pad(x, ((0, 0), (D, Hp_out - H + D), (D, D), (0, 0)))

    wr = jnp.stack([params[f"rate{i}"][0].reshape(9, C_in, C_out)
                    for i in range(n_rates)], axis=0).astype(jnp.bfloat16)
    wproj_k = wproj[:(n_rates + 1) * C_out].astype(jnp.bfloat16)
    scales = jnp.stack([s0] + [params[f"rate{i}"][1] for i in range(n_rates)]
                       + [sj], axis=0).astype(jnp.float32)
    biases = jnp.stack([b0] + [params[f"rate{i}"][2] for i in range(n_rates)]
                       + [bj], axis=0).astype(jnp.float32)

    kern = functools.partial(
        _aspp_fused_kernel, rates=rates, tile_h=tile_h, W=W,
        C_in=C_in, C_out=C_out, pad=D)

    # Grid-invariant operands: single-buffer (no point double-buffering blocks
    # whose index never changes — matters at production weight sizes on v7x).
    inv = dict(pipeline_mode=pl.Buffered(1))

    # Advisory cost estimate so XLA schedules the transposes/pads around us.
    m_tot = N * Hp_out * W
    flops = (2 * m_tot * C_in * C_out * (1 + 9 * n_rates)
             + 2 * m_tot * C_out * C_out * (1 + n_rates))
    bytes_accessed = (x.size * 2 + wr.size * 2 + w0.size * 2 + wproj_k.size * 2
                      + scales.size * 4 + biases.size * 4 + pool_c.size * 4
                      + N * Hp_out * W * C_out * 2)

    y = pl.pallas_call(
        kern,
        grid_spec=pltpu.PrefetchScalarGridSpec(
            num_scalar_prefetch=0,
            grid=(N, T),
            in_specs=[
                # per-image projected pooling contribution
                pl.BlockSpec((1, 1, C_out), lambda n, t: (n, 0, 0)),
                # x: per-image resident across the row-tile axis (read once).
                pl.BlockSpec((1, Hp, Wp, C_in), lambda n, t: (n, 0, 0, 0)),
                pl.BlockSpec((C_in, C_out), lambda n, t: (0, 0), **inv),
                pl.BlockSpec((n_rates, 9, C_in, C_out),
                             lambda n, t: (0, 0, 0, 0), **inv),
                pl.BlockSpec(((n_rates + 1) * C_out, C_out),
                             lambda n, t: (0, 0), **inv),
                pl.BlockSpec((n_rates + 2, C_out), lambda n, t: (0, 0), **inv),
                pl.BlockSpec((n_rates + 2, C_out), lambda n, t: (0, 0), **inv),
            ],
            out_specs=pl.BlockSpec((1, tile_h, W, C_out),
                                   lambda n, t: (n, t, 0, 0)),
        ),
        out_shape=jax.ShapeDtypeStruct((N, Hp_out, W, C_out), jnp.bfloat16),
        compiler_params=pltpu.CompilerParams(
            dimension_semantics=("parallel", "parallel")),
        cost_estimate=pl.CostEstimate(flops=flops, transcendentals=0,
                                      bytes_accessed=bytes_accessed),
    )(pool_c, x, w0.astype(jnp.bfloat16), wr, wproj_k, scales, biases)

    y = y[:, :H].astype(jnp.float32)               # drop ragged rows, f32 out
    return jnp.transpose(y, (0, 3, 1, 2))          # NHWC -> NCHW


# ---------------------------------------------------------------------------
# Parameter setup (deterministic, synthetic; BN folded to scale/bias)
# ---------------------------------------------------------------------------
def fold_bn(gamma, beta, mean, var, eps=1e-5):
    scale = gamma * lax.rsqrt(var + eps)
    return scale, beta - mean * scale


def init_aspp_params(key, in_channels, atrous_rates, out_channels):
    keys = iter(jax.random.split(key, 64))

    def bn(C):
        g = 1.0 + 0.1 * jax.random.normal(next(keys), (C,), jnp.float32)
        b = 0.1 * jax.random.normal(next(keys), (C,), jnp.float32)
        m = 0.1 * jax.random.normal(next(keys), (C,), jnp.float32)
        v = jnp.abs(1.0 + 0.1 * jax.random.normal(next(keys), (C,), jnp.float32))
        return fold_bn(g, b, m, v)

    params = {}
    w0 = 0.1 * jax.random.normal(next(keys), (in_channels, out_channels), jnp.float32)
    params["b0"] = (w0,) + bn(out_channels)
    for i, _ in enumerate(atrous_rates):
        w = 0.1 * jax.random.normal(next(keys), (3, 3, in_channels, out_channels),
                                    jnp.float32)
        params[f"rate{i}"] = (w,) + bn(out_channels)
    wp = 0.1 * jax.random.normal(next(keys), (in_channels, out_channels), jnp.float32)
    params["pool"] = (wp,) + bn(out_channels)
    n_branches = 2 + len(atrous_rates)
    wproj = 0.1 * jax.random.normal(
        next(keys), (n_branches * out_channels, out_channels), jnp.float32)
    params["proj"] = (wproj,) + bn(out_channels)
    return params


# ---------------------------------------------------------------------------
# Pure-JAX f32 reference (for correctness check)
# ---------------------------------------------------------------------------
def ref_aspp(x_nchw, params, atrous_rates):
    x = jnp.transpose(x_nchw, (0, 2, 3, 1))
    dn = ("NHWC", "HWIO", "NHWC")

    def pw(inp, w, s, b):
        y = lax.conv_general_dilated(inp, w[None, None], (1, 1), "VALID",
                                     dimension_numbers=dn)
        return jnp.maximum(y * s + b, 0.0)

    outs = [pw(x, *params["b0"])]
    for i, r in enumerate(atrous_rates):
        w, s, b = params[f"rate{i}"]
        y = lax.conv_general_dilated(x, w, (1, 1), ((r, r), (r, r)),
                                     rhs_dilation=(r, r), dimension_numbers=dn)
        outs.append(jnp.maximum(y * s + b, 0.0))
    w, s, b = params["pool"]
    m = jnp.mean(x, axis=(1, 2))
    y = jnp.maximum(m @ w * s + b, 0.0)
    outs.append(jnp.broadcast_to(y[:, None, None, :], x.shape[:3] + (w.shape[1],)))
    cat = jnp.concatenate(outs, axis=-1)
    y = pw(cat, *params["proj"])
    return jnp.transpose(y, (0, 3, 1, 2))


if __name__ == "__main__":
    key = jax.random.PRNGKey(0)
    cases = [
        dict(N=2, Cin=8, H=32, W=16, Cout=32, rates=(2, 4)),   # even tiling
        dict(N=1, Cin=8, H=20, W=16, Cout=32, rates=(2, 4)),   # ragged last tile
    ]
    for ci, c in enumerate(cases):
        kx, kp, key = jax.random.split(key, 3)
        x = jax.random.normal(kx, (c["N"], c["Cin"], c["H"], c["W"]), jnp.float32)
        params = init_aspp_params(kp, c["Cin"], c["rates"], c["Cout"])

        out = jax.block_until_ready(aspp_forward(x, params, c["rates"], tile_h=8))
        ref = ref_aspp(x, params, c["rates"])

        assert out.shape == (c["N"], c["Cout"], c["H"], c["W"]), out.shape
        max_err = float(jnp.max(jnp.abs(out - ref)))
        assert jnp.allclose(out, ref, atol=5e-2, rtol=5e-2), (
            f"case {ci}: Pallas ASPP mismatch vs reference, max|err|={max_err}")
    print("KERNEL_OK")
</pallas_src>

<mosaic_0001>
module attributes {stable_mosaic.version = 11 : i64} {
  func.func @_aspp_fused_kernel(%arg0: i32, %arg1: i32, %arg2: memref<1x1x32xf32, #tpu.memory_space<vmem>>, %arg3: memref<1x40x24x8xbf16, #tpu.memory_space<vmem>>, %arg4: memref<8x32xbf16, #tpu.memory_space<vmem>>, %arg5: memref<2x9x8x32xbf16, #tpu.memory_space<vmem>>, %arg6: memref<96x32xbf16, #tpu.memory_space<vmem>>, %arg7: memref<4x32xf32, #tpu.memory_space<vmem>>, %arg8: memref<4x32xf32, #tpu.memory_space<vmem>>, %arg9: memref<1x8x16x32xbf16, #tpu.memory_space<vmem>>) attributes {dimension_semantics = [#tpu.dimension_semantics<parallel>, #tpu.dimension_semantics<parallel>], iteration_bounds = array<i64: 2, 4>, scalar_prefetch = 0 : i64, scratch_operands = 0 : i64, tpu.core_type = #tpu.core_type<tc>, window_params = [{transform_indices = @transform_0, window_bounds = array<i64: 1, 1, 32>}, {transform_indices = @transform_1, window_bounds = array<i64: 1, 40, 24, 8>}, {pipeline_mode = #tpu.pipeline_mode<synchronous>, transform_indices = @transform_2, window_bounds = array<i64: 8, 32>}, {pipeline_mode = #tpu.pipeline_mode<synchronous>, transform_indices = @transform_3, window_bounds = array<i64: 2, 9, 8, 32>}, {pipeline_mode = #tpu.pipeline_mode<synchronous>, transform_indices = @transform_4, window_bounds = array<i64: 96, 32>}, {pipeline_mode = #tpu.pipeline_mode<synchronous>, transform_indices = @transform_5, window_bounds = array<i64: 4, 32>}, {pipeline_mode = #tpu.pipeline_mode<synchronous>, transform_indices = @transform_6, window_bounds = array<i64: 4, 32>}, {transform_indices = @transform_7, window_bounds = array<i64: 1, 8, 16, 32>}]} {
    %c8_i32 = arith.constant 8 : i32
    %0 = arith.muli %arg1, %c8_i32 : i32
    %1 = tpu.assume_multiple %0, 8 : i32
    %c4_i32 = arith.constant 4 : i32
    %2 = arith.addi %c4_i32, %1 : i32
    %c0 = arith.constant 0 : index
    %3 = arith.index_cast %2 : i32 to index
    %c4 = arith.constant 4 : index
    %c0_0 = arith.constant 0 : index
    %4 = vector.load %arg3[%c0, %3, %c4, %c0_0] : memref<1x40x24x8xbf16, #tpu.memory_space<vmem>>, vector<1x8x16x8xbf16>
    %5 = vector.shape_cast %4 : vector<1x8x16x8xbf16> to vector<8x16x8xbf16>
    %6 = vector.shape_cast %5 : vector<8x16x8xbf16> to vector<128x8xbf16>
    %c0_1 = arith.constant 0 : index
    %c0_2 = arith.constant 0 : index
    %7 = vector.load %arg4[%c0_1, %c0_2] : memref<8x32xbf16, #tpu.memory_space<vmem>>, vector<8x32xbf16>
    %cst = arith.constant dense<0.000000e+00> : vector<128x32xf32>
    %8 = tpu.matmul %6, %7, %cst {dimension_numbers = #tpu.dot_dimension_numbers<[1], [0], [0], [1], [0, 0, 1, 1], [], []>} : vector<128x8xbf16>, vector<8x32xbf16>, vector<128x32xf32> -> vector<128x32xf32>
    %c0_3 = arith.constant 0 : index
    %c0_4 = arith.constant 0 : index
    %9 = vector.load %arg7[%c0_3, %c0_4] : memref<4x32xf32, #tpu.memory_space<vmem>>, vector<1x32xf32>
    %10 = vector.broadcast %9 : vector<1x32xf32> to vector<128x32xf32>
    %11 = arith.mulf %8, %10 : vector<128x32xf32>
    %c0_5 = arith.constant 0 : index
    %c0_6 = arith.constant 0 : index
    %12 = vector.load %arg8[%c0_5, %c0_6] : memref<4x32xf32, #tpu.memory_space<vmem>>, vector<1x32xf32>
    %13 = vector.broadcast %12 : vector<1x32xf32> to vector<128x32xf32>
    %14 = arith.addf %11, %13 : vector<128x32xf32>
    %cst_7 = arith.constant 0.000000e+00 : f32
    %15 = vector.broadcast %cst_7 : f32 to vector<128x32xf32>
    %16 = arith.maximumf %14, %15 : vector<128x32xf32>
    %17 = arith.truncf %16 : vector<128x32xf32> to vector<128x32xbf16>
    %c0_8 = arith.constant 0 : index
    %c0_9 = arith.constant 0 : index
    %18 = vector.load %arg6[%c0_8, %c0_9] : memref<96x32xbf16, #tpu.memory_space<vmem>>, vector<32x32xbf16>
    %cst_10 = arith.constant dense<0.000000e+00> : vector<128x32xf32>
    %19 = tpu.matmul %17, %18, %cst_10 {dimension_numbers = #tpu.dot_dimension_numbers<[1], [0], [0], [1], [0, 0, 1, 1], [], []>} : vector<128x32xbf16>, vector<32x32xbf16>, vector<128x32xf32> -> vector<128x32xf32>
    %cst_11 = arith.constant 0.000000e+00 : f32
    %20 = vector.broadcast %cst_11 : f32 to vector<128x32xf32>
    %c4_i32_12 = arith.constant 4 : i32
    %21 = arith.addi %c4_i32_12, %1 : i32
    %c-2_i32 = arith.constant -2 : i32
    %22 = arith.addi %21, %c-2_i32 : i32
    %c0_13 = arith.constant 0 : index
    %23 = arith.index_cast %22 : i32 to index
    %c2 = arith.constant 2 : index
    %c0_14 = arith.constant 0 : index
    %24 = vector.load %arg3[%c0_13, %23, %c2, %c0_14] : memref<1x40x24x8xbf16, #tpu.memory_space<vmem>>, vector<1x8x16x8xbf16>
    %25 = vector.shape_cast %24 : vector<1x8x16x8xbf16> to vector<8x16x8xbf16>
    %26 = vector.shape_cast %25 : vector<8x16x8xbf16> to vector<128x8xbf16>
    %c0_15 = arith.constant 0 : index
    %c0_16 = arith.constant 0 : index
    %c0_17 = arith.constant 0 : index
    %c0_18 = arith.constant 0 : index
    %27 = vector.load %arg5[%c0_15, %c0_16, %c0_17, %c0_18] : memref<2x9x8x32xbf16, #tpu.memory_space<vmem>>, vector<1x1x8x32xbf16>
    %28 = vector.shape_cast %27 : vector<1x1x8x32xbf16> to vector<8x32xbf16>
    %cst_19 = arith.constant dense<0.000000e+00> : vector<128x32xf32>
    %29 = tpu.matmul %26, %28, %cst_19 {dimension_numbers = #tpu.dot_dimension_numbers<[1], [0], [0], [1], [0, 0, 1, 1], [], []>} : vector<128x8xbf16>, vector<8x32xbf16>, vector<128x32xf32> -> vector<128x32xf32>
    %30 = arith.addf %20, %29 : vector<128x32xf32>
    %c0_20 = arith.constant 0 : index
    %31 = arith.index_cast %22 : i32 to index
    %c4_21 = arith.constant 4 : index
    %c0_22 = arith.constant 0 : index
    %32 = vector.load %arg3[%c0_20, %31, %c4_21, %c0_22] : memref<1x40x24x8xbf16, #tpu.memory_space<vmem>>, vector<1x8x16x8xbf16>
    %33 = vector.shape_cast %32 : vector<1x8x16x8xbf16> to vector<8x16x8xbf16>
    %34 = vector.shape_cast %33 : vector<8x16x8xbf16> to vector<128x8xbf16>
    %c0_23 = arith.constant 0 : index
    %c1 = arith.constant 1 : index
    %c0_24 = arith.constant 0 : index
    %c0_25 = arith.constant 0 : index
    %35 = vector.load %arg5[%c0_23, %c1, %c0_24, %c0_25] : memref<2x9x8x32xbf16, #tpu.memory_space<vmem>>, vector<1x1x8x32xbf16>
    %36 = vector.shape_cast %35 : vector<1x1x8x32xbf16> to vector<8x32xbf16>
    %cst_26 = arith.constant dense<0.000000e+00> : vector<128x32xf32>
    %37 = tpu.matmul %34, %36, %cst_26 {dimension_numbers = #tpu.dot_dimension_numbers<[1], [0], [0], [1], [0, 0, 1, 1], [], []>} : vector<128x8xbf16>, vector<8x32xbf16>, vector<128x32xf32> -> vector<128x32xf32>
    %38 = arith.addf %30, %37 : vector<128x32xf32>
    %c0_27 = arith.constant 0 : index
    %39 = arith.index_cast %22 : i32 to index
    %c6 = arith.constant 6 : index
    %c0_28 = arith.constant 0 : index
    %40 = vector.load %arg3[%c0_27, %39, %c6, %c0_28] : memref<1x40x24x8xbf16, #tpu.memory_space<vmem>>, vector<1x8x16x8xbf16>
    %41 = vector.shape_cast %40 : vector<1x8x16x8xbf16> to vector<8x16x8xbf16>
    %42 = vector.shape_cast %41 : vector<8x16x8xbf16> to vector<128x8xbf16>
    %c0_29 = arith.constant 0 : index
    %c2_30 = arith.constant 2 : index
    %c0_31 = arith.constant 0 : index
    %c0_32 = arith.constant 0 : index
    %43 = vector.load %arg5[%c0_29, %c2_30, %c0_31, %c0_32] : memref<2x9x8x32xbf16, #tpu.memory_space<vmem>>, vector<1x1x8x32xbf16>
    %44 = vector.shape_cast %43 : vector<1x1x8x32xbf16> to vector<8x32xbf16>
    %cst_33 = arith.constant dense<0.000000e+00> : vector<128x32xf32>
    %45 = tpu.matmul %42, %44, %cst_33 {dimension_numbers = #tpu.dot_dimension_numbers<[1], [0], [0], [1], [0, 0, 1, 1], [], []>} : vector<128x8xbf16>, vector<8x32xbf16>, vector<128x32xf32> -> vector<128x32xf32>
    %46 = arith.addf %38, %45 : vector<128x32xf32>
    %c4_i32_34 = arith.constant 4 : i32
    %47 = arith.addi %c4_i32_34, %1 : i32
    %c0_i32 = arith.constant 0 : i32
    %48 = arith.addi %47, %c0_i32 : i32
    %c0_35 = arith.constant 0 : index
    %49 = arith.index_cast %48 : i32 to index
    %c2_36 = arith.constant 2 : index
    %c0_37 = arith.constant 0 : index
    %50 = vector.load %arg3[%c0_35, %49, %c2_36, %c0_37] : memref<1x40x24x8xbf16, #tpu.memory_space<vmem>>, vector<1x8x16x8xbf16>
    %51 = vector.shape_cast %50 : vector<1x8x16x8xbf16> to vector<8x16x8xbf16>
    %52 = vector.shape_cast %51 : vector<8x16x8xbf16> to vector<128x8xbf16>
    %c0_38 = arith.constant 0 : index
    %c3 = arith.constant 3 : index
    %c0_39 = arith.constant 0 : index
    %c0_40 = arith.constant 0 : index
    %53 = vector.load %arg5[%c0_38, %c3, %c0_39, %c0_40] : memref<2x9x8x32xbf16, #tpu.memory_space<vmem>>, vector<1x1x8x32xbf16>
    %54 = vector.shape_cast %53 : vector<1x1x8x32xbf16> to vector<8x32xbf16>
    %cst_41 = arith.constant dense<0.000000e+00> : vector<128x32xf32>
    %55 = tpu.matmul %52, %54, %cst_41 {dimension_numbers = #tpu.dot_dimension_numbers<[1], [0], [0], [1], [0, 0, 1, 1], [], []>} : vector<128x8xbf16>, vector<8x32xbf16>, vector<128x32xf32> -> vector<128x32xf32>
    %56 = arith.addf %46, %55 : vector<128x32xf32>
    %c0_42 = arith.constant 0 : index
    %57 = arith.index_cast %48 : i32 to index
    %c4_43 = arith.constant 4 : index
    %c0_44 = arith.constant 0 : index
    %58 = vector.load %arg3[%c0_42, %57, %c4_43, %c0_44] : memref<1x40x24x8xbf16, #tpu.memory_space<vmem>>, vector<1x8x16x8xbf16>
    %59 = vector.shape_cast %58 : vector<1x8x16x8xbf16> to vector<8x16x8xbf16>
    %60 = vector.shape_cast %59 : vector<8x16x8xbf16> to vector<128x8xbf16>
    %c0_45 = arith.constant 0 : index
    %c4_46 = arith.constant 4 : index
    %c0_47 = arith.constant 0 : index
    %c0_48 = arith.constant 0 : index
    %61 = vector.load %arg5[%c0_45, %c4_46, %c0_47, %c0_48] : memref<2x9x8x32xbf16, #tpu.memory_space<vmem>>, vector<1x1x8x32xbf16>
    %62 = vector.shape_cast %61 : vector<1x1x8x32xbf16> to vector<8x32xbf16>
    %cst_49 = arith.constant dense<0.000000e+00> : vector<128x32xf32>
    %63 = tpu.matmul %60, %62, %cst_49 {dimension_numbers = #tpu.dot_dimension_numbers<[1], [0], [0], [1], [0, 0, 1, 1], [], []>} : vector<128x8xbf16>, vector<8x32xbf16>, vector<128x32xf32> -> vector<128x32xf32>
    %64 = arith.addf %56, %63 : vector<128x32xf32>
    %c0_50 = arith.constant 0 : index
    %65 = arith.index_cast %48 : i32 to index
    %c6_51 = arith.constant 6 : index
    %c0_52 = arith.constant 0 : index
    %66 = vector.load %arg3[%c0_50, %65, %c6_51, %c0_52] : memref<1x40x24x8xbf16, #tpu.memory_space<vmem>>, vector<1x8x16x8xbf16>
    %67 = vector.shape_cast %66 : vector<1x8x16x8xbf16> to vector<8x16x8xbf16>
    %68 = vector.shape_cast %67 : vector<8x16x8xbf16> to vector<128x8xbf16>
    %c0_53 = arith.constant 0 : index
    %c5 = arith.constant 5 : index
    %c0_54 = arith.constant 0 : index
    %c0_55 = arith.constant 0 : index
    %69 = vector.load %arg5[%c0_53, %c5, %c0_54, %c0_55] : memref<2x9x8x32xbf16, #tpu.memory_space<vmem>>, vector<1x1x8x32xbf16>
    %70 = vector.shape_cast %69 : vector<1x1x8x32xbf16> to vector<8x32xbf16>
    %cst_56 = arith.constant dense<0.000000e+00> : vector<128x32xf32>
    %71 = tpu.matmul %68, %70, %cst_56 {dimension_numbers = #tpu.dot_dimension_numbers<[1], [0], [0], [1], [0, 0, 1, 1], [], []>} : vector<128x8xbf16>, vector<8x32xbf16>, vector<128x32xf32> -> vector<128x32xf32>
    %72 = arith.addf %64, %71 : vector<128x32xf32>
    %c4_i32_57 = arith.constant 4 : i32
    %73 = arith.addi %c4_i32_57, %1 : i32
    %c2_i32 = arith.constant 2 : i32
    %74 = arith.addi %73, %c2_i32 : i32
    %c0_58 = arith.constant 0 : index
    %75 = arith.index_cast %74 : i32 to index
    %c2_59 = arith.constant 2 : index
    %c0_60 = arith.constant 0 : index
    %76 = vector.load %arg3[%c0_58, %75, %c2_59, %c0_60] : memref<1x40x24x8xbf16, #tpu.memory_space<vmem>>, vector<1x8x16x8xbf16>
    %77 = vector.shape_cast %76 : vector<1x8x16x8xbf16> to vector<8x16x8xbf16>
    %78 = vector.shape_cast %77 : vector<8x16x8xbf16> to vector<128x8xbf16>
    %c0_61 = arith.constant 0 : index
    %c6_62 = arith.constant 6 : index
    %c0_63 = arith.constant 0 : index
    %c0_64 = arith.constant 0 : index
    %79 = vector.load %arg5[%c0_61, %c6_62, %c0_63, %c0_64] : memref<2x9x8x32xbf16, #tpu.memory_space<vmem>>, vector<1x1x8x32xbf16>
    %80 = vector.shape_cast %79 : vector<1x1x8x32xbf16> to vector<8x32xbf16>
    %cst_65 = arith.constant dense<0.000000e+00> : vector<128x32xf32>
    %81 = tpu.matmul %78, %80, %cst_65 {dimension_numbers = #tpu.dot_dimension_numbers<[1], [0], [0], [1], [0, 0, 1, 1], [], []>} : vector<128x8xbf16>, vector<8x32xbf16>, vector<128x32xf32> -> vector<128x32xf32>
    %82 = arith.addf %72, %81 : vector<128x32xf32>
    %c0_66 = arith.constant 0 : index
    %83 = arith.index_cast %74 : i32 to index
    %c4_67 = arith.constant 4 : index
    %c0_68 = arith.constant 0 : index
    %84 = vector.load %arg3[%c0_66, %83, %c4_67, %c0_68] : memref<1x40x24x8xbf16, #tpu.memory_space<vmem>>, vector<1x8x16x8xbf16>
    %85 = vector.shape_cast %84 : vector<1x8x16x8xbf16> to vector<8x16x8xbf16>
    %86 = vector.shape_cast %85 : vector<8x16x8xbf16> to vector<128x8xbf16>
    %c0_69 = arith.constant 0 : index
    %c7 = arith.constant 7 : index
    %c0_70 = arith.constant 0 : index
    %c0_71 = arith.constant 0 : index
    %87 = vector.load %arg5[%c0_69, %c7, %c0_70, %c0_71] : memref<2x9x8x32xbf16, #tpu.memory_space<vmem>>, vector<1x1x8x32xbf16>
    %88 = vector.shape_cast %87 : vector<1x1x8x32xbf16> to vector<8x32xbf16>
    %cst_72 = arith.constant dense<0.000000e+00> : vector<128x32xf32>
    %89 = tpu.matmul %86, %88, %cst_72 {dimension_numbers = #tpu.dot_dimension_numbers<[1], [0], [0], [1], [0, 0, 1, 1], [], []>} : vector<128x8xbf16>, vector<8x32xbf16>, vector<128x32xf32> -> vector<128x32xf32>
    %90 = arith.addf %82, %89 : vector<128x32xf32>
    %c0_73 = arith.constant 0 : index
    %91 = arith.index_cast %74 : i32 to index
    %c6_74 = arith.constant 6 : index
    %c0_75 = arith.constant 0 : index
    %92 = vector.load %arg3[%c0_73, %91, %c6_74, %c0_75] : memref<1x40x24x8xbf16, #tpu.memory_space<vmem>>, vector<1x8x16x8xbf16>
    %93 = vector.shape_cast %92 : vector<1x8x16x8xbf16> to vector<8x16x8xbf16>
    %94 = vector.shape_cast %93 : vector<8x16x8xbf16> to vector<128x8xbf16>
    %c0_76 = arith.constant 0 : index
    %c8 = arith.constant 8 : index
    %c0_77 = arith.constant 0 : index
    %c0_78 = arith.constant 0 : index
    %95 = vector.load %arg5[%c0_76, %c8, %c0_77, %c0_78] : memref<2x9x8x32xbf16, #tpu.memory_space<vmem>>, vector<1x1x8x32xbf16>
    %96 = vector.shape_cast %95 : vector<1x1x8x32xbf16> to vector<8x32xbf16>
    %cst_79 = arith.constant dense<0.000000e+00> : vector<128x32xf32>
    %97 = tpu.matmul %94, %96, %cst_79 {dimension_numbers = #tpu.dot_dimension_numbers<[1], [0], [0], [1], [0, 0, 1, 1], [], []>} : vector<128x8xbf16>, vector<8x32xbf16>, vector<128x32xf32> -> vector<128x32xf32>
    %98 = arith.addf %90, %97 : vector<128x32xf32>
    %c1_80 = arith.constant 1 : index
    %c0_81 = arith.constant 0 : index
    %99 = vector.load %arg7[%c1_80, %c0_81] : memref<4x32xf32, #tpu.memory_space<vmem>>, vector<1x32xf32>
    %100 = vector.broadcast %99 : vector<1x32xf32> to vector<128x32xf32>
    %101 = arith.mulf %98, %100 : vector<128x32xf32>
    %c1_82 = arith.constant 1 : index
    %c0_83 = arith.constant 0 : index
    %102 = vector.load %arg8[%c1_82, %c0_83] : memref<4x32xf32, #tpu.memory_space<vmem>>, vector<1x32xf32>
    %103 = vector.broadcast %102 : vector<1x32xf32> to vector<128x32xf32>
    %104 = arith.addf %101, %103 : vector<128x32xf32>
    %cst_84 = arith.constant 0.000000e+00 : f32
    %105 = vector.broadcast %cst_84 : f32 to vector<128x32xf32>
    %106 = arith.maximumf %104, %105 : vector<128x32xf32>
    %107 = arith.truncf %106 : vector<128x32xf32> to vector<128x32xbf16>
    %c32 = arith.constant 32 : index
    %c0_85 = arith.constant 0 : index
    %108 = vector.load %arg6[%c32, %c0_85] : memref<96x32xbf16, #tpu.memory_space<vmem>>, vector<32x32xbf16>
    %cst_86 = arith.constant dense<0.000000e+00> : vector<128x32xf32>
    %109 = tpu.matmul %107, %108, %cst_86 {dimension_numbers = #tpu.dot_dimension_numbers<[1], [0], [0], [1], [0, 0, 1, 1], [], []>} : vector<128x32xbf16>, vector<32x32xbf16>, vector<128x32xf32> -> vector<128x32xf32>
    %110 = arith.addf %19, %109 : vector<128x32xf32>
    %cst_87 = arith.constant 0.000000e+00 : f32
    %111 = vector.broadcast %cst_87 : f32 to vector<128x32xf32>
    %c4_i32_88 = arith.constant 4 : i32
    %112 = arith.addi %c4_i32_88, %1 : i32
    %c-4_i32 = arith.constant -4 : i32
    %113 = arith.addi %112, %c-4_i32 : i32
    %c0_89 = arith.constant 0 : index
    %114 = arith.index_cast %113 : i32 to index
    %c0_90 = arith.constant 0 : index
    %c0_91 = arith.constant 0 : index
    %115 = vector.load %arg3[%c0_89, %114, %c0_90, %c0_91] : memref<1x40x24x8xbf16, #tpu.memory_space<vmem>>, vector<1x8x16x8xbf16>
    %116 = vector.shape_cast %115 : vector<1x8x16x8xbf16> to vector<8x16x8xbf16>
    %117 = vector.shape_cast %116 : vector<8x16x8xbf16> to vector<128x8xbf16>
    %c1_92 = arith.constant 1 : index
    %c0_93 = arith.constant 0 : index
    %c0_94 = arith.constant 0 : index
    %c0_95 = arith.constant 0 : index
    %118 = vector.load %arg5[%c1_92, %c0_93, %c0_94, %c0_95] : memref<2x9x8x32xbf16, #tpu.memory_space<vmem>>, vector<1x1x8x32xbf16>
    %119 = vector.shape_cast %118 : vector<1x1x8x32xbf16> to vector<8x32xbf16>
    %cst_96 = arith.constant dense<0.000000e+00> : vector<128x32xf32>
    %120 = tpu.matmul %117, %119, %cst_96 {dimension_numbers = #tpu.dot_dimension_numbers<[1], [0], [0], [1], [0, 0, 1, 1], [], []>} : vector<128x8xbf16>, vector<8x32xbf16>, vector<128x32xf32> -> vector<128x32xf32>
    %121 = arith.addf %111, %120 : vector<128x32xf32>
    %c0_97 = arith.constant 0 : index
    %122 = arith.index_cast %113 : i32 to index
    %c4_98 = arith.constant 4 : index
    %c0_99 = arith.constant 0 : index
    %123 = vector.load %arg3[%c0_97, %122, %c4_98, %c0_99] : memref<1x40x24x8xbf16, #tpu.memory_space<vmem>>, vector<1x8x16x8xbf16>
    %124 = vector.shape_cast %123 : vector<1x8x16x8xbf16> to vector<8x16x8xbf16>
    %125 = vector.shape_cast %124 : vector<8x16x8xbf16> to vector<128x8xbf16>
    %c1_100 = arith.constant 1 : index
    %c1_101 = arith.constant 1 : index
    %c0_102 = arith.constant 0 : index
    %c0_103 = arith.constant 0 : index
    %126 = vector.load %arg5[%c1_100, %c1_101, %c0_102, %c0_103] : memref<2x9x8x32xbf16, #tpu.memory_space<vmem>>, vector<1x1x8x32xbf16>
    %127 = vector.shape_cast %126 : vector<1x1x8x32xbf16> to vector<8x32xbf16>
    %cst_104 = arith.constant dense<0.000000e+00> : vector<128x32xf32>
    %128 = tpu.matmul %125, %127, %cst_104 {dimension_numbers = #tpu.dot_dimension_numbers<[1], [0], [0], [1], [0, 0, 1, 1], [], []>} : vector<128x8xbf16>, vector<8x32xbf16>, vector<128x32xf32> -> vector<128x32xf32>
    %129 = arith.addf %121, %128 : vector<128x32xf32>
    %c0_105 = arith.constant 0 : index
    %130 = arith.index_cast %113 : i32 to index
    %c8_106 = arith.constant 8 : index
    %c0_107 = arith.constant 0 : index
    %131 = vector.load %arg3[%c0_105, %130, %c8_106, %c0_107] : memref<1x40x24x8xbf16, #tpu.memory_space<vmem>>, vector<1x8x16x8xbf16>
    %132 = vector.shape_cast %131 : vector<1x8x16x8xbf16> to vector<8x16x8xbf16>
    %133 = vector.shape_cast %132 : vector<8x16x8xbf16> to vector<128x8xbf16>
    %c1_108 = arith.constant 1 : index
    %c2_109 = arith.constant 2 : index
    %c0_110 = arith.constant 0 : index
    %c0_111 = arith.constant 0 : index
    %134 = vector.load %arg5[%c1_108, %c2_109, %c0_110, %c0_111] : memref<2x9x8x32xbf16, #tpu.memory_space<vmem>>, vector<1x1x8x32xbf16>
    %135 = vector.shape_cast %134 : vector<1x1x8x32xbf16> to vector<8x32xbf16>
    %cst_112 = arith.constant dense<0.000000e+00> : vector<128x32xf32>
    %136 = tpu.matmul %133, %135, %cst_112 {dimension_numbers = #tpu.dot_dimension_numbers<[1], [0], [0], [1], [0, 0, 1, 1], [], []>} : vector<128x8xbf16>, vector<8x32xbf16>, vector<128x32xf32> -> vector<128x32xf32>
    %137 = arith.addf %129, %136 : vector<128x32xf32>
    %c4_i32_113 = arith.constant 4 : i32
    %138 = arith.addi %c4_i32_113, %1 : i32
    %c0_i32_114 = arith.constant 0 : i32
    %139 = arith.addi %138, %c0_i32_114 : i32
    %c0_115 = arith.constant 0 : index
    %140 = arith.index_cast %139 : i32 to index
    %c0_116 = arith.constant 0 : index
    %c0_117 = arith.constant 0 : index
    %141 = vector.load %arg3[%c0_115, %140, %c0_116, %c0_117] : memref<1x40x24x8xbf16, #tpu.memory_space<vmem>>, vector<1x8x16x8xbf16>
    %142 = vector.shape_cast %141 : vector<1x8x16x8xbf16> to vector<8x16x8xbf16>
    %143 = vector.shape_cast %142 : vector<8x16x8xbf16> to vector<128x8xbf16>
    %c1_118 = arith.constant 1 : index
    %c3_119 = arith.constant 3 : index
    %c0_120 = arith.constant 0 : index
    %c0_121 = arith.constant 0 : index
    %144 = vector.load %arg5[%c1_118, %c3_119, %c0_120, %c0_121] : memref<2x9x8x32xbf16, #tpu.memory_space<vmem>>, vector<1x1x8x32xbf16>
    %145 = vector.shape_cast %144 : vector<1x1x8x32xbf16> to vector<8x32xbf16>
    %cst_122 = arith.constant dense<0.000000e+00> : vector<128x32xf32>
    %146 = tpu.matmul %143, %145, %cst_122 {dimension_numbers = #tpu.dot_dimension_numbers<[1], [0], [0], [1], [0, 0, 1, 1], [], []>} : vector<128x8xbf16>, vector<8x32xbf16>, vector<128x32xf32> -> vector<128x32xf32>
    %147 = arith.addf %137, %146 : vector<128x32xf32>
    %c0_123 = arith.constant 0 : index
    %148 = arith.index_cast %139 : i32 to index
    %c4_124 = arith.constant 4 : index
    %c0_125 = arith.constant 0 : index
    %149 = vector.load %arg3[%c0_123, %148, %c4_124, %c0_125] : memref<1x40x24x8xbf16, #tpu.memory_space<vmem>>, vector<1x8x16x8xbf16>
    %150 = vector.shape_cast %149 : vector<1x8x16x8xbf16> to vector<8x16x8xbf16>
    %151 = vector.shape_cast %150 : vector<8x16x8xbf16> to vector<128x8xbf16>
    %c1_126 = arith.constant 1 : index
    %c4_127 = arith.constant 4 : index
    %c0_128 = arith.constant 0 : index
    %c0_129 = arith.constant 0 : index
    %152 = vector.load %arg5[%c1_126, %c4_127, %c0_128, %c0_129] : memref<2x9x8x32xbf16, #tpu.memory_space<vmem>>, vector<1x1x8x32xbf16>
    %153 = vector.shape_cast %152 : vector<1x1x8x32xbf16> to vector<8x32xbf16>
    %cst_130 = arith.constant dense<0.000000e+00> : vector<128x32xf32>
    %154 = tpu.matmul %151, %153, %cst_130 {dimension_numbers = #tpu.dot_dimension_numbers<[1], [0], [0], [1], [0, 0, 1, 1], [], []>} : vector<128x8xbf16>, vector<8x32xbf16>, vector<128x32xf32> -> vector<128x32xf32>
    %155 = arith.addf %147, %154 : vector<128x32xf32>
    %c0_131 = arith.constant 0 : index
    %156 = arith.index_cast %139 : i32 to index
    %c8_132 = arith.constant 8 : index
    %c0_133 = arith.constant 0 : index
    %157 = vector.load %arg3[%c0_131, %156, %c8_132, %c0_133] : memref<1x40x24x8xbf16, #tpu.memory_space<vmem>>, vector<1x8x16x8xbf16>
    %158 = vector.shape_cast %157 : vector<1x8x16x8xbf16> to vector<8x16x8xbf16>
    %159 = vector.shape_cast %158 : vector<8x16x8xbf16> to vector<128x8xbf16>
    %c1_134 = arith.constant 1 : index
    %c5_135 = arith.constant 5 : index
    %c0_136 = arith.constant 0 : index
    %c0_137 = arith.constant 0 : index
    %160 = vector.load %arg5[%c1_134, %c5_135, %c0_136, %c0_137] : memref<2x9x8x32xbf16, #tpu.memory_space<vmem>>, vector<1x1x8x32xbf16>
    %161 = vector.shape_cast %160 : vector<1x1x8x32xbf16> to vector<8x32xbf16>
    %cst_138 = arith.constant dense<0.000000e+00> : vector<128x32xf32>
    %162 = tpu.matmul %159, %161, %cst_138 {dimension_numbers = #tpu.dot_dimension_numbers<[1], [0], [0], [1], [0, 0, 1, 1], [], []>} : vector<128x8xbf16>, vector<8x32xbf16>, vector<128x32xf32> -> vector<128x32xf32>
    %163 = arith.addf %155, %162 : vector<128x32xf32>
    %c4_i32_139 = arith.constant 4 : i32
    %164 = arith.addi %c4_i32_139, %1 : i32
    %c4_i32_140 = arith.constant 4 : i32
    %165 = arith.addi %164, %c4_i32_140 : i32
    %c0_141 = arith.constant 0 : index
    %166 = arith.index_cast %165 : i32 to index
    %c0_142 = arith.constant 0 : index
    %c0_143 = arith.constant 0 : index
    %167 = vector.load %arg3[%c0_141, %166, %c0_142, %c0_143] : memref<1x40x24x8xbf16, #tpu.memory_space<vmem>>, vector<1x8x16x8xbf16>
    %168 = vector.shape_cast %167 : vector<1x8x16x8xbf16> to vector<8x16x8xbf16>
    %169 = vector.shape_cast %168 : vector<8x16x8xbf16> to vector<128x8xbf16>
    %c1_144 = arith.constant 1 : index
    %c6_145 = arith.constant 6 : index
    %c0_146 = arith.constant 0 : index
    %c0_147 = arith.constant 0 : index
    %170 = vector.load %arg5[%c1_144, %c6_145, %c0_146, %c0_147] : memref<2x9x8x32xbf16, #tpu.memory_space<vmem>>, vector<1x1x8x32xbf16>
    %171 = vector.shape_cast %170 : vector<1x1x8x32xbf16> to vector<8x32xbf16>
    %cst_148 = arith.constant dense<0.000000e+00> : vector<128x32xf32>
    %172 = tpu.matmul %169, %171, %cst_148 {dimension_numbers = #tpu.dot_dimension_numbers<[1], [0], [0], [1], [0, 0, 1, 1], [], []>} : vector<128x8xbf16>, vector<8x32xbf16>, vector<128x32xf32> -> vector<128x32xf32>
    %173 = arith.addf %163, %172 : vector<128x32xf32>
    %c0_149 = arith.constant 0 : index
    %174 = arith.index_cast %165 : i32 to index
    %c4_150 = arith.constant 4 : index
    %c0_151 = arith.constant 0 : index
    %175 = vector.load %arg3[%c0_149, %174, %c4_150, %c0_151] : memref<1x40x24x8xbf16, #tpu.memory_space<vmem>>, vector<1x8x16x8xbf16>
    %176 = vector.shape_cast %175 : vector<1x8x16x8xbf16> to vector<8x16x8xbf16>
    %177 = vector.shape_cast %176 : vector<8x16x8xbf16> to vector<128x8xbf16>
    %c1_152 = arith.constant 1 : index
    %c7_153 = arith.constant 7 : index
    %c0_154 = arith.constant 0 : index
    %c0_155 = arith.constant 0 : index
    %178 = vector.load %arg5[%c1_152, %c7_153, %c0_154, %c0_155] : memref<2x9x8x32xbf16, #tpu.memory_space<vmem>>, vector<1x1x8x32xbf16>
    %179 = vector.shape_cast %178 : vector<1x1x8x32xbf16> to vector<8x32xbf16>
    %cst_156 = arith.constant dense<0.000000e+00> : vector<128x32xf32>
    %180 = tpu.matmul %177, %179, %cst_156 {dimension_numbers = #tpu.dot_dimension_numbers<[1], [0], [0], [1], [0, 0, 1, 1], [], []>} : vector<128x8xbf16>, vector<8x32xbf16>, vector<128x32xf32> -> vector<128x32xf32>
    %181 = arith.addf %173, %180 : vector<128x32xf32>
    %c0_157 = arith.constant 0 : index
    %182 = arith.index_cast %165 : i32 to index
    %c8_158 = arith.constant 8 : index
    %c0_159 = arith.constant 0 : index
    %183 = vector.load %arg3[%c0_157, %182, %c8_158, %c0_159] : memref<1x40x24x8xbf16, #tpu.memory_space<vmem>>, vector<1x8x16x8xbf16>
    %184 = vector.shape_cast %183 : vector<1x8x16x8xbf16> to vector<8x16x8xbf16>
    %185 = vector.shape_cast %184 : vector<8x16x8xbf16> to vector<128x8xbf16>
    %c1_160 = arith.constant 1 : index
    %c8_161 = arith.constant 8 : index
    %c0_162 = arith.constant 0 : index
    %c0_163 = arith.constant 0 : index
    %186 = vector.load %arg5[%c1_160, %c8_161, %c0_162, %c0_163] : memref<2x9x8x32xbf16, #tpu.memory_space<vmem>>, vector<1x1x8x32xbf16>
    %187 = vector.shape_cast %186 : vector<1x1x8x32xbf16> to vector<8x32xbf16>
    %cst_164 = arith.constant dense<0.000000e+00> : vector<128x32xf32>
    %188 = tpu.matmul %185, %187, %cst_164 {dimension_numbers = #tpu.dot_dimension_numbers<[1], [0], [0], [1], [0, 0, 1, 1], [], []>} : vector<128x8xbf16>, vector<8x32xbf16>, vector<128x32xf32> -> vector<128x32xf32>
    %189 = arith.addf %181, %188 : vector<128x32xf32>
    %c2_165 = arith.constant 2 : index
    %c0_166 = arith.constant 0 : index
    %190 = vector.load %arg7[%c2_165, %c0_166] : memref<4x32xf32, #tpu.memory_space<vmem>>, vector<1x32xf32>
    %191 = vector.broadcast %190 : vector<1x32xf32> to vector<128x32xf32>
    %192 = arith.mulf %189, %191 : vector<128x32xf32>
    %c2_167 = arith.constant 2 : index
    %c0_168 = arith.constant 0 : index
    %193 = vector.load %arg8[%c2_167, %c0_168] : memref<4x32xf32, #tpu.memory_space<vmem>>, vector<1x32xf32>
    %194 = vector.broadcast %193 : vector<1x32xf32> to vector<128x32xf32>
    %195 = arith.addf %192, %194 : vector<128x32xf32>
    %cst_169 = arith.constant 0.000000e+00 : f32
    %196 = vector.broadcast %cst_169 : f32 to vector<128x32xf32>
    %197 = arith.maximumf %195, %196 : vector<128x32xf32>
    %198 = arith.truncf %197 : vector<128x32xf32> to vector<128x32xbf16>
    %c64 = arith.constant 64 : index
    %c0_170 = arith.constant 0 : index
    %199 = vector.load %arg6[%c64, %c0_170] : memref<96x32xbf16, #tpu.memory_space<vmem>>, vector<32x32xbf16>
    %cst_171 = arith.constant dense<0.000000e+00> : vector<128x32xf32>
    %200 = tpu.matmul %198, %199, %cst_171 {dimension_numbers = #tpu.dot_dimension_numbers<[1], [0], [0], [1], [0, 0, 1, 1], [], []>} : vector<128x32xbf16>, vector<32x32xbf16>, vector<128x32xf32> -> vector<128x32xf32>
    %201 = arith.addf %110, %200 : vector<128x32xf32>
    %c0_172 = arith.constant 0 : index
    %c0_173 = arith.constant 0 : index
    %c0_174 = arith.constant 0 : index
    %202 = vector.load %arg2[%c0_172, %c0_173, %c0_174] : memref<1x1x32xf32, #tpu.memory_space<vmem>>, vector<1x1x32xf32>
    %203 = vector.shape_cast %202 : vector<1x1x32xf32> to vector<1x32xf32>
    %204 = vector.broadcast %203 : vector<1x32xf32> to vector<128x32xf32>
    %205 = arith.addf %201, %204 : vector<128x32xf32>
    %c3_175 = arith.constant 3 : index
    %c0_176 = arith.constant 0 : index
    %206 = vector.load %arg7[%c3_175, %c0_176] : memref<4x32xf32, #tpu.memory_space<vmem>>, vector<1x32xf32>
    %207 = vector.broadcast %206 : vector<1x32xf32> to vector<128x32xf32>
    %208 = arith.mulf %205, %207 : vector<128x32xf32>
    %c3_177 = arith.constant 3 : index
    %c0_178 = arith.constant 0 : index
    %209 = vector.load %arg8[%c3_177, %c0_178] : memref<4x32xf32, #tpu.memory_space<vmem>>, vector<1x32xf32>
    %210 = vector.broadcast %209 : vector<1x32xf32> to vector<128x32xf32>
    %211 = arith.addf %208, %210 : vector<128x32xf32>
    %cst_179 = arith.constant 0.000000e+00 : f32
    %212 = vector.broadcast %cst_179 : f32 to vector<128x32xf32>
    %213 = arith.maximumf %211, %212 : vector<128x32xf32>
    %214 = vector.shape_cast %213 : vector<128x32xf32> to vector<1x8x16x32xf32>
    %215 = arith.truncf %214 : vector<1x8x16x32xf32> to vector<1x8x16x32xbf16>
    %c0_180 = arith.constant 0 : index
    %c0_181 = arith.constant 0 : index
    %c0_182 = arith.constant 0 : index
    %c0_183 = arith.constant 0 : index
    %216 = vector.load %arg9[%c0_180, %c0_181, %c0_182, %c0_183] : memref<1x8x16x32xbf16, #tpu.memory_space<vmem>>, vector<1x8x16x32xbf16>
    tpu.vector_store %arg9[%c0_180, %c0_181, %c0_182, %c0_183], %215 {strides = array<i32>} : memref<1x8x16x32xbf16, #tpu.memory_space<vmem>>, vector<1x8x16x32xbf16>,
    return
  }
  func.func @transform_0(%arg0: i32, %arg1: i32) -> (i32, i32, i32) {
    %c0_i32 = arith.constant 0 : i32
    %c0_i32_0 = arith.constant 0 : i32
    %c0_i32_1 = arith.constant 0 : i32
    return %arg0, %c0_i32, %c0_i32_0 : i32, i32, i32
  }
  func.func @transform_1(%arg0: i32, %arg1: i32) -> (i32, i32, i32, i32) {
    %c0_i32 = arith.constant 0 : i32
    %c0_i32_0 = arith.constant 0 : i32
    %c0_i32_1 = arith.constant 0 : i32
    %c0_i32_2 = arith.constant 0 : i32
    return %arg0, %c0_i32, %c0_i32_0, %c0_i32_1 : i32, i32, i32, i32
  }
  func.func @transform_2(%arg0: i32, %arg1: i32) -> (i32, i32) {
    %c0_i32 = arith.constant 0 : i32
    %c0_i32_0 = arith.constant 0 : i32
    %c0_i32_1 = arith.constant 0 : i32
    return %c0_i32, %c0_i32_0 : i32, i32
  }
  func.func @transform_3(%arg0: i32, %arg1: i32) -> (i32, i32, i32, i32) {
    %c0_i32 = arith.constant 0 : i32
    %c0_i32_0 = arith.constant 0 : i32
    %c0_i32_1 = arith.constant 0 : i32
    %c0_i32_2 = arith.constant 0 : i32
    %c0_i32_3 = arith.constant 0 : i32
    return %c0_i32, %c0_i32_0, %c0_i32_1, %c0_i32_2 : i32, i32, i32, i32
  }
  func.func @transform_4(%arg0: i32, %arg1: i32) -> (i32, i32) {
    %c0_i32 = arith.constant 0 : i32
    %c0_i32_0 = arith.constant 0 : i32
    %c0_i32_1 = arith.constant 0 : i32
    return %c0_i32, %c0_i32_0 : i32, i32
  }
  func.func @transform_5(%arg0: i32, %arg1: i32) -> (i32, i32) {
    %c0_i32 = arith.constant 0 : i32
    %c0_i32_0 = arith.constant 0 : i32
    %c0_i32_1 = arith.constant 0 : i32
    return %c0_i32, %c0_i32_0 : i32, i32
  }
  func.func @transform_6(%arg0: i32, %arg1: i32) -> (i32, i32) {
    %c0_i32 = arith.constant 0 : i32
    %c0_i32_0 = arith.constant 0 : i32
    %c0_i32_1 = arith.constant 0 : i32
    return %c0_i32, %c0_i32_0 : i32, i32
  }
  func.func @transform_7(%arg0: i32, %arg1: i32) -> (i32, i32, i32, i32) {
    %c0_i32 = arith.constant 0 : i32
    %c0_i32_0 = arith.constant 0 : i32
    %c0_i32_1 = arith.constant 0 : i32
    return %arg0, %arg1, %c0_i32, %c0_i32_0 : i32, i32, i32, i32
  }
}

</mosaic_0001>

<bundles_post_ra>
// kernel: tpu_custom_call.1
= control target key start
LH: loop header
LB: loop body
LE: loop exit
PB: predicated region body
PF: predicated region fallthrough
CT: control target
= control target key end

     0   :  { %12 = vsyncpa [#allocation3], 0  ;;  %s7025_s0 = inlined_call_operand.vmem [shape: f32[2,1,32], index: 0, kind: input, shape index: {}]   ;;  %s7026_s1 = inlined_call_operand.vmem [shape: bf16[2,40,24,8], index: 1, kind: input, shape index: {}]   ;;  %s7027_s2 = inlined_call_operand.vmem [shape: bf16[8,32], index: 2, kind: input, shape index: {}]   ;;  %s7028_s3 = inlined_call_operand.vmem [shape: bf16[2,9,8,32], index: 3, kind: input, shape index: {}]   ;;  %s7029_s4 = inlined_call_operand.vmem [shape: bf16[96,32], index: 4, kind: input, shape index: {}]   ;;  %s7030_s5 = inlined_call_operand.vmem [shape: f32[4,32], index: 5, kind: input, shape index: {}]   ;;  %s7031_s6 = inlined_call_operand.vmem [shape: f32[4,32], index: 6, kind: input, shape index: {}]   ;;  %s7032_s7 = inlined_call_operand.hbm [shape: bf16[2,32,16,32], index: 7, kind: output, shape index: {}]  }
   0x1   :  { %14 = vsyncpa [#allocation3 + $0x1], 0  ;;  %s5230_s24 = smov 0   ;;  %s5232_s25 = smov 0  }
   0x2   :  { %s5234_s26 = smov 0   ;;  %s5236_s27 = smov 0  }
   0x3   :  { %s5238_s28 = smov 0   ;;  %s5240_s29 = smov 0  }
   0x4   :  { %s5242_s30 = smov 0   ;;  %s5244_s8 = smov 0  }
   0x5 LB: > { %s4261_s9 = sadd.s32 4294967295, %s5186_s8   ;;  %s4262_s10 = sadd.s32 4294967294, %s5186_s8   ;;  %s5186_s8 = sphi %s5244_s8, %s20_s8   ;;  %s5182_s30 = sphi %s5242_s30, %s7050_s30   ;;  %s5178_s29 = sphi %s5240_s29, %s7049_s29   ;;  %s5174_s28 = sphi %s5238_s28, %s7048_s28   ;;  %s5170_s27 = sphi %s5236_s27, %s7047_s27   ;;  %s5166_s26 = sphi %s5234_s26, %s7046_s26   ;;  %s5162_s25 = sphi %s5232_s25, %s7045_s25   ;;  %s5158_s24 = sphi %s5230_s24, %s7044_s24  }
   0x6   : > { %s29_s11 = sadd.s32 1, %s5178_s29  ;;  %s32_s12 = sadd.s32 1, %s5182_s30 }
   0x7   : > { %p30_p0 = scmp.ge.s32.totalorder %s29_s11, 4  ;;  %p208_p1 = scmp.ne.s32.totalorder %s5166_s26, %s5162_s25 }
   0x8   : > { %p209_p2 = scmp.eq.s32.totalorder %s4261_s9, 7  ;;  %p214_p5 = scmp.ne.s32.totalorder %s5162_s25, %s5158_s24 }
   0x9   : > { %s7052_s11 = smov (%p30_p0, %s29_s11), 0  ;;  %s7054_s12 = smov (!%p30_p0, %s32_s12), %s5182_s30 }
   0xa   : > { %s194_s13 = ssub.s32 %s5178_s29, %s7052_s11  ;;  %p5281_p3 = por %p209_p2, %p208_p1 }
   0xb   : > { %p34_p4 = scmp.ge.s32.totalorder %s7054_s12, 2  ;;  %p215_p6 = scmp.eq.s32.totalorder %s4262_s10, 7 }
   0xc   : > { %p4265_p7 = scmp.ge.s32.totalorder %s5186_s8, 1  ;;  %p262_p9 = scmp.lt.s32.totalorder %s5186_s8, 9 }
   0xd   : > { %s7056_s12 = smov (%p34_p4, %s7054_s12), 0  ;;  %p5290_p8 = por %p215_p6, %p214_p5 }
   0xe   : > { %s193_s16 = ssub.s32 %s5182_s30, %s7056_s12  ;;  %s198_s17 = sadd.s32 1, %s5166_s26 }
   0xf   : > { %s195_s18 = sor.u32 %s194_s13, %s193_s16  ;;  %p263_p10 = pnand %p4265_p7, %p262_p9 }
  0x10   : > { %p196_p11 = scmp.eq.s32.totalorder %s195_s18, 0 }
  0x11   : > { %266 = sbr.rel (%p263_p10) target bundleno = 1060 (0x424), region = 48 }
  0x12   : > { %s5299_s19 = scalar_select %p196_p11, %s5166_s26, %s198_s17  }
  0x16   : > { %v419_v0 = vld [vmem:[%s7027_s2] sm:$0xf]  ;;  %vm469_vm0 = vcmask 1043456   ;;  %v4369_v1 = vld [vmem:[%s7028_s3 + $0x4] sm:$0xf]  ;;  %p297_p12 = scmp.lt.s32.totalorder %s5174_s28, 1 }
  0x17   : > { %v471_v2 = vsel %vm469_vm0, %v419_v0, 0  ;;  %v837_v3 = vsel %vm469_vm0, %v4369_v1, 0  ;;  %s4270_s9 = smul.u32 96, %s5170_s27  ;;  %vm360_vm1 = vcmask 1041408   ;;  %v697_v4 = vld [vmem:[%s7028_s3] sm:$0xf] }
  0x18   : > { %4999 = vmatpush.bf16.msra.mxu2 %v471_v2  ;;  %5000 = vmatpush.bf16.msra.mxu3 %v837_v3  ;;  %s5312_s10 = scalar_select %p297_p12, %s5174_s28, 1  ;;  %v4410_v5 = vld [vmem:[%s7028_s3 + $0x8] sm:$0xf]  ;;  %v937_v6 = vsel %vm469_vm0, %v697_v4, 0  ;;  %v4443_v8 = vld [vmem:[%s7028_s3 + $0xc] sm:$0xf] }
  0x19   : > { %480 = vmatpush.bf16.msra.mxu0 %v471_v2  ;;  %846 = vmatpush.bf16.msra.mxu1 %v837_v3  ;;  %v1130_v7 = vsel %vm469_vm0, %v4410_v5, 0  ;;  %v4452_v9 = vld [vmem:[%s7028_s3 + $0x10] sm:$0xf]  ;;  %vm361_vm2 = vcmask 1045508   ;;  %v1336_v10 = vsel %vm469_vm0, %v4443_v8, 0  ;;  %vm444_vm4 = vcmask 64512  }
  0x1a   : > { %s5001_s13 = smul.u32 480, %s5312_s10  ;;  %v1406_v11 = vsel %vm469_vm0, %v4452_v9, 0  ;;  %vm5337_vm3 = vmor %vm360_vm1, %vm361_vm2  ;;  %vm638_vm5 = vcmask 1042432   ;;  %vm639_vm6 = vcmask 1046532   ;;  %vm1020_vm7 = vcmask 1040384   ;;  %s299_s21 = scalar_lea.vmem %s7025_s0, %s5312_s10 }
  0x1b   : > { %vm1021_vm8 = vcmask 1044484   ;;  %vm5560_vm9 = vmor %vm638_vm5, %vm639_vm6  ;;  %vm2393_vm11 = vcmask 261120   ;;  %s294_s22 = sand.u32 1, %s5162_s25   ;;  %vm4122_vm12 = vcmask 257024   ;;  %s4998_s23 = sshll.u32 %s5170_s27, 4 }
  0x1c   : > { %946 = vmatpush.bf16.msrb.mxu2 %v937_v6  ;;  %1139 = vmatpush.bf16.msrb.mxu3 %v1130_v7  ;;  %s304_s18 = scalar_lea.vmem %s7026_s1, %s5001_s13  ;;  %vm5567_vm10 = vmor %vm1020_vm7, %vm1021_vm8  ;;  %s4266_s10 = sshll.u32 %s294_s22, 6 }
  0x1d   : > { %1345 = vmatpush.bf16.msrb.mxu0 %v1336_v10  ;;  %1415 = vmatpush.bf16.msrb.mxu1 %v1406_v11  ;;  %s5334_s20 = scalar_lea.vmem %s304_s18, %s4270_s9  ;;  %s4955_s13 = sshll.u32 %s5174_s28, 6 }
  0x1e   : > { %v4283_v13 = vld [vmem:[%s5334_s20 + $0x60] sm:$0xc]  ;;  %v5343_v14 = vld [vmem:[%s5334_s20 + $0x64] sm:$0xf]  ;;  %v4285_v15 = vld [vmem:[%s5334_s20 + $0x68] sm:$0x3]  ;;  %s4152_s16 = sadd.s32 %s4998_s23, %s4955_s13 }
  0x1f   : > { %v4299_v16 = vrot.slane %v4283_v13, 10  ;;  %v393_v17 = vrot.slane %v5343_v14, 6  ;;  %v396_v18 = vrot.slane %v4285_v15, 6  ;;  %v5348_v19 = vld [vmem:[%s5334_s20 + $0x4c] sm:$0xf]  ;;  %v4995_v12 = vld [vmem:[%s5334_s20 + $0xb8] sm:$0xff] }
  0x20   : > { %v4353_v20 = vld [vmem:[%s5334_s20 + $0x48] sm:$0xc]  ;;  %v4354_v21 = vld [vmem:[%s5334_s20 + $0x50] sm:$0x3]  ;;  %v760_v22 = vrot.slane %v5348_v19, 6  ;;  %s5112_s27 = scalar_lea.hbm %s7032_s7, 512 }
  0x21   : > { %v394_v23 = vsel %vm5337_vm3, %v4299_v16, %v393_v17  ;;  %v395_v24 = vrot.slane %v393_v17, 4  ;;  %v4365_v25 = vrot.slane %v4353_v20, 10  ;;  %v763_v26 = vrot.slane %v4354_v21, 6  ;;  %v4271_v27 = vld [vmem:[%s5334_s20 + $0x30] sm:$0xc] }
  0x22   : > { %v428_v28 = vunpack.c.l.b16 %v394_v23  ;;  %v762_v29 = vrot.slane %v760_v22, 4  ;;  %v5357_v30 = vld [vmem:[%s5334_s20 + $0x34] sm:$0xf]  ;;  %v4273_v31 = vld [vmem:[%s5334_s20 + $0x38] sm:$0x3]  ;;  %v4295_v32 = vrot.slane %v4271_v27, 10 }
  0x23   : > { %v397_v33 = vsel %vm5337_vm3, %v395_v24, %v396_v18  ;;  %v761_v34 = vsel %vm5337_vm3, %v4365_v25, %v760_v22  ;;  %v365_v35 = vrot.slane %v5357_v30, 6  ;;  %v368_v36 = vrot.slane %v4273_v31, 6  ;;  %v5366_v37 = vld [vmem:[%s5334_s20 + $0x1c] sm:$0xf]  ;;  %v4345_v38 = vld [vmem:[%s5334_s20 + $0x18] sm:$0xc] }
  0x24   : > { %v429_v39 = vunpack.c.l.b16 %v397_v33  ;;  %v764_v40 = vsel %vm5337_vm3, %v762_v29, %v763_v26  ;;  %v796_v41 = vunpack.c.l.b16 %v761_v34  ;;  %v4346_v42 = vld [vmem:[%s5334_s20 + $0x20] sm:$0x3]  ;;  %v4286_v43 = vld [vmem:[%s5334_s20 + $0x6c] sm:$0xc]  ;;  %v4361_v47 = vrot.slane %v4345_v38, 10 }
  0x25   : > { %v797_v44 = vunpack.c.l.b16 %v764_v40  ;;  %v366_v45 = vsel %vm5337_vm3, %v4295_v32, %v365_v35  ;;  %v367_v46 = vrot.slane %v365_v35, 4  ;;  %v5376_v48 = vld [vmem:[%s5334_s20 + $0x70] sm:$0xf]  ;;  %v732_v51 = vrot.slane %v5366_v37, 6  ;;  %v4288_v52 = vld [vmem:[%s5334_s20 + $0x74] sm:$0x3] }
  0x26   : > { %v5378_v49 = vpack.c.b16 %v429_v39, %v428_v28  ;;  %v420_v50 = vunpack.c.l.b16 %v366_v45  ;;  %v5383_v53 = vld [vmem:[%s5334_s20 + $0x58] sm:$0xf]  ;;  %v735_v56 = vrot.slane %v4346_v42, 6  ;;  %v4300_v57 = vrot.slane %v4286_v43, 10  ;;  %v4355_v58 = vld [vmem:[%s5334_s20 + $0x54] sm:$0xc] }
  0x27   : > { %v808_v54 = vpack.c.b16 %v797_v44, %v796_v41  ;;  %v369_v55 = vsel %vm5337_vm3, %v367_v46, %v368_v36  ;;  %v733_v60 = vsel %vm5337_vm3, %v4361_v47, %v732_v51  ;;  %v734_v61 = vrot.slane %v732_v51, 4  ;;  %v4356_v1 = vld [vmem:[%s5334_s20 + $0x5c] sm:$0x3]  ;;  %v4274_v3 = vld [vmem:[%s5334_s20 + $0x3c] sm:$0xc] }
  0x28   : > { %4307 = vmatmul.msk.bf16.vlgmr.msra.gmra.mxu2 %vm444_vm4, %v5378_v49  ;;  %v421_v59 = vunpack.c.l.b16 %v369_v55  ;;  %v400_v62 = vrot.slane %v5376_v48, 6  ;;  %v788_v63 = vunpack.c.l.b16 %v733_v60  ;;  %v403_v0 = vrot.slane %v4288_v52, 6  ;;  %v5402_v8 = vld [vmem:[%s5334_s20 + $0x40] sm:$0xf]  ;;  %v4276_v9 = vld [vmem:[%s5334_s20 + $0x44] sm:$0x3] }
  0x29   : > { %4374 = vmatmul.msk.bf16.vlgmr.msra.gmra.mxu3 %vm444_vm4, %v808_v54  ;;  %v767_v2 = vrot.slane %v5383_v53, 6  ;;  %v736_v5 = vsel %vm5337_vm3, %v734_v61, %v735_v56  ;;  %v4366_v7 = vrot.slane %v4355_v58, 10  ;;  %v5406_v13 = vld [vmem:[%s5334_s20 + $0x28] sm:$0xf]  ;;  %v770_v17 = vrot.slane %v4356_v1, 6 }
  0x2a   : > { %v5397_v4 = vpack.c.b16 %v421_v59, %v420_v50  ;;  %v402_v6 = vrot.slane %v400_v62, 4  ;;  %v789_v10 = vunpack.c.l.b16 %v736_v5  ;;  %v401_v15 = vsel %vm5337_vm3, %v4300_v57, %v400_v62  ;;  %v4347_v23 = vld [vmem:[%s5334_s20 + $0x24] sm:$0xc]  ;;  %v4348_v24 = vld [vmem:[%s5334_s20 + $0x2c] sm:$0x3] }
  0x2b   : > { %v769_v11 = vrot.slane %v767_v2, 4  ;;  %v4296_v18 = vrot.slane %v4274_v3, 10  ;;  %v372_v21 = vrot.slane %v5402_v8, 6  ;;  %v375_v22 = vrot.slane %v4276_v9, 6  ;;  %v5428_v40 = vld [vmem:[%s5334_s20 + $0x7c] sm:$0xf] }
  0x2c   : > { %4303 = vmatmul.msk.bf16.vlgmr.msra.gmra.mxu0 %vm444_vm4, %v5397_v4  ;;  %v404_v16 = vsel %vm5337_vm3, %v402_v6, %v403_v0  ;;  %v804_v20 = vpack.c.b16 %v789_v10, %v788_v63  ;;  %v768_v25 = vsel %vm5337_vm3, %v4366_v7, %v767_v2  ;;  %v739_v27 = vrot.slane %v5406_v13, 6  ;;  %v5433_v43 = vld [vmem:[%s5334_s20 + $0x64] sm:$0xf]  ;;  %v4289_v51 = vld [vmem:[%s5334_s20 + $0x78] sm:$0xc] }
  0x2d   : > { %v771_v26 = vsel %vm5337_vm3, %v769_v11, %v770_v17  ;;  %v430_v28 = vunpack.c.l.b16 %v401_v15  ;;  %v431_v29 = vunpack.c.l.b16 %v404_v16  ;;  %v374_v31 = vrot.slane %v372_v21, 4  ;;  %v4291_v52 = vld [vmem:[%s5334_s20 + $0x80] sm:$0x3]  ;;  %v5444_v55 = vld [vmem:[%s5334_s20 + $0x4c] sm:$0xf] }
  0x2e   : > { %4370 = vmatmul.msk.bf16.vlgmr.msra.gmra.mxu1 %vm444_vm4, %v804_v20  ;;  %v373_v32 = vsel %vm5337_vm3, %v4296_v18, %v372_v21  ;;  %v4362_v33 = vrot.slane %v4347_v23, 10  ;;  %v741_v34 = vrot.slane %v739_v27, 4  ;;  %v742_v35 = vrot.slane %v4348_v24, 6  ;;  %v4357_v58 = vld [vmem:[%s5334_s20 + $0x60] sm:$0xc] }
  0x2f   : > { %v798_v36 = vunpack.c.l.b16 %v768_v25  ;;  %v799_v38 = vunpack.c.l.b16 %v771_v26  ;;  %v376_v39 = vsel %vm5337_vm3, %v374_v31, %v375_v22  ;;  %v5430_v41 = vpack.c.b16 %v431_v29, %v430_v28  ;;  %v4358_v59 = vld [vmem:[%s5334_s20 + $0x68] sm:$0x3]  ;;  %v4277_v0 = vld [vmem:[%s5334_s20 + $0x48] sm:$0xc]  ;;  %v5456_v2 = vld [vmem:[%s5334_s20 + $0x34] sm:$0xf] }
  0x30   : > { %v422_v42 = vunpack.c.l.b16 %v373_v32  ;;  %v423_v44 = vunpack.c.l.b16 %v376_v39  ;;  %v740_v45 = vsel %vm5337_vm3, %v4362_v33, %v739_v27  ;;  %v743_v46 = vsel %vm5337_vm3, %v741_v34, %v742_v35  ;;  %v4279_v7 = vld [vmem:[%s5334_s20 + $0x50] sm:$0x3]  ;;  %v4349_v20 = vld [vmem:[%s5334_s20 + $0x30] sm:$0xc]  ;;  %v4350_v21 = vld [vmem:[%s5334_s20 + $0x38] sm:$0x3] }
  0x31   : > { %v407_v47 = vrot.slane %v5428_v40, 6  ;;  %v809_v50 = vpack.c.b16 %v799_v38, %v798_v36  ;;  %v774_v54 = vrot.slane %v5433_v43, 6  ;;  %v790_v56 = vunpack.c.l.b16 %v740_v45  ;;  %v5478_v34 = vld [vmem:[%s5334_s20 + $0x88] sm:$0xf]  ;;  %v5483_v38 = vld [vmem:[%s5334_s20 + $0x70] sm:$0xf] }
  0x32   : > { %v791_v57 = vunpack.c.l.b16 %v743_v46  ;;  %v5450_v60 = vpack.c.b16 %v423_v44, %v422_v42  ;;  %v4301_v61 = vrot.slane %v4289_v51, 10  ;;  %v410_v63 = vrot.slane %v4291_v52, 6  ;;  %v5494_v52 = vld [vmem:[%s5334_s20 + $0x58] sm:$0xf] }
  0x33   : > { %v409_v62 = vrot.slane %v407_v47, 4  ;;  %v379_v1 = vrot.slane %v5444_v55, 6  ;;  %v4367_v3 = vrot.slane %v4357_v58, 10  ;;  %v776_v5 = vrot.slane %v774_v54, 4  ;;  %v4360_v58 = vld [vmem:[%s5334_s20 + $0x74] sm:$0x3] }
  0x34   : > { %v777_v6 = vrot.slane %v4358_v59, 6  ;;  %v805_v9 = vpack.c.b16 %v791_v57, %v790_v56  ;;  %v408_v10 = vsel %vm5337_vm3, %v4301_v61, %v407_v47  ;;  %v4297_v15 = vrot.slane %v4277_v0, 10  ;;  %v4292_v47 = vld [vmem:[%s5334_s20 + $0x84] sm:$0xc]  ;;  %v4359_v57 = vld [vmem:[%s5334_s20 + $0x6c] sm:$0xc] }
  0x35   : > { %v411_v11 = vsel %vm5337_vm3, %v409_v62, %v410_v63  ;;  %v746_v16 = vrot.slane %v5456_v2, 6  ;;  %v381_v17 = vrot.slane %v379_v1, 4  ;;  %v382_v18 = vrot.slane %v4279_v7, 6  ;;  %v4280_v0 = vld [vmem:[%s5334_s20 + $0x54] sm:$0xc] }
  0x36   : > { %v775_v22 = vsel %vm5337_vm3, %v4367_v3, %v774_v54  ;;  %v778_v23 = vsel %vm5337_vm3, %v776_v5, %v777_v6  ;;  %v432_v24 = vunpack.c.l.b16 %v408_v10  ;;  %v433_v25 = vunpack.c.l.b16 %v411_v11  ;;  %v5506_v3 = vld [vmem:[%s5334_s20 + $0x40] sm:$0xf]  ;;  %v4485_v5 = vld [vmem:[%s7028_s3 + $0x14] sm:$0xf]  ;;  %v4282_v10 = vld [vmem:[%s5334_s20 + $0x5c] sm:$0x3] }
  0x37   : > { %v380_v26 = vsel %vm5337_vm3, %v4297_v15, %v379_v1  ;;  %v4363_v27 = vrot.slane %v4349_v20, 10  ;;  %v748_v28 = vrot.slane %v746_v16, 4  ;;  %v749_v29 = vrot.slane %v4350_v21, 6  ;;  %v4528_v21 = vld [vmem:[%s7028_s3 + $0x18] sm:$0xf] }
  0x38   : > { %4308 = vmatmul.msk.bf16.gmra.mxu2 %vm444_vm4, %v5430_v41  ;;  %v800_v31 = vunpack.c.l.b16 %v775_v22  ;;  %v801_v32 = vunpack.c.l.b16 %v778_v23  ;;  %v383_v33 = vsel %vm5337_vm3, %v381_v17, %v382_v18  ;;  %v5480_v35 = vpack.c.b16 %v433_v25, %v432_v24  ;;  %v4351_v18 = vld [vmem:[%s5334_s20 + $0x3c] sm:$0xc]  ;;  %v4352_v25 = vld [vmem:[%s5334_s20 + $0x44] sm:$0x3] }
  0x39   : > { %4375 = vmatmul.msk.bf16.gmra.mxu3 %vm444_vm4, %v809_v50  ;;  %v424_v36 = vunpack.c.l.b16 %v380_v26  ;;  %v425_v39 = vunpack.c.l.b16 %v383_v33  ;;  %v747_v42 = vsel %vm5337_vm3, %v4363_v27, %v746_v16  ;;  %v750_v44 = vsel %vm5337_vm3, %v748_v28, %v749_v29  ;;  %v4294_v50 = vld [vmem:[%s5334_s20 + $0x8c] sm:$0x3]  ;;  %v4561_v33 = vld [vmem:[%s7028_s3 + $0x1c] sm:$0xf] }
  0x3a   : > { %v414_v45 = vrot.slane %v5478_v34, 6  ;;  %v810_v46 = vpack.c.b16 %v801_v32, %v800_v31  ;;  %v781_v51 = vrot.slane %v5483_v38, 6  ;;  %v792_v54 = vunpack.c.l.b16 %v747_v42 }
  0x3b   : > { %v793_v56 = vunpack.c.l.b16 %v750_v44  ;;  %v5500_v59 = vpack.c.b16 %v425_v39, %v424_v36  ;;  %v4302_v61 = vrot.slane %v4292_v47, 10  ;;  %v417_v63 = vrot.slane %v4294_v50, 6  ;;  %v4594_v36 = vld [vmem:[%s7028_s3 + $0x20] sm:$0xf] }
  0x3c   : > { %4304 = vmatmul.msk.bf16.gmra.mxu0 %vm444_vm4, %v5450_v60  ;;  %v416_v62 = vrot.slane %v414_v45, 4  ;;  %v386_v1 = vrot.slane %v5494_v52, 6  ;;  %v4368_v6 = vrot.slane %v4359_v57, 10  ;;  %v783_v7 = vrot.slane %v781_v51, 4 }
  0x3d   : > { %v1612_v11 = vsel %vm469_vm0, %v4485_v5, 0  ;;  %v806_v15 = vpack.c.b16 %v793_v56, %v792_v54  ;;  %v415_v16 = vsel %vm5337_vm3, %v4302_v61, %v414_v45  ;;  %v753_v20 = vrot.slane %v5506_v3, 6 }
  0x3e   : > { %4371 = vmatmul.msk.bf16.gmra.mxu1 %vm444_vm4, %v805_v9  ;;  %v784_v9 = vrot.slane %v4360_v58, 6  ;;  %1621 = vmatpush.bf16.msra.mxu2 %v1612_v11  ;;  %v418_v17 = vsel %vm5337_vm3, %v416_v62, %v417_v63  ;;  %v4298_v22 = vrot.slane %v4280_v0, 10  ;;  %v388_v23 = vrot.slane %v386_v1, 4  ;;  %v4313_v63 = vld [vmem:[%s5334_s20 + $0x18] sm:$0xe] }
  0x3f   : > { %v389_v24 = vrot.slane %v4282_v10, 6  ;;  %v1838_v26 = vsel %vm469_vm0, %v4528_v21, 0  ;;  %v782_v27 = vsel %vm5337_vm3, %v4368_v6, %v781_v51  ;;  %v434_v29 = vunpack.c.l.b16 %v415_v16  ;;  %v4387_v10 = vld [vmem:[%s5334_s20 + $0x20] sm:$0x7] }
  0x40   : > { %v785_v28 = vsel %vm5337_vm3, %v783_v7, %v784_v9  ;;  %1847 = vmatpush.bf16.msra.mxu3 %v1838_v26  ;;  %v435_v31 = vunpack.c.l.b16 %v418_v17  ;;  %v4364_v32 = vrot.slane %v4351_v18, 10  ;;  %v755_v39 = vrot.slane %v753_v20, 4  ;;  %v4386_v9 = vld [vmem:[%s5334_s20 + $0x18] sm:$0x8]  ;;  %v4419_v18 = vld [vmem:[%s5334_s20 + $0x30] sm:$0xe] }
  0x41   : > { %v756_v42 = vrot.slane %v4352_v25, 6  ;;  %v2044_v44 = vsel %vm469_vm0, %v4561_v33, 0  ;;  %v2250_v45 = vsel %vm469_vm0, %v4594_v36, 0  ;;  %v803_v47 = vunpack.c.l.b16 %v785_v28 }
  0x42   : > { %v387_v50 = vsel %vm5337_vm3, %v4298_v22, %v386_v1  ;;  %v390_v51 = vsel %vm5337_vm3, %v388_v23, %v389_v24  ;;  %2053 = vmatpush.bf16.msra.mxu0 %v2044_v44  ;;  %2259 = vmatpush.bf16.msra.mxu1 %v2250_v45  ;;  %v5543_v54 = vpack.c.b16 %v435_v31, %v434_v29  ;;  %v643_v0 = vrot.slane %v5366_v37, 5  ;;  %v4315_v1 = vld [vmem:[%s5334_s20 + $0x20] sm:$0x1]  ;;  %v4420_v24 = vld [vmem:[%s5334_s20 + $0x38] sm:$0x1] }
  0x43   : > { %v426_v56 = vunpack.c.l.b16 %v387_v50  ;;  %v427_v57 = vunpack.c.l.b16 %v390_v51  ;;  %v754_v58 = vsel %vm5337_vm3, %v4364_v32, %v753_v20  ;;  %v757_v61 = vsel %vm5337_vm3, %v755_v39, %v756_v42 }
  0x44   : > { %7038 = vst [vmem:[#allocation5_spill] sm:$0xff] %v5543_v54  ;;  %v1025_v5 = vrot.slane %v5366_v37, 7  ;;  %v794_v6 = vunpack.c.l.b16 %v754_v58  ;;  %v795_v7 = vunpack.c.l.b16 %v757_v61  ;;  %v645_v37 = vrot.slane %v643_v0, 4  ;;  %v4318_v61 = vld [vmem:[%s5334_s20 + $0x2c] sm:$0x1] }
  0x45   : > { %v5557_v11 = vpack.c.b16 %v427_v57, %v426_v56  ;;  %v646_v17 = vrot.slane %v4315_v1, 5  ;;  %v1231_v20 = vrot.slane %v5357_v30, 5  ;;  %v4402_v21 = vrot.slane %v4386_v9, 11  ;;  %v4316_v57 = vld [vmem:[%s5334_s20 + $0x24] sm:$0xe] }
  0x46   : > { %v1027_v22 = vrot.slane %v1025_v5, 4  ;;  %v1028_v23 = vrot.slane %v4387_v10, 7  ;;  %v807_v25 = vpack.c.b16 %v795_v7, %v794_v6  ;;  %v4435_v29 = vrot.slane %v4419_v18, 9  ;;  %v4422_v18 = vld [vmem:[%s5334_s20 + $0x44] sm:$0x1] }
  0x47   : > { %v647_v28 = vsel %vm5560_vm9, %v645_v37, %v646_v17  ;;  %v1233_v30 = vrot.slane %v1231_v20, 4  ;;  %v1234_v31 = vrot.slane %v4420_v24, 5  ;;  %v1026_v32 = vsel %vm5567_vm10, %v4402_v21, %v1025_v5  ;;  %v4421_v17 = vld [vmem:[%s5334_s20 + $0x3c] sm:$0xe] }
  0x48   : > { %4309 = vmatmul.msk.bf16.gmra.mxu2 %vm444_vm4, %v5480_v35  ;;  %v1029_v33 = vsel %vm5567_vm10, %v1027_v22, %v1028_v23  ;;  %v889_v39 = vunpack.c.l.b16 %v647_v28  ;;  %v1081_v42 = vunpack.c.l.b16 %v1026_v32  ;;  %v1232_v45 = vsel %vm5560_vm9, %v4435_v29, %v1231_v20 }
  0x49   : > { %4376 = vmatmul.msk.bf16.gmra.mxu3 %vm444_vm4, %v810_v46  ;;  %v802_v46 = vunpack.c.l.b16 %v782_v27  ;;  %v1082_v44 = vunpack.c.l.b16 %v1029_v33  ;;  %v1287_v50 = vunpack.c.l.b16 %v1232_v45  ;;  %v650_v58 = vrot.slane %v5406_v13, 5  ;;  %v4321_v45 = vld [vmem:[%s5334_s20 + $0x38] sm:$0x1] }
  0x4a   : > { %v4338_v5 = vrot.slane %v4316_v57, 9  ;;  %v653_v7 = vrot.slane %v4318_v61, 5  ;;  %v1238_v10 = vrot.slane %v5402_v8, 5  ;;  %v4436_v21 = vrot.slane %v4421_v17, 9 }
  0x4b   : > { %v811_v62 = vpack.c.b16 %v803_v47, %v802_v46  ;;  %v1235_v46 = vsel %vm5560_vm9, %v1233_v30, %v1234_v31  ;;  %v1097_v56 = vpack.c.b16 %v1082_v44, %v1081_v42  ;;  %v652_v6 = vrot.slane %v650_v58, 4  ;;  %v4319_v42 = vld [vmem:[%s5334_s20 + $0x30] sm:$0xe] }
  0x4c   : > { %4305 = vmatmul.msk.bf16.gmra.mxu0 %vm444_vm4, %v5500_v59  ;;  %v1288_v51 = vunpack.c.l.b16 %v1235_v46  ;;  %v1240_v22 = vrot.slane %v1238_v10, 4  ;;  %v1241_v23 = vrot.slane %v4422_v18, 5  ;;  %v1239_v30 = vsel %vm5560_vm9, %v4436_v21, %v1238_v10  ;;  %v4390_v46 = vld [vmem:[%s5334_s20 + $0x30] sm:$0x8] }
  0x4d   : > { %v654_v20 = vsel %vm5560_vm9, %v652_v6, %v653_v7  ;;  %v1289_v33 = vunpack.c.l.b16 %v1239_v30  ;;  %v657_v44 = vrot.slane %v5456_v2, 5  ;;  %v4404_v61 = vrot.slane %v4390_v46, 11 }
  0x4e   : > { %4372 = vmatmul.msk.bf16.gmra.mxu1 %vm444_vm4, %v806_v15  ;;  %v4337_v15 = vrot.slane %v4313_v63, 9  ;;  %v1032_v63 = vrot.slane %v5406_v13, 7  ;;  %v1303_v1 = vpack.c.b16 %v1288_v51, %v1287_v50  ;;  %v651_v13 = vsel %vm5560_vm9, %v4338_v5, %v650_v58  ;;  %v4391_v50 = vld [vmem:[%s5334_s20 + $0x38] sm:$0x7]  ;;  %v4424_v5 = vld [vmem:[%s5334_s20 + $0x50] sm:$0x1] }
  0x4f   : > { %v1242_v31 = vsel %vm5560_vm9, %v1240_v22, %v1241_v23  ;;  %v659_v57 = vrot.slane %v657_v44, 4  ;;  %v660_v58 = vrot.slane %v4321_v45, 5  ;;  %v1248_v10 = vrot.slane %v4424_v5, 5 }
  0x50   : > { %v644_v27 = vsel %vm5560_vm9, %v4337_v15, %v643_v0  ;;  %v4389_v0 = vld [vmem:[%s5334_s20 + $0x2c] sm:$0x7]  ;;  %v1034_v15 = vrot.slane %v1032_v63, 4  ;;  %v1046_v30 = vrot.slane %v5506_v3, 7 }
  0x51   : > { %v888_v36 = vunpack.c.l.b16 %v644_v27  ;;  %v1035_v37 = vrot.slane %v4389_v0, 7  ;;  %v891_v27 = vunpack.c.l.b16 %v654_v20  ;;  %v1042_v0 = vrot.slane %v4391_v50, 7  ;;  %v4426_v50 = vld [vmem:[%s5334_s20 + $0x5c] sm:$0x1] }
  0x52   : > { %v661_v6 = vsel %vm5560_vm9, %v659_v57, %v660_v58  ;;  %v1048_v45 = vrot.slane %v1046_v30, 4  ;;  %v1255_v58 = vrot.slane %v4426_v50, 5 }
  0x53   : > { %v904_v47 = vpack.c.b16 %v889_v39, %v888_v36  ;;  %v1036_v24 = vsel %vm5567_vm10, %v1034_v15, %v1035_v37  ;;  %v1290_v36 = vunpack.c.l.b16 %v1242_v31  ;;  %v893_v17 = vunpack.c.l.b16 %v661_v6  ;;  %v4393_v31 = vld [vmem:[%s5334_s20 + $0x44] sm:$0x7] }
  0x54   : > { %v1084_v29 = vunpack.c.l.b16 %v1036_v24  ;;  %v1049_v46 = vrot.slane %v4393_v31, 7 }
  0x55   : > { %v1304_v51 = vpack.c.b16 %v1290_v36, %v1289_v33 }
  0x58   : > { %4310 = vmatmul.msk.bf16.gmra.mxu2 %vm444_vm4, %v5543_v54 }
  0x59   : > { %4377 = vmatmul.msk.bf16.gmra.mxu3 %vm444_vm4, %v811_v62  ;;  %v4388_v62 = vld [vmem:[%s5334_s20 + $0x24] sm:$0x8] }
  0x5a   : > { %v4403_v9 = vrot.slane %v4388_v62, 11  ;;  %v1245_v62 = vrot.slane %v5444_v55, 5 }
  0x5c   : > { %4306 = vmatmul.msk.bf16.gmra.mxu0 %vm444_vm4, %v5557_v11  ;;  %v1033_v8 = vsel %vm5567_vm10, %v4403_v9, %v1032_v63  ;;  %v1247_v9 = vrot.slane %v1245_v62, 4 }
  0x5d   : > { %v1083_v28 = vunpack.c.l.b16 %v1033_v8 }
  0x5e   : > { %4373 = vmatmul.msk.bf16.gmra.mxu1 %vm444_vm4, %v807_v25  ;;  %v890_v25 = vunpack.c.l.b16 %v651_v13  ;;  %v1249_v21 = vsel %vm5560_vm9, %v1247_v9, %v1248_v10 }
  0x5f   : > { %v1098_v39 = vpack.c.b16 %v1084_v29, %v1083_v28  ;;  %v1292_v8 = vunpack.c.l.b16 %v1249_v21  ;;  %v4324_v28 = vld [vmem:[%s5334_s20 + $0x44] sm:$0x1]  ;;  %v4392_v29 = vld [vmem:[%s5334_s20 + $0x3c] sm:$0x8] }
  0x60   : > { %v905_v32 = vpack.c.b16 %v891_v27, %v890_v25  ;;  %v4322_v25 = vld [vmem:[%s5334_s20 + $0x3c] sm:$0xe]  ;;  %v664_v27 = vrot.slane %v5506_v3, 5 }
  0x61   : > { %v4340_v33 = vrot.slane %v4322_v25, 9 }
  0x62   : > { %v666_v36 = vrot.slane %v664_v27, 4 }
  0x63   : > { %v665_v3 = vsel %vm5560_vm9, %v4340_v33, %v664_v27 }
  0x68   : > { %4378 = vmatmul.msk.bf16.vlgmr.msrb.gmra.mxu2 %vm444_vm4, %v904_v47  ;;  %v1039_v47 = vrot.slane %v5456_v2, 7 }
  0x69   : > { %4411 = vmatmul.msk.bf16.vlgmr.msrb.gmra.mxu3 %vm444_vm4, %v1097_v56  ;;  %v4339_v56 = vrot.slane %v4319_v42, 9  ;;  %v4405_v42 = vrot.slane %v4392_v29, 11  ;;  %v4428_v29 = vld [vmem:[%s5334_s20 + $0x68] sm:$0x1] }
  0x6a   : > { %v1041_v63 = vrot.slane %v1039_v47, 4  ;;  %v1040_v55 = vsel %vm5567_vm10, %v4404_v61, %v1039_v47  ;;  %v4425_v47 = vld [vmem:[%s5334_s20 + $0x54] sm:$0xe]  ;;  %v1050_v61 = vsel %vm5567_vm10, %v1048_v45, %v1049_v46  ;;  %v1262_v33 = vrot.slane %v4428_v29, 5 }
  0x6b   : > { %v658_v2 = vsel %vm5560_vm9, %v4339_v56, %v657_v44  ;;  %v1085_v18 = vunpack.c.l.b16 %v1040_v55  ;;  %v1252_v44 = vrot.slane %v5494_v52, 5  ;;  %v4438_v56 = vrot.slane %v4425_v47, 9  ;;  %v4325_v55 = vld [vmem:[%s5334_s20 + $0x48] sm:$0xe] }
  0x6c   : > { %4444 = vmatmul.msk.bf16.vlgmr.msrb.gmra.mxu0 %vm444_vm4, %v1303_v1  ;;  %v4423_v1 = vld [vmem:[%s5334_s20 + $0x48] sm:$0xe]  ;;  %v1043_v15 = vsel %vm5567_vm10, %v1041_v63, %v1042_v0  ;;  %v892_v37 = vunpack.c.l.b16 %v658_v2  ;;  %v1047_v52 = vsel %vm5567_vm10, %v4405_v42, %v1046_v30  ;;  %v4341_v21 = vrot.slane %v4325_v55, 9  ;;  %v5709_v55 = vld [vmem:[%s7031_s6] ss:$0 sm:$0xff] }
  0x6d   : > { %v4437_v7 = vrot.slane %v4423_v1, 9  ;;  %v1086_v13 = vunpack.c.l.b16 %v1043_v15  ;;  %v1254_v57 = vrot.slane %v1252_v44, 4  ;;  %v1087_v0 = vunpack.c.l.b16 %v1047_v52  ;;  %v4330_v52 = vld [vmem:[%s5334_s20 + $0x5c] sm:$0x1] }
  0x6e   : > { %4453 = vmatmul.msk.bf16.vlgmr.msrb.gmra.mxu1 %vm444_vm4, %v5397_v4  ;;  %v906_v22 = vpack.c.b16 %v893_v17, %v892_v37  ;;  %v1088_v1 = vunpack.c.l.b16 %v1050_v61  ;;  %v1253_v5 = vsel %vm5560_vm9, %v4438_v56, %v1252_v44  ;;  %v671_v15 = vrot.slane %v5348_v19, 5  ;;  %v4327_v37 = vld [vmem:[%s5334_s20 + $0x50] sm:$0x1]  ;;  %v4394_v17 = vld [vmem:[%s5334_s20 + $0x48] sm:$0x8] }
  0x6f   : > { %v1246_v20 = vsel %vm5560_vm9, %v4437_v7, %v1245_v62  ;;  %v1099_v24 = vpack.c.b16 %v1086_v13, %v1085_v18  ;;  %v894_v62 = vunpack.c.l.b16 %v665_v3  ;;  %v1256_v2 = vsel %vm5560_vm9, %v1254_v57, %v1255_v58  ;;  %v4395_v13 = vld [vmem:[%s5334_s20 + $0x50] sm:$0x7]  ;;  %v4328_v56 = vld [vmem:[%s5334_s20 + $0x54] sm:$0xe] }
  0x70   : > { %v1291_v23 = vunpack.c.l.b16 %v1246_v20  ;;  %v1293_v7 = vunpack.c.l.b16 %v1253_v5  ;;  %v1294_v9 = vunpack.c.l.b16 %v1256_v2  ;;  %v1100_v10 = vpack.c.b16 %v1088_v1, %v1087_v0  ;;  %v4397_v0 = vld [vmem:[%s5334_s20 + $0x5c] sm:$0x7]  ;;  %v5699_v1 = vld [vmem:[%s7030_s5] ss:$0 sm:$0xff]  ;;  %v4429_v2 = vld [vmem:[%s5334_s20 + $0x6c] sm:$0xe] }
  0x71   : > { %v1053_v18 = vrot.slane %v5348_v19, 7  ;;  %v1056_v27 = vrot.slane %v4395_v13, 7  ;;  %v672_v19 = vsel %vm5560_vm9, %v4341_v21, %v671_v15  ;;  %v678_v58 = vrot.slane %v5383_v53, 5 }
  0x72   : > { %v1306_v20 = vpack.c.b16 %v1294_v9, %v1293_v7  ;;  %v1060_v61 = vrot.slane %v5383_v53, 7  ;;  %v4430_v53 = vld [vmem:[%s5334_s20 + $0x74] sm:$0x1] }
  0x73   : > { %v1055_v25 = vrot.slane %v1053_v18, 4  ;;  %v680_v9 = vrot.slane %v678_v58, 4 }
  0x78   : > { %4379 = vmatmul.msk.bf16.gmra.mxu2 %vm444_vm4, %v905_v32  ;;  %v1305_v32 = vpack.c.b16 %v1292_v8, %v1291_v23  ;;  %v674_v23 = vrot.slane %v4327_v37, 5  ;;  %v4406_v8 = vrot.slane %v4394_v17, 11  ;;  %v1062_v37 = vrot.slane %v1060_v61, 4 }
  0x79   : > { %4412 = vmatmul.msk.bf16.gmra.mxu3 %vm444_vm4, %v1098_v39  ;;  %v667_v39 = vrot.slane %v4324_v28, 5  ;;  %v4427_v28 = vld [vmem:[%s5334_s20 + $0x60] sm:$0xe]  ;;  %v1063_v17 = vrot.slane %v4397_v0, 7  ;;  %v4333_v0 = vld [vmem:[%s5334_s20 + $0x68] sm:$0x1] }
  0x7a   : > { %v4439_v31 = vrot.slane %v4427_v28, 9 }
  0x7b   : > { %v1064_v29 = vsel %vm5567_vm10, %v1062_v37, %v1063_v17  ;;  %v4431_v37 = vld [vmem:[%s5334_s20 + $0x78] sm:$0xe]  ;;  %v1273_v17 = vrot.slane %v5428_v40, 5 }
  0x7c   : > { %4445 = vmatmul.msk.bf16.gmra.mxu0 %vm444_vm4, %v1304_v51  ;;  %v668_v51 = vsel %vm5560_vm9, %v666_v36, %v667_v39  ;;  %v1057_v36 = vsel %vm5567_vm10, %v1055_v25, %v1056_v27  ;;  %v896_v39 = vunpack.c.l.b16 %v672_v19 }
  0x7d   : > { %v895_v63 = vunpack.c.l.b16 %v668_v51  ;;  %v1090_v45 = vunpack.c.l.b16 %v1057_v36 }
  0x7e   : > { %4454 = vmatmul.msk.bf16.gmra.mxu1 %vm444_vm4, %v5450_v60 }
  0x7f   : > { %v907_v6 = vpack.c.b16 %v895_v63, %v894_v62  ;;  %v4342_v62 = vrot.slane %v4328_v56, 9  ;;  %v4396_v63 = vld [vmem:[%s5334_s20 + $0x54] sm:$0x8] }
  0x81   : > { %v679_v13 = vsel %vm5560_vm9, %v4342_v62, %v678_v58  ;;  %v4331_v58 = vld [vmem:[%s5334_s20 + $0x60] sm:$0xe] }
  0x82   : > { %v898_v19 = vunpack.c.l.b16 %v679_v13 }
  0x88   : > { %4380 = vmatmul.msk.bf16.gmra.mxu2 %vm444_vm4, %v906_v22  ;;  %v673_v22 = vrot.slane %v671_v15, 4  ;;  %v4407_v15 = vrot.slane %v4396_v63, 11 }
  0x89   : > { %4413 = vmatmul.msk.bf16.gmra.mxu3 %vm444_vm4, %v1099_v24  ;;  %v1259_v24 = vrot.slane %v5343_v14, 5  ;;  %v1054_v14 = vsel %vm5567_vm10, %v4406_v8, %v1053_v18 }
  0x8a   : > { %v675_v30 = vsel %vm5560_vm9, %v673_v22, %v674_v23  ;;  %v1089_v44 = vunpack.c.l.b16 %v1054_v14  ;;  %v1061_v28 = vsel %vm5567_vm10, %v4407_v15, %v1060_v61  ;;  %v685_v61 = vrot.slane %v5433_v43, 5 }
  0x8b   : > { %v897_v42 = vunpack.c.l.b16 %v675_v30  ;;  %v1260_v46 = vsel %vm5560_vm9, %v4439_v31, %v1259_v24  ;;  %v1091_v36 = vunpack.c.l.b16 %v1061_v28  ;;  %v4441_v28 = vrot.slane %v4431_v37, 9  ;;  %v4336_v37 = vld [vmem:[%s5334_s20 + $0x74] sm:$0x1] }
  0x8c   : > { %4446 = vmatmul.msk.bf16.gmra.mxu0 %vm444_vm4, %v1305_v32  ;;  %v1261_v32 = vrot.slane %v1259_v24, 4  ;;  %v1295_v3 = vunpack.c.l.b16 %v1260_v46  ;;  %v1101_v57 = vpack.c.b16 %v1090_v45, %v1089_v44  ;;  %v1269_v24 = vrot.slane %v4430_v53, 5 }
  0x8d   : > { %v908_v50 = vpack.c.b16 %v897_v42, %v896_v39  ;;  %v1092_v39 = vunpack.c.l.b16 %v1064_v29  ;;  %v687_v13 = vrot.slane %v685_v61, 4 }
  0x8e   : > { %4455 = vmatmul.msk.bf16.gmra.mxu1 %vm444_vm4, %v5500_v59  ;;  %v1263_v47 = vsel %vm5560_vm9, %v1261_v32, %v1262_v33 }
  0x8f   : > { %v1296_v51 = vunpack.c.l.b16 %v1263_v47 }
  0x91   : > { %v1307_v5 = vpack.c.b16 %v1296_v51, %v1295_v3 }
  0x98   : > { %4381 = vmatmul.msk.bf16.gmra.mxu2 %vm444_vm4, %v907_v6  ;;  %v1266_v6 = vrot.slane %v5376_v48, 5 }
  0x99   : > { %4414 = vmatmul.msk.bf16.gmra.mxu3 %vm444_vm4, %v1100_v10  ;;  %v681_v10 = vrot.slane %v4330_v52, 5  ;;  %v1102_v52 = vpack.c.b16 %v1092_v39, %v1091_v36 }
  0x9a   : > { %v1268_v8 = vrot.slane %v1266_v6, 4 }
  0x9b   : > { %v682_v25 = vsel %vm5560_vm9, %v680_v9, %v681_v10  ;;  %v4399_v9 = vld [vmem:[%s5334_s20 + $0x68] sm:$0x7] }
  0x9c   : > { %4447 = vmatmul.msk.bf16.gmra.mxu0 %vm444_vm4, %v1306_v20  ;;  %v4440_v20 = vrot.slane %v4429_v2, 9  ;;  %v899_v31 = vunpack.c.l.b16 %v682_v25  ;;  %v1270_v33 = vsel %vm5560_vm9, %v1268_v8, %v1269_v24  ;;  %v1070_v24 = vrot.slane %v4399_v9, 7 }
  0x9d   : > { %v1298_v46 = vunpack.c.l.b16 %v1270_v33 }
  0x9e   : > { %4456 = vmatmul.msk.bf16.gmra.mxu1 %vm444_vm4, %v5557_v11  ;;  %v1267_v32 = vsel %vm5560_vm9, %v4440_v20, %v1266_v6  ;;  %v4343_v6 = vrot.slane %v4331_v58, 9  ;;  %v688_v20 = vrot.slane %v4333_v0, 5 }
  0x9f   : > { %v1297_v45 = vunpack.c.l.b16 %v1267_v32 }
  0xa0   : > { %v689_v33 = vsel %vm5560_vm9, %v687_v13, %v688_v20  ;;  %v1074_v13 = vrot.slane %v5483_v38, 7 }
  0xa1   : > { %v1308_v2 = vpack.c.b16 %v1298_v46, %v1297_v45  ;;  %v901_v45 = vunpack.c.l.b16 %v689_v33  ;;  %v1274_v46 = vsel %vm5560_vm9, %v4441_v28, %v1273_v17 }
  0xa8   : > { %4382 = vmatmul.msk.bf16.gmra.mxu2 %vm444_vm4, %v908_v50 }
  0xa9   : > { %v482_v7 = vpop.f32.mrf.mxu0  ;;  %4415 = vmatmul.msk.bf16.gmra.mxu3 %vm444_vm4, %v1101_v57  ;;  %v909_v57 = vpack.c.b16 %v899_v31, %v898_v19  ;;  %v1275_v31 = vrot.slane %v1273_v17, 4 }
  0xaa   : > { %v524_v48 = vmul.f32 %v5699_v1, %v482_v7  ;;  %v4398_v7 = vld [vmem:[%s5334_s20 + $0x60] sm:$0x8] }
  0xab   : > { %v502_v18 = vpop.f32.mrf.mxu2  ;;  %v5714_v21 = vpop.f32.mrf.mxu1 }
  0xac   : > { %4448 = vmatmul.msk.bf16.gmra.mxu0 %vm444_vm4, %v1307_v5  ;;  %v532_v22 = vmul.f32 %v5699_v1, %v502_v18  ;;  %v5718_v23 = vpop.f32.mrf.mxu3  ;;  %v542_v30 = vadd.f32 %v5709_v55, %v524_v48  ;;  %v1067_v5 = vrot.slane %v5433_v43, 7  ;;  %v4432_v48 = vld [vmem:[%s5334_s20 + $0x80] sm:$0x1] }
  0xad   : > { %v1276_v32 = vrot.slane %v4432_v48, 5 }
  0xae   : > { %v550_v27 = vadd.f32 %v5709_v55, %v532_v22  ;;  %4457 = vmatmul.msk.bf16.gmra.mxu1 %vm444_vm4, %v5378_v49  ;;  %v558_v47 = vmax.f32 %v542_v30, 0.0  ;;  %v4408_v22 = vrot.slane %v4398_v7, 11  ;;  %v1069_v8 = vrot.slane %v1067_v5, 4 }
  0xb0   : > { %v566_v10 = vmax.f32 %v550_v27, 0.0  ;;  %v686_v27 = vsel %vm5560_vm9, %v4343_v6, %v685_v61  ;;  %v1068_v36 = vsel %vm5567_vm10, %v4408_v22, %v1067_v5  ;;  %v1071_v39 = vsel %vm5567_vm10, %v1069_v8, %v1070_v24  ;;  %v4400_v8 = vld [vmem:[%s5334_s20 + $0x6c] sm:$0x8]  ;;  %v4401_v24 = vld [vmem:[%s5334_s20 + $0x74] sm:$0x7] }
  0xb1   : > { %v484_v14 = vpop.f32.mrf.mxu0  ;;  %v1299_v61 = vunpack.c.l.b16 %v1274_v46  ;;  %v4409_v33 = vrot.slane %v4400_v8, 11  ;;  %v5829_v8 = vld [vmem:[%s5334_s20 + $0x4c] sm:$0xf] }
  0xb2   : > { %v525_v42 = vmul.f32 %v5699_v1, %v484_v14 }
  0xb3   : > { %v504_v44 = vpop.f32.mrf.mxu2  ;;  %v5736_v3 = vpop.f32.mrf.mxu1 }
  0xb4   : > { %v543_v50 = vadd.f32 %v5709_v55, %v525_v42  ;;  %v533_v51 = vmul.f32 %v5699_v1, %v504_v44  ;;  %v5739_v56 = vpop.f32.mrf.mxu3  ;;  %v900_v42 = vunpack.c.l.b16 %v686_v27 }
  0xb6   : > { %v559_v62 = vmax.f32 %v543_v50, 0.0  ;;  %v551_v63 = vadd.f32 %v5709_v55, %v533_v51  ;;  %v1093_v51 = vunpack.c.l.b16 %v1068_v36  ;;  %v910_v9 = vpack.c.b16 %v901_v45, %v900_v42  ;;  %v4434_v42 = vld [vmem:[%s5334_s20 + $0x8c] sm:$0x1] }
  0xb7   : > { %v1076_v36 = vrot.slane %v1074_v13, 4 }
  0xb8   : > { %v5748_v53 = vpack.c.bf16 %v559_v62, %v558_v47  ;;  %v567_v15 = vmax.f32 %v551_v63, 0.0  ;;  %4383 = vmatmul.msk.bf16.gmra.mxu2 %vm444_vm4, %v909_v57  ;;  %v1277_v47 = vsel %vm5560_vm9, %v1275_v31, %v1276_v32  ;;  %v1094_v57 = vunpack.c.l.b16 %v1071_v39  ;;  %v4433_v31 = vld [vmem:[%s5334_s20 + $0x84] sm:$0xe] }
  0xb9   : > { %v487_v18 = vpop.f32.mrf.mxu0  ;;  %4416 = vmatmul.msk.bf16.gmra.mxu3 %vm444_vm4, %v1102_v52  ;;  %v1300_v62 = vunpack.c.l.b16 %v1277_v47  ;;  %v692_v63 = vrot.slane %v5483_v38, 5  ;;  %v1280_v32 = vrot.slane %v5478_v34, 5  ;;  %v1077_v39 = vrot.slane %v4401_v24, 7 }
  0xba   : > { %v5755_v43 = vpack.c.bf16 %v567_v15, %v566_v10  ;;  %v526_v29 = vmul.f32 %v5699_v1, %v487_v18  ;;  %v4334_v10 = vld [vmem:[%s5334_s20 + $0x6c] sm:$0xe]  ;;  %v1103_v15 = vpack.c.b16 %v1094_v57, %v1093_v51  ;;  %v4442_v51 = vrot.slane %v4433_v31, 9 }
  0xbb   : > { %v507_v25 = vpop.f32.mrf.mxu2  ;;  %v5760_v19 = vpop.f32.mrf.mxu1  ;;  %v1309_v20 = vpack.c.b16 %v1300_v62, %v1299_v61  ;;  %v4344_v48 = vrot.slane %v4334_v10, 9  ;;  %v694_v22 = vrot.slane %v692_v63, 4  ;;  %v1282_v57 = vrot.slane %v1280_v32, 4 }
  0xbc   : > { %4449 = vmatmul.msk.bf16.gmra.mxu0 %vm444_vm4, %v1308_v2  ;;  %v534_v40 = vmul.f32 %v5699_v1, %v507_v25  ;;  %v5764_v30 = vpop.f32.mrf.mxu3  ;;  %v544_v44 = vadd.f32 %v5709_v55, %v526_v29  ;;  %v695_v29 = vrot.slane %v4336_v37, 5  ;;  %v1075_v61 = vsel %vm5567_vm10, %v4409_v33, %v1074_v13  ;;  %v4462_v33 = vld [vmem:[%s5334_s20 + $0x38] sm:$0x7] }
  0xbd   : > { %v1078_v62 = vsel %vm5567_vm10, %v1076_v36, %v1077_v39  ;;  %v1095_v10 = vunpack.c.l.b16 %v1075_v61 }
  0xbe   : > { %v552_v14 = vadd.f32 %v5709_v55, %v534_v40  ;;  %4458 = vmatmul.msk.bf16.gmra.mxu1 %vm444_vm4, %v5430_v41  ;;  %v560_v0 = vmax.f32 %v544_v44, 0.0  ;;  %v696_v34 = vsel %vm5560_vm9, %v694_v22, %v695_v29 }
  0xc0   : > { %v568_v25 = vmax.f32 %v552_v14, 0.0  ;;  %v693_v14 = vsel %vm5560_vm9, %v4344_v48, %v692_v63 }
  0xc1   : > { %v489_v50 = vpop.f32.mrf.mxu0  ;;  %v902_v63 = vunpack.c.l.b16 %v693_v14  ;;  %v1733_v14 = vrot.slane %v5829_v8, 5 }
  0xc2   : > { %v527_v58 = vmul.f32 %v5699_v1, %v489_v50 }
  0xc3   : > { %v509_v52 = vpop.f32.mrf.mxu2  ;;  %v5783_v2 = vpop.f32.mrf.mxu1 }
  0xc4   : > { %v545_v5 = vadd.f32 %v5709_v55, %v527_v58  ;;  %v535_v6 = vmul.f32 %v5699_v1, %v509_v52  ;;  %v5786_v7 = vpop.f32.mrf.mxu3  ;;  %v1283_v58 = vrot.slane %v4434_v42, 5 }
  0xc6   : > { %v561_v17 = vmax.f32 %v545_v5, 0.0  ;;  %v553_v18 = vadd.f32 %v5709_v55, %v535_v6  ;;  %v1281_v6 = vsel %vm5560_vm9, %v4442_v51, %v1280_v32  ;;  %v1284_v37 = vsel %vm5560_vm9, %v1282_v57, %v1283_v58  ;;  %v4461_v32 = vld [vmem:[%s5334_s20 + $0x30] sm:$0x8]  ;;  %v4498_v51 = vld [vmem:[%s5334_s20 + $0x50] sm:$0x1] }
  0xc7   : > { %v1301_v22 = vunpack.c.l.b16 %v1281_v6  ;;  %v1302_v31 = vunpack.c.l.b16 %v1284_v37  ;;  %v1939_v57 = vrot.slane %v5829_v8, 6  ;;  %v1736_v37 = vrot.slane %v4498_v51, 5 }
  0xc8   : > { %v5794_v27 = vpack.c.bf16 %v561_v17, %v560_v0  ;;  %v569_v28 = vmax.f32 %v553_v18, 0.0  ;;  %4384 = vmatmul.msk.bf16.gmra.mxu2 %vm444_vm4, %v910_v9  ;;  %v903_v0 = vunpack.c.l.b16 %v696_v34  ;;  %v5084_v18 = vld [vmem:[%s5334_s20 + $0x34] sm:$0xf]  ;;  %v1510_v34 = vrot.slane %v4462_v33, 7 }
  0xc9   : > { %v492_v40 = vpop.f32.mrf.mxu0  ;;  %4417 = vmatmul.msk.bf16.gmra.mxu3 %vm444_vm4, %v1103_v15  ;;  %v1096_v15 = vunpack.c.l.b16 %v1078_v62  ;;  %v1507_v13 = vrot.slane %v5084_v18, 7  ;;  %v2145_v33 = vrot.slane %v5829_v8, 7 }
  0xca   : > { %v5800_v38 = vpack.c.bf16 %v569_v28, %v568_v25  ;;  %v528_v45 = vmul.f32 %v5699_v1, %v492_v40  ;;  %v911_v48 = vpack.c.b16 %v903_v0, %v902_v63  ;;  %v1310_v63 = vpack.c.b16 %v1302_v31, %v1301_v22  ;;  %v4537_v0 = vld [vmem:[%s5334_s20 + $0x48] sm:$0xc] }
  0xcb   : > { %v512_v44 = vpop.f32.mrf.mxu2  ;;  %v5806_v46 = vpop.f32.mrf.mxu1  ;;  %v1104_v36 = vpack.c.b16 %v1096_v15, %v1095_v10  ;;  %v1735_v15 = vrot.slane %v1733_v14, 4  ;;  %v4553_v18 = vrot.slane %v4537_v0, 10 }
  0xcc   : > { %4450 = vmatmul.msk.bf16.gmra.mxu0 %vm444_vm4, %v1309_v20  ;;  %v536_v47 = vmul.f32 %v5699_v1, %v512_v44  ;;  %v5810_v50 = vpop.f32.mrf.mxu3  ;;  %v546_v5 = vadd.f32 %v5709_v55, %v528_v45  ;;  %v4496_v44 = vld [vmem:[%s5334_s20 + $0x48] sm:$0xe]  ;;  %v1509_v45 = vrot.slane %v1507_v13, 4 }
  0xcd   : > { %v4520_v10 = vrot.slane %v4496_v44, 9  ;;  %v1737_v44 = vsel %vm5560_vm9, %v1735_v15, %v1736_v37 }
  0xce   : > { %v554_v52 = vadd.f32 %v5709_v55, %v536_v47  ;;  %4459 = vmatmul.msk.bf16.gmra.mxu1 %vm444_vm4, %v5480_v35  ;;  %v562_v24 = vmax.f32 %v546_v5, 0.0  ;;  %v4477_v47 = vrot.slane %v4461_v32, 11  ;;  %v4538_v5 = vld [vmem:[%s5334_s20 + $0x50] sm:$0x3]  ;;  %v1511_v31 = vsel %vm5567_vm10, %v1509_v45, %v1510_v34  ;;  %v4570_v32 = vld [vmem:[%s5334_s20 + $0x48] sm:$0x8] }
  0xcf   : > { %v1940_v45 = vsel %vm5337_vm3, %v4553_v18, %v1939_v57  ;;  %v4586_v34 = vrot.slane %v4570_v32, 11  ;;  %v1790_v0 = vunpack.c.l.b16 %v1737_v44  ;;  %v5883_v18 = vld [vmem:[%s5334_s20 + $0x58] sm:$0xf] }
  0xd0   : > { %v570_v58 = vmax.f32 %v554_v52, 0.0  ;;  %v1508_v52 = vsel %vm5567_vm10, %v4477_v47, %v1507_v13  ;;  %v4571_v13 = vld [vmem:[%s5334_s20 + $0x50] sm:$0x7]  ;;  %v1564_v47 = vunpack.c.l.b16 %v1511_v31 }
  0xd1   : > { %v494_v9 = vpop.f32.mrf.mxu0  ;;  %v2146_v37 = vsel %vm5567_vm10, %v4586_v34, %v2145_v33 }
  0xd2   : > { %v529_v17 = vmul.f32 %v5699_v1, %v494_v9 }
  0xd3   : > { %v514_v20 = vpop.f32.mrf.mxu2  ;;  %v5832_v28 = vpop.f32.mrf.mxu1 }
  0xd4   : > { %v547_v25 = vadd.f32 %v5709_v55, %v529_v17  ;;  %v537_v29 = vmul.f32 %v5699_v1, %v514_v20  ;;  %v5835_v40 = vpop.f32.mrf.mxu3  ;;  %v1941_v20 = vrot.slane %v1939_v57, 4 }
  0xd6   : > { %v563_v39 = vmax.f32 %v547_v25, 0.0  ;;  %v555_v42 = vadd.f32 %v5709_v55, %v537_v29 }
  0xd8   : > { %v5844_v61 = vpack.c.bf16 %v563_v39, %v562_v24  ;;  %v571_v62 = vmax.f32 %v555_v42, 0.0  ;;  %4385 = vmatmul.msk.bf16.gmra.mxu2 %vm444_vm4, %v911_v48  ;;  %v1942_v48 = vrot.slane %v4538_v5, 6  ;;  %v1563_v39 = vunpack.c.l.b16 %v1508_v52 }
  0xd9   : > { %v497_v6 = vpop.f32.mrf.mxu0  ;;  %4418 = vmatmul.msk.bf16.gmra.mxu3 %vm444_vm4, %v1104_v36  ;;  %v1734_v42 = vsel %vm5560_vm9, %v4520_v10, %v1733_v14  ;;  %v2148_v14 = vrot.slane %v4571_v13, 7  ;;  %v4463_v13 = vld [vmem:[%s5334_s20 + $0x3c] sm:$0x8] }
  0xda   : > { %v5850_v9 = vpack.c.bf16 %v571_v62, %v570_v58  ;;  %v530_v22 = vmul.f32 %v5699_v1, %v497_v6  ;;  %v1943_v8 = vsel %vm5337_vm3, %v1941_v20, %v1942_v48  ;;  %v2147_v58 = vrot.slane %v2145_v33, 4 }
  0xdb   : > { %v517_v17 = vpop.f32.mrf.mxu2  ;;  %v5855_v24 = vpop.f32.mrf.mxu1  ;;  %v1995_v6 = vunpack.c.l.b16 %v1940_v45  ;;  %v1996_v10 = vunpack.c.l.b16 %v1943_v8  ;;  %v1579_v57 = vpack.c.b16 %v1564_v47, %v1563_v39  ;;  %v4464_v39 = vld [vmem:[%s5334_s20 + $0x44] sm:$0x7]  ;;  %v1740_v45 = vrot.slane %v5883_v18, 5 }
  0xdc   : > { %4451 = vmatmul.msk.bf16.gmra.mxu0 %vm444_vm4, %v1310_v63  ;;  %v538_v25 = vmul.f32 %v5699_v1, %v517_v17  ;;  %v5859_v29 = vpop.f32.mrf.mxu3  ;;  %v548_v51 = vadd.f32 %v5709_v55, %v530_v22  ;;  %v1789_v63 = vunpack.c.l.b16 %v1734_v42  ;;  %v5085_v17 = vld [vmem:[%s5334_s20 + $0x40] sm:$0xf]  ;;  %v2149_v32 = vsel %vm5567_vm10, %v2147_v58, %v2148_v14 }
  0xdd   : > { %v1514_v52 = vrot.slane %v5085_v17, 7  ;;  %v2011_v47 = vpack.c.b16 %v1996_v10, %v1995_v6  ;;  %v2201_v8 = vunpack.c.l.b16 %v2146_v37  ;;  %v2202_v34 = vunpack.c.l.b16 %v2149_v32  ;;  %v4539_v6 = vld [vmem:[%s5334_s20 + $0x54] sm:$0xc] }
  0xde   : > { %v556_v36 = vadd.f32 %v5709_v55, %v538_v25  ;;  %4460 = vmatmul.msk.bf16.gmra.mxu1 %vm444_vm4, %v5543_v54  ;;  %v564_v20 = vmax.f32 %v548_v51, 0.0  ;;  %v1805_v33 = vpack.c.b16 %v1790_v0, %v1789_v63  ;;  %v4478_v51 = vrot.slane %v4463_v13, 11  ;;  %v4960_v63 = vld [vmem:[%s7029_s4 + $0x8] sm:$0xff] }
  0xdf   : > { %v1517_v14 = vrot.slane %v4464_v39, 7  ;;  %2509 = vmatpush.bf16.msrb.mxu3 %v4960_v63  ;;  %v2217_v32 = vpack.c.b16 %v2202_v34, %v2201_v8  ;;  %v4573_v63 = vld [vmem:[%s5334_s20 + $0x5c] sm:$0x7] }
  0xe0   : > { %v1515_v13 = vsel %vm5567_vm10, %v4478_v51, %v1514_v52 }
  0xe1   : > { %v499_v62 = vpop.f32.mrf.mxu0 }
  0xe2   : > { %v531_v5 = vmul.f32 %v5699_v1, %v499_v62  ;;  %v1516_v62 = vrot.slane %v1514_v52, 4 }
  0xe3   : > { %v519_v15 = vpop.f32.mrf.mxu2  ;;  %v5886_v22 = vpop.f32.mrf.mxu1 }
  0xe4   : > { %v549_v48 = vadd.f32 %v5709_v55, %v531_v5  ;;  %v539_v25 = vmul.f32 %v5699_v1, %v519_v15  ;;  %v5889_v31 = vpop.f32.mrf.mxu3  ;;  %v4499_v1 = vld [vmem:[%s5334_s20 + $0x54] sm:$0xe]  ;;  %v4501_v5 = vld [vmem:[%s5334_s20 + $0x5c] sm:$0x1]  ;;  %v572_v15 = vmax.f32 %v556_v36, 0.0  ;;  %v1946_v36 = vrot.slane %v5883_v18, 6 }
  0xe5   : > { %v4521_v37 = vrot.slane %v4499_v1, 9  ;;  %v4554_v1 = vrot.slane %v4539_v6, 10  ;;  %v2155_v6 = vrot.slane %v4573_v63, 7  ;;  %v4465_v63 = vld [vmem:[%s5334_s20 + $0x48] sm:$0x8] }
  0xe6   : > { %v565_v42 = vmax.f32 %v549_v48, 0.0  ;;  %v557_v44 = vadd.f32 %v5709_v55, %v539_v25  ;;  %v4962_v55 = vld [vmem:[%s7029_s4 + $0x18] sm:$0xff] }
  0xe7   : > { %v4540_v48 = vld [vmem:[%s5334_s20 + $0x5c] sm:$0x3]  ;;  %2424 = vmatpush.bf16.msrb.mxu2 %v4962_v55  ;;  %v1741_v52 = vsel %vm5560_vm9, %v4521_v37, %v1740_v45 }
  0xe8   : > { %v5899_v17 = vpack.c.bf16 %v565_v42, %v564_v20  ;;  %v573_v58 = vmax.f32 %v557_v44, 0.0  ;;  %4486 = vmatmul.msk.bf16.vlgmr.msra.gmra.mxu2 %vm444_vm4, %v1579_v57  ;;  %v1742_v57 = vrot.slane %v1740_v45, 4  ;;  %v1743_v20 = vrot.slane %v4501_v5, 5  ;;  %v4572_v5 = vld [vmem:[%s5334_s20 + $0x54] sm:$0x8] }
  0xe9   : > { %v1347_v0 = vpop.f32.mrf.mxu0  ;;  %4529 = vmatmul.msk.bf16.vlgmr.msra.gmra.mxu3 %vm444_vm4, %v1805_v33  ;;  %v1518_v44 = vsel %vm5567_vm10, %v1516_v62, %v1517_v14  ;;  %v1949_v55 = vrot.slane %v4540_v48, 6  ;;  %v4587_v51 = vrot.slane %v4572_v5, 11  ;;  %v4646_v48 = vld [vmem:[%s7028_s3 + $0x28] sm:$0xf]  ;;  %v1791_v37 = vunpack.c.l.b16 %v1741_v52 }
  0xea   : > { %v5911_v10 = vpack.c.bf16 %v573_v58, %v572_v15  ;;  %v2152_v15 = vrot.slane %v5883_v18, 7  ;;  %v1948_v58 = vrot.slane %v1946_v36, 4  ;;  %v1566_v34 = vunpack.c.l.b16 %v1518_v44 }
  0xeb   : > { %v948_v25 = vpop.f32.mrf.mxu2  ;;  %v1417_v39 = vpop.f32.mrf.mxu1  ;;  %v1947_v18 = vsel %vm5337_vm3, %v4554_v1, %v1946_v36 }
  0xec   : > { %4562 = vmatmul.msk.bf16.vlgmr.msra.gmra.mxu0 %vm444_vm4, %v2011_v47  ;;  %v949_v33 = vadd.f32 %v948_v25, %v5714_v21  ;;  %v1141_v42 = vpop.f32.mrf.mxu3  ;;  %v1744_v47 = vsel %vm5560_vm9, %v1742_v57, %v1743_v20  ;;  %v1565_v21 = vunpack.c.l.b16 %v1515_v13  ;;  %v2154_v14 = vrot.slane %v2152_v15, 4 }
  0xed   : > { %v1792_v25 = vunpack.c.l.b16 %v1744_v47  ;;  %v1950_v57 = vsel %vm5337_vm3, %v1948_v58, %v1949_v55  ;;  %v2720_v20 = vsel %vm469_vm0, %v4646_v48, 0  ;;  %v1997_v13 = vunpack.c.l.b16 %v1947_v18  ;;  %v4504_v48 = vld [vmem:[%s5334_s20 + $0x68] sm:$0x1] }
  0xee   : > { %v1181_v8 = vadd.f32 %v1141_v42, %v949_v33  ;;  %4595 = vmatmul.msk.bf16.vlgmr.msra.gmra.mxu1 %vm444_vm4, %v2217_v32  ;;  %2729 = vmatpush.bf16.msrb.mxu0 %v2720_v20  ;;  %v1580_v32 = vpack.c.b16 %v1566_v34, %v1565_v21  ;;  %v5939_v33 = vld [vmem:[%s5334_s20 + $0x64] sm:$0xf]  ;;  %v1998_v5 = vunpack.c.l.b16 %v1950_v57  ;;  %v2153_v58 = vsel %vm5567_vm10, %v4587_v51, %v2152_v15  ;;  %v4466_v21 = vld [vmem:[%s5334_s20 + $0x50] sm:$0x7]  ;;  %v4502_v34 = vld [vmem:[%s5334_s20 + $0x60] sm:$0xe] }
  0xef   : > { %v1806_v55 = vpack.c.b16 %v1792_v25, %v1791_v37  ;;  %v2203_v18 = vunpack.c.l.b16 %v2153_v58  ;;  %v4479_v51 = vrot.slane %v4465_v63, 11  ;;  %v1524_v37 = vrot.slane %v4466_v21, 7  ;;  %v4542_v58 = vld [vmem:[%s5334_s20 + $0x68] sm:$0x3] }
  0xf0   : > { %v1387_v62 = vadd.f32 %v1347_v0, %v1181_v8  ;;  %v5086_v8 = vld [vmem:[%s5334_s20 + $0x4c] sm:$0xf]  ;;  %v2012_v15 = vpack.c.b16 %v1998_v5, %v1997_v13  ;;  %v4522_v25 = vrot.slane %v4502_v34, 9  ;;  %v1953_v20 = vrot.slane %v5939_v33, 6  ;;  %v4575_v21 = vld [vmem:[%s5334_s20 + $0x68] sm:$0x7] }
  0xf1   : > { %v1349_v45 = vpop.f32.mrf.mxu0  ;;  %v1521_v52 = vrot.slane %v5086_v8, 7 }
  0xf2   : > { %v5936_v0 = vadd.f32 %v1417_v39, %v1387_v62  ;;  %v2156_v39 = vsel %vm5567_vm10, %v2154_v14, %v2155_v6  ;;  %v1747_v62 = vrot.slane %v5939_v33, 5 }
  0xf3   : > { %v950_v36 = vpop.f32.mrf.mxu2  ;;  %v1419_v42 = vpop.f32.mrf.mxu1  ;;  %v1523_v6 = vrot.slane %v1521_v52, 4  ;;  %v1522_v8 = vsel %vm5567_vm10, %v4479_v51, %v1521_v52 }
  0xf4   : > { %v951_v44 = vadd.f32 %v950_v36, %v5736_v3  ;;  %v1143_v1 = vpop.f32.mrf.mxu3  ;;  %v2204_v3 = vunpack.c.l.b16 %v2156_v39  ;;  %v1749_v36 = vrot.slane %v1747_v62, 4 }
  0xf5   : > { %v1525_v34 = vsel %vm5567_vm10, %v1523_v6, %v1524_v37 }
  0xf6   : > { %v1182_v47 = vadd.f32 %v1143_v1, %v951_v44  ;;  %v1750_v44 = vrot.slane %v4504_v48, 5  ;;  %v4541_v1 = vld [vmem:[%s5334_s20 + $0x60] sm:$0xc]  ;;  %v1568_v6 = vunpack.c.l.b16 %v1525_v34 }
  0xf7   : > { %v4555_v48 = vrot.slane %v4541_v1, 10 }
  0xf8   : > { %v1388_v57 = vadd.f32 %v1349_v45, %v1182_v47  ;;  %4487 = vmatmul.msk.bf16.gmra.mxu2 %vm444_vm4, %v1580_v32  ;;  %v2218_v45 = vpack.c.b16 %v2204_v3, %v2203_v18  ;;  %v2159_v32 = vrot.slane %v5939_v33, 7  ;;  %v4574_v47 = vld [vmem:[%s5334_s20 + $0x60] sm:$0x8]  ;;  %v1955_v18 = vrot.slane %v1953_v20, 4 }
  0xf9   : > { %v1352_v14 = vpop.f32.mrf.mxu0  ;;  %4530 = vmatmul.msk.bf16.gmra.mxu3 %vm444_vm4, %v1806_v55  ;;  %v1956_v3 = vrot.slane %v4542_v58, 6 }
  0xfa   : > { %v5958_v13 = vadd.f32 %v1419_v42, %v1388_v57  ;;  %v1748_v42 = vsel %vm5560_vm9, %v4522_v25, %v1747_v62  ;;  %v1751_v57 = vsel %vm5560_vm9, %v1749_v36, %v1750_v44  ;;  %v2161_v52 = vrot.slane %v2159_v32, 4 }
  0xfb   : > { %v953_v39 = vpop.f32.mrf.mxu2  ;;  %v1422_v5 = vpop.f32.mrf.mxu1  ;;  %v1793_v1 = vunpack.c.l.b16 %v1748_v42  ;;  %v1794_v58 = vunpack.c.l.b16 %v1751_v57  ;;  %v1954_v62 = vsel %vm5337_vm3, %v4555_v48, %v1953_v20  ;;  %v1957_v25 = vsel %vm5337_vm3, %v1955_v18, %v1956_v3  ;;  %v4467_v18 = vld [vmem:[%s5334_s20 + $0x54] sm:$0x8]  ;;  %v4468_v3 = vld [vmem:[%s5334_s20 + $0x5c] sm:$0x7] }
  0xfc   : > { %4563 = vmatmul.msk.bf16.gmra.mxu0 %vm444_vm4, %v2012_v15  ;;  %v954_v55 = vadd.f32 %v953_v39, %v5760_v19  ;;  %v1146_v63 = vpop.f32.mrf.mxu3  ;;  %v4588_v19 = vrot.slane %v4574_v47, 11  ;;  %v2162_v15 = vrot.slane %v4575_v21, 7  ;;  %v1567_v39 = vunpack.c.l.b16 %v1522_v8  ;;  %v5985_v8 = vld [vmem:[%s5334_s20 + $0x70] sm:$0xf] }
  0xfd   : > { %v2000_v48 = vunpack.c.l.b16 %v1957_v25 }
  0xfe   : > { %v1183_v33 = vadd.f32 %v1146_v63, %v954_v55  ;;  %4596 = vmatmul.msk.bf16.gmra.mxu1 %vm444_vm4, %v2218_v45  ;;  %v2160_v45 = vsel %vm5567_vm10, %v4588_v19, %v2159_v32  ;;  %v5087_v55 = vld [vmem:[%s5334_s20 + $0x58] sm:$0xf]  ;;  %v1581_v34 = vpack.c.b16 %v1568_v6, %v1567_v39  ;;  %v1807_v32 = vpack.c.b16 %v1794_v58, %v1793_v1  ;;  %v4505_v19 = vld [vmem:[%s5334_s20 + $0x6c] sm:$0xe]  ;;  %v4544_v1 = vld [vmem:[%s5334_s20 + $0x74] sm:$0x3] }
  0xff   : > { %v1528_v63 = vrot.slane %v5087_v55, 7  ;;  %v2205_v42 = vunpack.c.l.b16 %v2160_v45  ;;  %v1531_v55 = vrot.slane %v4468_v3, 7  ;;  %v4543_v6 = vld [vmem:[%s5334_s20 + $0x6c] sm:$0xc]  ;;  %v4523_v45 = vrot.slane %v4505_v19, 9 }
 0x100   : > { %v1389_v51 = vadd.f32 %v1352_v14, %v1183_v33  ;;  %v2163_v14 = vsel %vm5567_vm10, %v2161_v52, %v2162_v15  ;;  %v1754_v52 = vrot.slane %v5985_v8, 5  ;;  %v4480_v15 = vrot.slane %v4467_v18, 11 }
 0x101   : > { %v1354_v37 = vpop.f32.mrf.mxu0  ;;  %v2206_v57 = vunpack.c.l.b16 %v2163_v14  ;;  %v2166_v19 = vrot.slane %v5985_v8, 7 }
 0x102   : > { %v5977_v36 = vadd.f32 %v1422_v5, %v1389_v51  ;;  %v1999_v5 = vunpack.c.l.b16 %v1954_v62  ;;  %v1530_v51 = vrot.slane %v1528_v63, 4  ;;  %v1960_v62 = vrot.slane %v5985_v8, 6 }
 0x103   : > { %v955_v44 = vpop.f32.mrf.mxu2  ;;  %v1424_v47 = vpop.f32.mrf.mxu1  ;;  %v2219_v58 = vpack.c.b16 %v2206_v57, %v2205_v42  ;;  %v1756_v14 = vrot.slane %v1754_v52, 4  ;;  %v1963_v42 = vrot.slane %v4544_v1, 6  ;;  %v4576_v57 = vld [vmem:[%s5334_s20 + $0x6c] sm:$0x8] }
 0x104   : > { %v956_v20 = vadd.f32 %v955_v44, %v5783_v2  ;;  %v1148_v21 = vpop.f32.mrf.mxu3  ;;  %v4507_v2 = vld [vmem:[%s5334_s20 + $0x74] sm:$0x1]  ;;  %v2013_v39 = vpack.c.b16 %v2000_v48, %v1999_v5  ;;  %v4556_v5 = vrot.slane %v4543_v6, 10 }
 0x106   : > { %v1184_v33 = vadd.f32 %v1148_v21, %v956_v20  ;;  %v1757_v20 = vrot.slane %v4507_v2, 5  ;;  %v4577_v2 = vld [vmem:[%s5334_s20 + $0x74] sm:$0x7] }
 0x107   : > { %v2169_v6 = vrot.slane %v4577_v2, 7 }
 0x108   : > { %v1390_v44 = vadd.f32 %v1354_v37, %v1184_v33  ;;  %4488 = vmatmul.msk.bf16.gmra.mxu2 %vm444_vm4, %v1581_v34  ;;  %v1529_v37 = vsel %vm5567_vm10, %v4480_v15, %v1528_v63  ;;  %v1532_v34 = vsel %vm5567_vm10, %v1530_v51, %v1531_v55  ;;  %v1962_v33 = vrot.slane %v1960_v62, 4 }
 0x109   : > { %v1357_v25 = vpop.f32.mrf.mxu0  ;;  %4531 = vmatmul.msk.bf16.gmra.mxu3 %vm444_vm4, %v1807_v32  ;;  %v1755_v63 = vsel %vm5560_vm9, %v4523_v45, %v1754_v52  ;;  %v1569_v15 = vunpack.c.l.b16 %v1529_v37  ;;  %v1570_v51 = vunpack.c.l.b16 %v1532_v34  ;;  %v4589_v55 = vrot.slane %v4576_v57, 11  ;;  %v4470_v57 = vld [vmem:[%s5334_s20 + $0x68] sm:$0x7] }
 0x10a   : > { %v6002_v48 = vadd.f32 %v1424_v47, %v1390_v44  ;;  %v1758_v47 = vsel %vm5560_vm9, %v1756_v14, %v1757_v20  ;;  %v1964_v8 = vsel %vm5337_vm3, %v1962_v33, %v1963_v42  ;;  %v1795_v1 = vunpack.c.l.b16 %v1755_v63  ;;  %v4469_v42 = vld [vmem:[%s5334_s20 + $0x60] sm:$0x8] }
 0x10b   : > { %v958_v21 = vpop.f32.mrf.mxu2  ;;  %v1427_v18 = vpop.f32.mrf.mxu1  ;;  %v1796_v45 = vunpack.c.l.b16 %v1758_v47  ;;  %v1582_v20 = vpack.c.b16 %v1570_v51, %v1569_v15  ;;  %v2002_v37 = vunpack.c.l.b16 %v1964_v8  ;;  %v4508_v51 = vld [vmem:[%s5334_s20 + $0x78] sm:$0xe]  ;;  %v1538_v8 = vrot.slane %v4470_v57, 7 }
 0x10c   : > { %4564 = vmatmul.msk.bf16.gmra.mxu0 %vm444_vm4, %v2013_v39  ;;  %v959_v3 = vadd.f32 %v958_v21, %v5806_v46  ;;  %v1151_v32 = vpop.f32.mrf.mxu3  ;;  %v1961_v46 = vsel %vm5337_vm3, %v4556_v5, %v1960_v62  ;;  %v2168_v39 = vrot.slane %v2166_v19, 4  ;;  %v6021_v62 = vld [vmem:[%s5334_s20 + $0x7c] sm:$0xf]  ;;  %v2167_v5 = vsel %vm5567_vm10, %v4589_v55, %v2166_v19 }
 0x10d   : > { %v2001_v21 = vunpack.c.l.b16 %v1961_v46  ;;  %v1808_v33 = vpack.c.b16 %v1796_v45, %v1795_v1  ;;  %v1761_v63 = vrot.slane %v6021_v62, 5  ;;  %v2207_v15 = vunpack.c.l.b16 %v2167_v5  ;;  %v4510_v46 = vld [vmem:[%s5334_s20 + $0x80] sm:$0x1] }
 0x10e   : > { %v1185_v54 = vadd.f32 %v1151_v32, %v959_v3  ;;  %4597 = vmatmul.msk.bf16.gmra.mxu1 %vm444_vm4, %v2219_v58  ;;  %v2170_v3 = vsel %vm5567_vm10, %v2168_v39, %v2169_v6  ;;  %v4481_v19 = vrot.slane %v4469_v42, 11  ;;  %v4545_v39 = vld [vmem:[%s5334_s20 + $0x78] sm:$0xc]  ;;  %v1967_v1 = vrot.slane %v6021_v62, 6 }
 0x10f   : > { %v2014_v47 = vpack.c.b16 %v2002_v37, %v2001_v21  ;;  %v4524_v45 = vrot.slane %v4508_v51, 9  ;;  %v1764_v21 = vrot.slane %v4510_v46, 5  ;;  %v4546_v37 = vld [vmem:[%s5334_s20 + $0x80] sm:$0x3]  ;;  %v2173_v57 = vrot.slane %v6021_v62, 7 }
 0x110   : > { %v1391_v44 = vadd.f32 %v1357_v25, %v1185_v54  ;;  %v1970_v51 = vrot.slane %v4546_v37, 6 }
 0x111   : > { %v1359_v52 = vpop.f32.mrf.mxu0  ;;  %v1762_v46 = vsel %vm5560_vm9, %v4524_v45, %v1761_v63 }
 0x112   : > { %v6018_v58 = vadd.f32 %v1427_v18, %v1391_v44  ;;  %v5088_v18 = vld [vmem:[%s5334_s20 + $0x64] sm:$0xf]  ;;  %v1797_v37 = vunpack.c.l.b16 %v1762_v46 }
 0x113   : > { %v960_v14 = vpop.f32.mrf.mxu2  ;;  %v1429_v54 = vpop.f32.mrf.mxu1  ;;  %v1535_v32 = vrot.slane %v5088_v18, 7  ;;  %v4511_v46 = vld [vmem:[%s5334_s20 + $0x84] sm:$0xe] }
 0x114   : > { %v961_v25 = vadd.f32 %v960_v14, %v5832_v28  ;;  %v1153_v34 = vpop.f32.mrf.mxu3  ;;  %v2208_v28 = vunpack.c.l.b16 %v2170_v3  ;;  %v1763_v14 = vrot.slane %v1761_v63, 4 }
 0x115   : > { %v1537_v55 = vrot.slane %v1535_v32, 4 }
 0x116   : > { %v1186_v2 = vadd.f32 %v1153_v34, %v961_v25  ;;  %v2220_v34 = vpack.c.b16 %v2208_v28, %v2207_v15  ;;  %v4578_v15 = vld [vmem:[%s5334_s20 + $0x78] sm:$0x8]  ;;  %v4579_v28 = vld [vmem:[%s5334_s20 + $0x80] sm:$0x7] }
 0x117   : > { %v1539_v42 = vsel %vm5567_vm10, %v1537_v55, %v1538_v8  ;;  %v2175_v55 = vrot.slane %v2173_v57, 4  ;;  %v2176_v8 = vrot.slane %v4579_v28, 7 }
 0x118   : > { %v1392_v44 = vadd.f32 %v1359_v52, %v1186_v2  ;;  %4489 = vmatmul.msk.bf16.gmra.mxu2 %vm444_vm4, %v1582_v20  ;;  %v4557_v52 = vrot.slane %v4545_v39, 10  ;;  %v1969_v2 = vrot.slane %v1967_v1, 4 }
 0x119   : > { %v1362_v6 = vpop.f32.mrf.mxu0  ;;  %4532 = vmatmul.msk.bf16.gmra.mxu3 %vm444_vm4, %v1808_v33  ;;  %v1536_v33 = vsel %vm5567_vm10, %v4481_v19, %v1535_v32  ;;  %v4590_v19 = vrot.slane %v4578_v15, 11 }
 0x11a   : > { %v6039_v5 = vadd.f32 %v1429_v54, %v1392_v44  ;;  %v1571_v32 = vunpack.c.l.b16 %v1536_v33  ;;  %v1968_v44 = vsel %vm5337_vm3, %v4557_v52, %v1967_v1  ;;  %v1971_v45 = vsel %vm5337_vm3, %v1969_v2, %v1970_v51  ;;  %v6062_v1 = vld [vmem:[%s5334_s20 + $0x88] sm:$0xf]  ;;  %v4471_v2 = vld [vmem:[%s5334_s20 + $0x6c] sm:$0x8]  ;;  %v5089_v51 = vld [vmem:[%s5334_s20 + $0x70] sm:$0xf] }
 0x11b   : > { %v963_v25 = vpop.f32.mrf.mxu2  ;;  %v1432_v20 = vpop.f32.mrf.mxu1  ;;  %v2174_v33 = vsel %vm5567_vm10, %v4590_v19, %v2173_v57  ;;  %v1542_v15 = vrot.slane %v5089_v51, 7  ;;  %v4961_v19 = vld [vmem:[%s7029_s4 + $0x10] sm:$0xff] }
 0x11c   : > { %4565 = vmatmul.msk.bf16.gmra.mxu0 %vm444_vm4, %v2014_v47  ;;  %v964_v3 = vadd.f32 %v963_v25, %v5855_v24  ;;  %v1156_v18 = vpop.f32.mrf.mxu3  ;;  %v1765_v24 = vsel %vm5560_vm9, %v1763_v14, %v1764_v21  ;;  %v1572_v47 = vunpack.c.l.b16 %v1539_v42  ;;  %2425 = vmatpush.bf16.msrb.mxu2 %v4961_v19 }
 0x11d   : > { %v1798_v63 = vunpack.c.l.b16 %v1765_v24  ;;  %v1768_v24 = vrot.slane %v6062_v1, 5 }
 0x11e   : > { %v1187_v54 = vadd.f32 %v1156_v18, %v964_v3  ;;  %4598 = vmatmul.msk.bf16.gmra.mxu1 %vm444_vm4, %v2220_v34  ;;  %v1583_v25 = vpack.c.b16 %v1572_v47, %v1571_v32  ;;  %v2003_v34 = vunpack.c.l.b16 %v1968_v44  ;;  %v2004_v18 = vunpack.c.l.b16 %v1971_v45 }
 0x11f   : > { %v1809_v42 = vpack.c.b16 %v1798_v63, %v1797_v37  ;;  %v2209_v32 = vunpack.c.l.b16 %v2174_v33  ;;  %v1544_v37 = vrot.slane %v1542_v15, 4  ;;  %v4525_v45 = vrot.slane %v4511_v46, 9  ;;  %v4581_v46 = vld [vmem:[%s5334_s20 + $0x8c] sm:$0x7] }
 0x120   : > { %v1393_v62 = vadd.f32 %v1362_v6, %v1187_v54  ;;  %v4472_v54 = vld [vmem:[%s5334_s20 + $0x74] sm:$0x7]  ;;  %v2015_v57 = vpack.c.b16 %v2004_v18, %v2003_v34  ;;  %v4547_v34 = vld [vmem:[%s5334_s20 + $0x84] sm:$0xc]  ;;  %v2180_v33 = vrot.slane %v6062_v1, 7 }
 0x121   : > { %v1364_v39 = vpop.f32.mrf.mxu0  ;;  %v1545_v63 = vrot.slane %v4472_v54, 7  ;;  %v4580_v54 = vld [vmem:[%s5334_s20 + $0x84] sm:$0x8]  ;;  %v4558_v19 = vrot.slane %v4547_v34, 10 }
 0x122   : > { %v6059_v14 = vadd.f32 %v1432_v20, %v1393_v62  ;;  %v2177_v20 = vsel %vm5567_vm10, %v2175_v55, %v2176_v8  ;;  %v4482_v62 = vrot.slane %v4471_v2, 11  ;;  %v4959_v55 = vld [vmem:[%s7029_s4] sm:$0xff] }
 0x123   : > { %v965_v21 = vpop.f32.mrf.mxu2  ;;  %v1434_v6 = vpop.f32.mrf.mxu1  ;;  %v2210_v47 = vunpack.c.l.b16 %v2177_v20  ;;  %2510 = vmatpush.bf16.msrb.mxu3 %v4959_v55 }
 0x124   : > { %v966_v52 = vadd.f32 %v965_v21, %v5886_v22  ;;  %v1158_v3 = vpop.f32.mrf.mxu3  ;;  %v4513_v22 = vld [vmem:[%s5334_s20 + $0x8c] sm:$0x1]  ;;  %v1770_v21 = vrot.slane %v1768_v24, 4 }
 0x125   : > { %v2221_v18 = vpack.c.b16 %v2210_v47, %v2209_v32 }
 0x126   : > { %v1188_v28 = vadd.f32 %v1158_v3, %v966_v52  ;;  %v4548_v52 = vld [vmem:[%s5334_s20 + $0x8c] sm:$0x3] }
 0x127   : > { %v1977_v47 = vrot.slane %v4548_v52, 6 }
 0x128   : > { %v1394_v44 = vadd.f32 %v1364_v39, %v1188_v28  ;;  %4490 = vmatmul.msk.bf16.gmra.mxu2 %vm444_vm4, %v1583_v25  ;;  %v1974_v39 = vrot.slane %v6062_v1, 6  ;;  %v1771_v25 = vrot.slane %v4513_v22, 5  ;;  %v1543_v28 = vsel %vm5567_vm10, %v4482_v62, %v1542_v15 }
 0x129   : > { %v1367_v8 = vpop.f32.mrf.mxu0  ;;  %4533 = vmatmul.msk.bf16.gmra.mxu3 %vm444_vm4, %v1809_v42  ;;  %v1546_v22 = vsel %vm5567_vm10, %v1544_v37, %v1545_v63  ;;  %v2182_v15 = vrot.slane %v2180_v33, 4  ;;  %v1573_v55 = vunpack.c.l.b16 %v1543_v28 }
 0x12a   : > { %v6087_v20 = vadd.f32 %v1434_v6, %v1394_v44  ;;  %v1976_v32 = vrot.slane %v1974_v39, 4  ;;  %v1769_v6 = vsel %vm5560_vm9, %v4525_v45, %v1768_v24  ;;  %v1772_v44 = vsel %vm5560_vm9, %v1770_v21, %v1771_v25 }
 0x12b   : > { %v968_v3 = vpop.f32.mrf.mxu2  ;;  %v1437_v42 = vpop.f32.mrf.mxu1  ;;  %v1574_v37 = vunpack.c.l.b16 %v1546_v22  ;;  %v1799_v34 = vunpack.c.l.b16 %v1769_v6  ;;  %v1800_v52 = vunpack.c.l.b16 %v1772_v44  ;;  %v1975_v24 = vsel %vm5337_vm3, %v4558_v19, %v1974_v39  ;;  %v4473_v19 = vld [vmem:[%s5334_s20 + $0x78] sm:$0x8]  ;;  %v4514_v44 = vld [vmem:[%s5334_s20 + $0x90] sm:$0xe] }
 0x12c   : > { %4566 = vmatmul.msk.bf16.gmra.mxu0 %vm444_vm4, %v2015_v57  ;;  %v969_v2 = vadd.f32 %v968_v3, %v5718_v23  ;;  %v1161_v51 = vpop.f32.mrf.mxu3  ;;  %v4591_v23 = vrot.slane %v4580_v54, 11  ;;  %v2183_v57 = vrot.slane %v4581_v46, 7  ;;  %v1978_v45 = vsel %vm5337_vm3, %v1976_v32, %v1977_v47  ;;  %v4474_v32 = vld [vmem:[%s5334_s20 + $0x80] sm:$0x7] }
 0x12d   : > { %v1584_v46 = vpack.c.b16 %v1574_v37, %v1573_v55  ;;  %v2006_v22 = vunpack.c.l.b16 %v1978_v45  ;;  %v4549_v37 = vld [vmem:[%s5334_s20 + $0x90] sm:$0xc] }
 0x12e   : > { %v1189_v1 = vadd.f32 %v1161_v51, %v969_v2  ;;  %4599 = vmatmul.msk.bf16.gmra.mxu1 %vm444_vm4, %v2221_v18  ;;  %v2181_v3 = vsel %vm5567_vm10, %v4591_v23, %v2180_v33  ;;  %v5090_v18 = vld [vmem:[%s5334_s20 + $0x7c] sm:$0xf]  ;;  %v6114_v51 = vld [vmem:[%s5334_s20 + $0x94] sm:$0xf]  ;;  %v1810_v33 = vpack.c.b16 %v1800_v52, %v1799_v34  ;;  %v4550_v34 = vld [vmem:[%s5334_s20 + $0x98] sm:$0x3] }
 0x12f   : > { %v1549_v2 = vrot.slane %v5090_v18, 7  ;;  %v1775_v23 = vrot.slane %v6114_v51, 5 }
 0x130   : > { %v1395_v62 = vadd.f32 %v1367_v8, %v1189_v1  ;;  %v2184_v8 = vsel %vm5567_vm10, %v2182_v15, %v2183_v57  ;;  %v2211_v1 = vunpack.c.l.b16 %v2181_v3  ;;  %v4483_v15 = vrot.slane %v4473_v19, 11 }
 0x131   : > { %v1369_v63 = vpop.f32.mrf.mxu0  ;;  %v2212_v6 = vunpack.c.l.b16 %v2184_v8  ;;  %v1551_v57 = vrot.slane %v1549_v2, 4  ;;  %v4526_v3 = vrot.slane %v4514_v44, 9  ;;  %v1777_v8 = vrot.slane %v1775_v23, 4  ;;  %v4583_v44 = vld [vmem:[%s5334_s20 + $0x98] sm:$0x7] }
 0x132   : > { %v6106_v21 = vadd.f32 %v1437_v42, %v1395_v62  ;;  %v2005_v42 = vunpack.c.l.b16 %v1975_v24  ;;  %v1552_v62 = vrot.slane %v4474_v32, 7  ;;  %v1981_v24 = vrot.slane %v6114_v51, 6 }
 0x133   : > { %v970_v25 = vpop.f32.mrf.mxu2  ;;  %v1439_v28 = vpop.f32.mrf.mxu1  ;;  %v2222_v52 = vpack.c.b16 %v2212_v6, %v2211_v1  ;;  %v4582_v1 = vld [vmem:[%s5334_s20 + $0x90] sm:$0x8]  ;;  %v2187_v6 = vrot.slane %v6114_v51, 7 }
 0x134   : > { %v971_v39 = vadd.f32 %v970_v25, %v5739_v56  ;;  %v1163_v54 = vpop.f32.mrf.mxu3  ;;  %v4516_v56 = vld [vmem:[%s5334_s20 + $0x98] sm:$0x1]  ;;  %v2016_v55 = vpack.c.b16 %v2006_v22, %v2005_v42 }
 0x135   : > { %v1778_v18 = vrot.slane %v4516_v56, 5 }
 0x136   : > { %v1190_v47 = vadd.f32 %v1163_v54, %v971_v39  ;;  %v1553_v54 = vsel %vm5567_vm10, %v1551_v57, %v1552_v62  ;;  %v4592_v62 = vrot.slane %v4582_v1, 11  ;;  %v4475_v1 = vld [vmem:[%s5334_s20 + $0x84] sm:$0x8] }
 0x137   : > { %v1576_v57 = vunpack.c.l.b16 %v1553_v54 }
 0x138   : > { %v1396_v25 = vadd.f32 %v1369_v63, %v1190_v47  ;;  %4491 = vmatmul.msk.bf16.gmra.mxu2 %vm444_vm4, %v1584_v46  ;;  %v1550_v63 = vsel %vm5567_vm10, %v4483_v15, %v1549_v2  ;;  %v4559_v46 = vrot.slane %v4549_v37, 10  ;;  %v1984_v47 = vrot.slane %v4550_v34, 6 }
 0x139   : > { %v1372_v45 = vpop.f32.mrf.mxu0  ;;  %4534 = vmatmul.msk.bf16.gmra.mxu3 %vm444_vm4, %v1810_v33  ;;  %v1983_v33 = vrot.slane %v1981_v24, 4  ;;  %v1776_v2 = vsel %vm5560_vm9, %v4526_v3, %v1775_v23  ;;  %v1575_v15 = vunpack.c.l.b16 %v1550_v63  ;;  %v2190_v37 = vrot.slane %v4583_v44, 7  ;;  %v4476_v44 = vld [vmem:[%s5334_s20 + $0x8c] sm:$0x7] }
 0x13a   : > { %v6131_v42 = vadd.f32 %v1439_v28, %v1396_v25  ;;  %v1779_v28 = vsel %vm5560_vm9, %v1777_v8, %v1778_v18  ;;  %v1801_v34 = vunpack.c.l.b16 %v1776_v2 }
 0x13b   : > { %v973_v39 = vpop.f32.mrf.mxu2  ;;  %v1442_v22 = vpop.f32.mrf.mxu1  ;;  %v1985_v51 = vsel %vm5337_vm3, %v1983_v33, %v1984_v47  ;;  %v1802_v3 = vunpack.c.l.b16 %v1779_v28  ;;  %v1585_v18 = vpack.c.b16 %v1576_v57, %v1575_v15  ;;  %v4517_v57 = vld [vmem:[%s5334_s20 + $0x9c] sm:$0xe] }
 0x13c   : > { %4567 = vmatmul.msk.bf16.gmra.mxu0 %vm444_vm4, %v2016_v55  ;;  %v974_v19 = vadd.f32 %v973_v39, %v5764_v30  ;;  %v1166_v32 = vpop.f32.mrf.mxu3  ;;  %v1982_v30 = vsel %vm5337_vm3, %v4559_v46, %v1981_v24  ;;  %v2189_v55 = vrot.slane %v2187_v6, 4  ;;  %v2008_v63 = vunpack.c.l.b16 %v1985_v51  ;;  %v6150_v24 = vld [vmem:[%s5334_s20 + $0xa0] sm:$0xf] }
 0x13d   : > { %v2007_v39 = vunpack.c.l.b16 %v1982_v30  ;;  %v1811_v47 = vpack.c.b16 %v1802_v3, %v1801_v34  ;;  %v1782_v2 = vrot.slane %v6150_v24, 5  ;;  %v4519_v30 = vld [vmem:[%s5334_s20 + $0xa4] sm:$0x1]  ;;  %v1559_v51 = vrot.slane %v4476_v44, 7 }
 0x13e   : > { %v1191_v56 = vadd.f32 %v1166_v32, %v974_v19  ;;  %4600 = vmatmul.msk.bf16.gmra.mxu1 %vm444_vm4, %v2222_v52  ;;  %v2188_v19 = vsel %vm5567_vm10, %v4592_v62, %v2187_v6  ;;  %v2191_v32 = vsel %vm5567_vm10, %v2189_v55, %v2190_v37  ;;  %v4484_v6 = vrot.slane %v4475_v1, 11  ;;  %v4551_v55 = vld [vmem:[%s5334_s20 + $0x9c] sm:$0xc] }
 0x13f   : > { %v2017_v28 = vpack.c.b16 %v2008_v63, %v2007_v39  ;;  %v2213_v15 = vunpack.c.l.b16 %v2188_v19  ;;  %v1988_v34 = vrot.slane %v6150_v24, 6  ;;  %v4527_v3 = vrot.slane %v4517_v57, 9  ;;  %v4552_v63 = vld [vmem:[%s5334_s20 + $0xa4] sm:$0x3]  ;;  %v4584_v57 = vld [vmem:[%s5334_s20 + $0x9c] sm:$0x8] }
 0x140   : > { %v1397_v25 = vadd.f32 %v1372_v45, %v1191_v56  ;;  %v1785_v39 = vrot.slane %v4519_v30, 5  ;;  %v2194_v44 = vrot.slane %v6150_v24, 7  ;;  %v4585_v30 = vld [vmem:[%s5334_s20 + $0xa4] sm:$0x7]  ;;  %v4593_v24 = vrot.slane %v4584_v57, 11 }
 0x141   : > { %v1374_v23 = vpop.f32.mrf.mxu0 }
 0x142   : > { %v6147_v52 = vadd.f32 %v1442_v22, %v1397_v25  ;;  %v5091_v22 = vld [vmem:[%s5334_s20 + $0x88] sm:$0xf] }
 0x143   : > { %v975_v8 = vpop.f32.mrf.mxu2  ;;  %v1444_v45 = vpop.f32.mrf.mxu1  ;;  %v1556_v33 = vrot.slane %v5091_v22, 7 }
 0x144   : > { %v976_v54 = vadd.f32 %v975_v8, %v5786_v7  ;;  %v1168_v46 = vpop.f32.mrf.mxu3  ;;  %v2214_v7 = vunpack.c.l.b16 %v2191_v32  ;;  %v1784_v8 = vrot.slane %v1782_v2, 4 }
 0x145   : > { %v1558_v62 = vrot.slane %v1556_v33, 4 }
 0x146   : > { %v1192_v56 = vadd.f32 %v1168_v46, %v976_v54  ;;  %v2223_v46 = vpack.c.b16 %v2214_v7, %v2213_v15  ;;  %v1783_v7 = vsel %vm5560_vm9, %v4527_v3, %v1782_v2 }
 0x147   : > { %v1560_v1 = vsel %vm5567_vm10, %v1558_v62, %v1559_v51  ;;  %v2196_v62 = vrot.slane %v2194_v44, 4  ;;  %v2197_v51 = vrot.slane %v4585_v30, 7 }
 0x148   : > { %v1398_v25 = vadd.f32 %v1374_v23, %v1192_v56  ;;  %4492 = vmatmul.msk.bf16.gmra.mxu2 %vm444_vm4, %v1585_v18  ;;  %v4560_v18 = vrot.slane %v4551_v55, 10  ;;  %v1990_v56 = vrot.slane %v1988_v34, 4 }
 0x149   : > { %v1377_v37 = vpop.f32.mrf.mxu0  ;;  %4535 = vmatmul.msk.bf16.gmra.mxu3 %vm444_vm4, %v1811_v47  ;;  %v1557_v47 = vsel %vm5567_vm10, %v4484_v6, %v1556_v33  ;;  %v1578_v33 = vunpack.c.l.b16 %v1560_v1 }
 0x14a   : > { %v6168_v54 = vadd.f32 %v1444_v45, %v1398_v25  ;;  %v1991_v45 = vrot.slane %v4552_v63, 6  ;;  %v1989_v25 = vsel %vm5337_vm3, %v4560_v18, %v1988_v34  ;;  %v1803_v63 = vunpack.c.l.b16 %v1783_v7 }
 0x14b   : > { %v978_v23 = vpop.f32.mrf.mxu2  ;;  %v1447_v19 = vpop.f32.mrf.mxu1  ;;  %v2198_v18 = vsel %vm5567_vm10, %v2196_v62, %v2197_v51  ;;  %v2573_v62 = vld [vmem:[%s5334_s20] sm:$0xc]  ;;  %v2574_v51 = vld [vmem:[%s5334_s20 + $0x8] sm:$0x3] }
 0x14c   : > { %4568 = vmatmul.msk.bf16.gmra.mxu0 %vm444_vm4, %v2017_v28  ;;  %v979_v32 = vadd.f32 %v978_v23, %v5810_v50  ;;  %v1171_v22 = vpop.f32.mrf.mxu3  ;;  %v1786_v50 = vsel %vm5560_vm9, %v1784_v8, %v1785_v39  ;;  %v1577_v28 = vunpack.c.l.b16 %v1557_v47  ;;  %v1992_v2 = vsel %vm5337_vm3, %v1990_v56, %v1991_v45 }
 0x14d   : > { %v1804_v23 = vunpack.c.l.b16 %v1786_v50  ;;  %v2009_v39 = vunpack.c.l.b16 %v1989_v25  ;;  %v2010_v34 = vunpack.c.l.b16 %v1992_v2 }
 0x14e   : > { %v1193_v15 = vadd.f32 %v1171_v22, %v979_v32  ;;  %4601 = vmatmul.msk.bf16.gmra.mxu1 %vm444_vm4, %v2223_v46  ;;  %v1586_v8 = vpack.c.b16 %v1578_v33, %v1577_v28  ;;  %v6203_v33 = vld [vmem:[%s5334_s20 + $0x4] sm:$0xf] }
 0x14f   : > { %v1812_v47 = vpack.c.b16 %v1804_v23, %v1803_v63  ;;  %v2018_v45 = vpack.c.b16 %v2010_v34, %v2009_v39  ;;  %v2618_v23 = vrot.slane %v2574_v51, 6  ;;  %v2555_v34 = vld [vmem:[%s5334_s20] sm:$0xf] }
 0x150   : > { %v1399_v6 = vadd.f32 %v1377_v37, %v1193_v15  ;;  %v2195_v37 = vsel %vm5567_vm10, %v4593_v24, %v2194_v44 }
 0x151   : > { %v1379_v55 = vpop.f32.mrf.mxu0  ;;  %v2215_v57 = vunpack.c.l.b16 %v2195_v37 }
 0x152   : > { %v6188_v3 = vadd.f32 %v1447_v19, %v1399_v6  ;;  %v2216_v19 = vunpack.c.l.b16 %v2198_v18  ;;  %v2615_v6 = vrot.slane %v6203_v33, 6 }
 0x153   : > { %v980_v16 = vpop.f32.mrf.mxu2  ;;  %v1449_v46 = vpop.f32.mrf.mxu1 }
 0x154   : > { %v981_v32 = vadd.f32 %v980_v16, %v5835_v40  ;;  %v1173_v22 = vpop.f32.mrf.mxu3  ;;  %v2224_v15 = vpack.c.b16 %v2216_v19, %v2215_v57  ;;  %v2617_v63 = vrot.slane %v2615_v6, 4  ;;  %v2780_v57 = vunpack.c.l.b16 %v6203_v33 }
 0x156   : > { %v1194_v1 = vadd.f32 %v1173_v22, %v981_v32  ;;  %v2619_v22 = vsel %vm5337_vm3, %v2617_v63, %v2618_v23  ;;  %v2575_v63 = vld [vmem:[%s5334_s20 + $0xc] sm:$0xc]  ;;  %v2576_v23 = vld [vmem:[%s5334_s20 + $0x14] sm:$0x3] }
 0x158   : > { %v1400_v56 = vadd.f32 %v1379_v55, %v1194_v1  ;;  %4493 = vmatmul.msk.bf16.gmra.mxu2 %vm444_vm4, %v1586_v8  ;;  %v4638_v55 = vrot.slane %v2573_v62, 10 }
 0x159   : > { %v1382_v30 = vpop.f32.mrf.mxu0  ;;  %4536 = vmatmul.msk.bf16.gmra.mxu3 %vm444_vm4, %v1812_v47  ;;  %v2672_v47 = vunpack.c.l.b16 %v2619_v22 }
 0x15a   : > { %v6197_v40 = vadd.f32 %v1449_v46, %v1400_v56  ;;  %v4637_v46 = vld [vmem:[%s7028_s3 + $0x24] sm:$0xf]  ;;  %v2616_v32 = vsel %vm5337_vm3, %v4638_v55, %v2615_v6 }
 0x15b   : > { %v983_v44 = vpop.f32.mrf.mxu2  ;;  %v1452_v26 = vpop.f32.mrf.mxu1  ;;  %v2828_v37 = vsel %vm469_vm0, %v4637_v46, 0  ;;  %v2671_v18 = vunpack.c.l.b16 %v2616_v32  ;;  %v6247_v32 = vld [vmem:[%s7030_s5 + $0x1] ss:$0 sm:$0xff] }
 0x15c   : > { %4569 = vmatmul.msk.bf16.gmra.mxu0 %vm444_vm4, %v2018_v45  ;;  %v984_v7 = vadd.f32 %v983_v44, %v5859_v29  ;;  %v1176_v50 = vpop.f32.mrf.mxu3  ;;  %2837 = vmatpush.bf16.msrb.mxu1 %v2828_v37 }
 0x15d   : > { %v2687_v56 = vpack.c.b16 %v2672_v47, %v2671_v18 }
 0x15e   : > { %v1195_v28 = vadd.f32 %v1176_v50, %v984_v7  ;;  %4602 = vmatmul.msk.bf16.gmra.mxu1 %vm444_vm4, %v2224_v15 }
 0x160   : > { %v1401_v25 = vadd.f32 %v1382_v30, %v1195_v28 }
 0x161   : > { %v1384_v24 = vpop.f32.mrf.mxu0 }
 0x162   : > { %v6208_v2 = vadd.f32 %v1452_v26, %v1401_v25  ;;  %v4663_v25 = vld [vmem:[%s7028_s3 + $0x2c] sm:$0xf] }
 0x163   : > { %v985_v16 = vpop.f32.mrf.mxu2  ;;  %v1454_v29 = vpop.f32.mrf.mxu1  ;;  %v2938_v6 = vsel %vm469_vm0, %v4663_v25, 0 }
 0x164   : > { %v986_v8 = vadd.f32 %v985_v16, %v5889_v31  ;;  %v1178_v39 = vpop.f32.mrf.mxu3  ;;  %v2779_v31 = vunpack.c.l.b16 %v2555_v34  ;;  %2947 = vmatpush.bf16.msra.mxu2 %v2938_v6  ;;  %v4639_v16 = vrot.slane %v2575_v63, 10 }
 0x166   : > { %v1196_v1 = vadd.f32 %v1178_v39, %v986_v8  ;;  %v2795_v15 = vpack.c.b16 %v2780_v57, %v2779_v31  ;;  %v2625_v8 = vrot.slane %v2576_v23, 6 }
 0x168   : > { %v1402_v19 = vadd.f32 %v1384_v24, %v1196_v1  ;;  %v2557_v1 = vld [vmem:[%s5334_s20 + $0xc] sm:$0xf] }
 0x169   : > { %v2055_v45 = vpop.f32.mrf.mxu0  ;;  %4627 = vmatmul.msk.bf16.vlgmr.msrb.gmra.mxu3 %vm2393_vm11, %v5748_v53  ;;  %v4688_v53 = vld [vmem:[%s7028_s3 + $0x30] sm:$0xf] }
 0x16a   : > { %v6223_v30 = vadd.f32 %v1454_v29, %v1402_v19  ;;  %v3088_v24 = vsel %vm469_vm0, %v4688_v53, 0 }
 0x16b   : > { %v1623_v44 = vpop.f32.mrf.mxu2  ;;  %v2261_v26 = vpop.f32.mrf.mxu1  ;;  %3097 = vmatpush.bf16.msra.mxu3 %v3088_v24 }
 0x16c   : > { %v1663_v7 = vadd.f32 %v1623_v44, %v5936_v0  ;;  %v1849_v50 = vpop.f32.mrf.mxu3  ;;  %4647 = vmatmul.msk.bf16.vlgmr.msrb.gmra.mxu0 %vm444_vm4, %v2687_v56  ;;  %v6239_v0 = vld [vmem:[%s5334_s20 + $0x10] sm:$0xf] }
 0x16d   : > { %v2622_v51 = vrot.slane %v6239_v0, 6  ;;  %v2782_v44 = vunpack.c.l.b16 %v6239_v0 }
 0x16e   : > { %v1889_v28 = vadd.f32 %v1849_v50, %v1663_v7  ;;  %4655 = vmatmul.msk.bf16.vlgmr.msrb.gmra.mxu1 %vm444_vm4, %v2795_v15  ;;  %v4729_v7 = vld [vmem:[%s7028_s3 + $0x34] sm:$0xf] }
 0x16f   : > { %v2624_v29 = vrot.slane %v2622_v51, 4  ;;  %v2623_v18 = vsel %vm5337_vm3, %v4639_v16, %v2622_v51  ;;  %v3158_v25 = vsel %vm469_vm0, %v4729_v7, 0 }
 0x170   : > { %v2095_v62 = vadd.f32 %v2055_v45, %v1889_v28  ;;  %v2673_v31 = vunpack.c.l.b16 %v2623_v18  ;;  %v2781_v45 = vunpack.c.l.b16 %v2557_v1  ;;  %3167 = vmatpush.bf16.msra.mxu0 %v3158_v25  ;;  %v2578_v18 = vld [vmem:[%s5334_s20 + $0x20] sm:$0x3] }
 0x171   : > { %v2057_v55 = vpop.f32.mrf.mxu0  ;;  %v2626_v47 = vsel %vm5337_vm3, %v2624_v29, %v2625_v8  ;;  %v6277_v29 = vld [vmem:[%s5334_s20 + $0x1c] sm:$0xf] }
 0x172   : > { %v2301_v46 = vadd.f32 %v2261_v26, %v2095_v62  ;;  %v2674_v19 = vunpack.c.l.b16 %v2626_v47  ;;  %v2796_v24 = vpack.c.b16 %v2782_v44, %v2781_v45 }
 0x173   : > { %v1625_v39 = vpop.f32.mrf.mxu2  ;;  %v2263_v22 = vpop.f32.mrf.mxu1 }
 0x174   : > { %v1664_v34 = vadd.f32 %v1625_v39, %v5958_v13  ;;  %v1851_v37 = vpop.f32.mrf.mxu3  ;;  %v2319_v15 = vmul.f32 %v6247_v32, %v2301_v46  ;;  %v6260_v13 = vld [vmem:[%s7031_s6 + $0x1] ss:$0 sm:$0xff]  ;;  %v2688_v50 = vpack.c.b16 %v2674_v19, %v2673_v31  ;;  %v2632_v19 = vrot.slane %v2578_v18, 6  ;;  %v6305_v18 = vld [vmem:[%s5334_s20 + $0x28] sm:$0xf] }
 0x176   : > { %v1890_v56 = vadd.f32 %v1851_v37, %v1664_v34  ;;  %v2337_v62 = vadd.f32 %v6260_v13, %v2319_v15  ;;  %v2577_v37 = vld [vmem:[%s5334_s20 + $0x18] sm:$0xc] }
 0x177   : > { %v4640_v47 = vrot.slane %v2577_v37, 10 }
 0x178   : > { %v2096_v26 = vadd.f32 %v2057_v55, %v1890_v56  ;;  %v2353_v8 = vmax.f32 %v2337_v62, 0.0  ;;  %v2784_v62 = vunpack.c.l.b16 %v6277_v29 }
 0x179   : > { %v2060_v28 = vpop.f32.mrf.mxu0  ;;  %4628 = vmatmul.msk.bf16.gmra.mxu3 %vm2393_vm11, %v5794_v27 }
 0x17a   : > { %v2302_v53 = vadd.f32 %v2263_v22, %v2096_v26  ;;  %v2629_v22 = vrot.slane %v6277_v29, 6 }
 0x17b   : > { %v1628_v6 = vpop.f32.mrf.mxu2  ;;  %v2266_v55 = vpop.f32.mrf.mxu1 }
 0x17c   : > { %v2320_v51 = vmul.f32 %v6247_v32, %v2302_v53  ;;  %v1665_v63 = vadd.f32 %v1628_v6, %v5977_v36  ;;  %v1854_v23 = vpop.f32.mrf.mxu3  ;;  %4648 = vmatmul.msk.bf16.gmra.mxu0 %vm444_vm4, %v2688_v50  ;;  %v2631_v1 = vrot.slane %v2629_v22, 4  ;;  %v2630_v7 = vsel %vm5337_vm3, %v4640_v47, %v2629_v22  ;;  %v6287_v50 = vld [vmem:[%s5334_s20 + $0x14] sm:$0xff]  }
 0x17d   : > { %v2675_v25 = vunpack.c.l.b16 %v2630_v7 }
 0x17e   : > { %v2338_v27 = vadd.f32 %v6260_v13, %v2320_v51  ;;  %v1891_v16 = vadd.f32 %v1854_v23, %v1665_v63  ;;  %4656 = vmatmul.msk.bf16.gmra.mxu1 %vm444_vm4, %v2796_v24  ;;  %v2783_v24 = vunpack.c.h.b16 %v6287_v50 }
 0x180   : > { %v2354_v39 = vmax.f32 %v2338_v27, 0.0  ;;  %v2097_v46 = vadd.f32 %v2060_v28, %v1891_v16  ;;  %v2633_v28 = vsel %vm5337_vm3, %v2631_v1, %v2632_v19  ;;  %v2797_v16 = vpack.c.b16 %v2784_v62, %v2783_v24 }
 0x181   : > { %v2062_v34 = vpop.f32.mrf.mxu0  ;;  %v2676_v6 = vunpack.c.l.b16 %v2633_v28 }
 0x182   : > { %v2369_v36 = vpack.c.bf16 %v2354_v39, %v2353_v8  ;;  %v2303_v56 = vadd.f32 %v2266_v55, %v2097_v46 }
 0x183   : > { %v1630_v31 = vpop.f32.mrf.mxu2  ;;  %v2268_v45 = vpop.f32.mrf.mxu1  ;;  %v2689_v55 = vpack.c.b16 %v2676_v6, %v2675_v25 }
 0x184   : > { %v1666_v15 = vadd.f32 %v1630_v31, %v6002_v48  ;;  %v1856_v26 = vpop.f32.mrf.mxu3  ;;  %4611 = vmatmul.msk.bf16.vlgmr.msrb.gmra.mxu2 %vm2393_vm11, %v2369_v36  ;;  %v2321_v48 = vmul.f32 %v6247_v32, %v2303_v56  ;;  %v2636_v31 = vrot.slane %v6305_v18, 6  ;;  %v2579_v56 = vld [vmem:[%s5334_s20 + $0x24] sm:$0xc] }
 0x186   : > { %v1892_v53 = vadd.f32 %v1856_v26, %v1666_v15  ;;  %v2339_v8 = vadd.f32 %v6260_v13, %v2321_v48  ;;  %v4641_v15 = vrot.slane %v2579_v56, 10  ;;  %v2638_v26 = vrot.slane %v2636_v31, 4 }
 0x188   : > { %v2098_v51 = vadd.f32 %v2062_v34, %v1892_v53  ;;  %v2355_v36 = vmax.f32 %v2339_v8, 0.0  ;;  %v2637_v48 = vsel %vm5337_vm3, %v4641_v15, %v2636_v31  ;;  %v2786_v8 = vunpack.c.l.b16 %v6305_v18 }
 0x189   : > { %v2065_v63 = vpop.f32.mrf.mxu0  ;;  %4629 = vmatmul.msk.bf16.gmra.mxu3 %vm2393_vm11, %v5844_v61 }
 0x18a   : > { %v2304_v23 = vadd.f32 %v2268_v45, %v2098_v51  ;;  %v2580_v45 = vld [vmem:[%s5334_s20 + $0x2c] sm:$0x3]  ;;  %v6315_v51 = vld [vmem:[%s5334_s20 + $0x20] sm:$0xff]  }
 0x18b   : > { %v1633_v27 = vpop.f32.mrf.mxu2  ;;  %v2271_v46 = vpop.f32.mrf.mxu1  ;;  %v2639_v28 = vrot.slane %v2580_v45, 6  ;;  %v6333_v45 = vld [vmem:[%s5334_s20 + $0x34] sm:$0xf] }
 0x18c   : > { %v2322_v39 = vmul.f32 %v6247_v32, %v2304_v23  ;;  %v1667_v22 = vadd.f32 %v1633_v27, %v6018_v58  ;;  %v1859_v34 = vpop.f32.mrf.mxu3  ;;  %4649 = vmatmul.msk.bf16.gmra.mxu0 %vm444_vm4, %v2689_v55 }
 0x18d   : > { %v2640_v55 = vsel %vm5337_vm3, %v2638_v26, %v2639_v28 }
 0x18e   : > { %v2340_v37 = vadd.f32 %v6260_v13, %v2322_v39  ;;  %v1893_v61 = vadd.f32 %v1859_v34, %v1667_v22  ;;  %4657 = vmatmul.msk.bf16.gmra.mxu1 %vm444_vm4, %v2797_v16  ;;  %v2678_v27 = vunpack.c.l.b16 %v2640_v55  ;;  %v2785_v16 = vunpack.c.h.b16 %v6315_v51 }
 0x190   : > { %v2099_v47 = vadd.f32 %v2065_v63, %v1893_v61  ;;  %v2356_v1 = vmax.f32 %v2340_v37, 0.0  ;;  %v2677_v63 = vunpack.c.l.b16 %v2637_v48  ;;  %v2798_v61 = vpack.c.b16 %v2786_v8, %v2785_v16 }
 0x191   : > { %v2067_v19 = vpop.f32.mrf.mxu0 }
 0x192   : > { %v2370_v58 = vpack.c.bf16 %v2356_v1, %v2355_v36  ;;  %v2305_v25 = vadd.f32 %v2271_v46, %v2099_v47  ;;  %v2690_v46 = vpack.c.b16 %v2678_v27, %v2677_v63 }
 0x193   : > { %v1635_v7 = vpop.f32.mrf.mxu2  ;;  %v2273_v53 = vpop.f32.mrf.mxu1 }
 0x194   : > { %v1668_v6 = vadd.f32 %v1635_v7, %v6039_v5  ;;  %v1861_v24 = vpop.f32.mrf.mxu3  ;;  %4612 = vmatmul.msk.bf16.gmra.mxu2 %vm2393_vm11, %v2370_v58  ;;  %v2323_v5 = vmul.f32 %v6247_v32, %v2305_v25  ;;  %v2643_v7 = vrot.slane %v6333_v45, 6  ;;  %v2581_v25 = vld [vmem:[%s5334_s20 + $0x30] sm:$0xc] }
 0x196   : > { %v1894_v23 = vadd.f32 %v1861_v24, %v1668_v6  ;;  %v2341_v36 = vadd.f32 %v6260_v13, %v2323_v5  ;;  %v4642_v6 = vrot.slane %v2581_v25, 10  ;;  %v2645_v24 = vrot.slane %v2643_v7, 4 }
 0x198   : > { %v2100_v39 = vadd.f32 %v2067_v19, %v1894_v23  ;;  %v2357_v58 = vmax.f32 %v2341_v36, 0.0  ;;  %v2644_v5 = vsel %vm5337_vm3, %v4642_v6, %v2643_v7  ;;  %v2788_v36 = vunpack.c.l.b16 %v6333_v45 }
 0x199   : > { %v2070_v22 = vpop.f32.mrf.mxu0  ;;  %4630 = vmatmul.msk.bf16.gmra.mxu3 %vm2393_vm11, %v5899_v17 }
 0x19a   : > { %v2306_v34 = vadd.f32 %v2273_v53, %v2100_v39  ;;  %v2582_v53 = vld [vmem:[%s5334_s20 + $0x38] sm:$0x3]  ;;  %v6343_v39 = vld [vmem:[%s5334_s20 + $0x2c] sm:$0xff]  }
 0x19b   : > { %v1638_v37 = vpop.f32.mrf.mxu2  ;;  %v2276_v1 = vpop.f32.mrf.mxu1  ;;  %v2646_v55 = vrot.slane %v2582_v53, 6  ;;  %v6361_v53 = vld [vmem:[%s5334_s20 + $0x40] sm:$0xf] }
 0x19c   : > { %v2324_v47 = vmul.f32 %v6247_v32, %v2306_v34  ;;  %v1669_v31 = vadd.f32 %v1638_v37, %v6059_v14  ;;  %v1864_v19 = vpop.f32.mrf.mxu3  ;;  %4650 = vmatmul.msk.bf16.gmra.mxu0 %vm444_vm4, %v2690_v46 }
 0x19d   : > { %v2647_v46 = vsel %vm5337_vm3, %v2645_v24, %v2646_v55 }
 0x19e   : > { %v2342_v56 = vadd.f32 %v6260_v13, %v2324_v47  ;;  %v1895_v17 = vadd.f32 %v1864_v19, %v1669_v31  ;;  %4658 = vmatmul.msk.bf16.gmra.mxu1 %vm444_vm4, %v2798_v61  ;;  %v2680_v37 = vunpack.c.l.b16 %v2647_v46  ;;  %v2787_v61 = vunpack.c.h.b16 %v6343_v39 }
 0x1a0   : > { %v2101_v15 = vadd.f32 %v2070_v22, %v1895_v17  ;;  %v2358_v26 = vmax.f32 %v2342_v56, 0.0  ;;  %v2679_v22 = vunpack.c.l.b16 %v2644_v5  ;;  %v2799_v17 = vpack.c.b16 %v2788_v36, %v2787_v61 }
 0x1a1   : > { %v2072_v28 = vpop.f32.mrf.mxu0 }
 0x1a2   : > { %v2371_v14 = vpack.c.bf16 %v2358_v26, %v2357_v58  ;;  %v2307_v63 = vadd.f32 %v2276_v1, %v2101_v15  ;;  %v2691_v1 = vpack.c.b16 %v2680_v37, %v2679_v22 }
 0x1a3   : > { %v1640_v48 = vpop.f32.mrf.mxu2  ;;  %v2278_v23 = vpop.f32.mrf.mxu1 }
 0x1a4   : > { %v1670_v27 = vadd.f32 %v1640_v48, %v6087_v20  ;;  %v1866_v16 = vpop.f32.mrf.mxu3  ;;  %4613 = vmatmul.msk.bf16.gmra.mxu2 %vm2393_vm11, %v2371_v14  ;;  %v2325_v20 = vmul.f32 %v6247_v32, %v2307_v63  ;;  %v2650_v48 = vrot.slane %v6361_v53, 6  ;;  %v2583_v63 = vld [vmem:[%s5334_s20 + $0x3c] sm:$0xc] }
 0x1a6   : > { %v1896_v34 = vadd.f32 %v1866_v16, %v1670_v27  ;;  %v2343_v58 = vadd.f32 %v6260_v13, %v2325_v20  ;;  %v4643_v27 = vrot.slane %v2583_v63, 10  ;;  %v2652_v16 = vrot.slane %v2650_v48, 4 }
 0x1a8   : > { %v2102_v47 = vadd.f32 %v2072_v28, %v1896_v34  ;;  %v2359_v14 = vmax.f32 %v2343_v58, 0.0  ;;  %v2651_v20 = vsel %vm5337_vm3, %v4643_v27, %v2650_v48  ;;  %v2790_v58 = vunpack.c.l.b16 %v6361_v53 }
 0x1a9   : > { %v2075_v31 = vpop.f32.mrf.mxu0  ;;  %4631 = vmatmul.msk.bf16.gmra.mxu3 %vm2393_vm11, %v5755_v43 }
 0x1aa   : > { %v2308_v19 = vadd.f32 %v2278_v23, %v2102_v47  ;;  %v2584_v23 = vld [vmem:[%s5334_s20 + $0x44] sm:$0x3]  ;;  %v6371_v47 = vld [vmem:[%s5334_s20 + $0x38] sm:$0xff]  }
 0x1ab   : > { %v1643_v56 = vpop.f32.mrf.mxu2  ;;  %v2281_v26 = vpop.f32.mrf.mxu1  ;;  %v2653_v46 = vrot.slane %v2584_v23, 6  ;;  %v6389_v23 = vld [vmem:[%s5334_s20 + $0x4c] sm:$0xf] }
 0x1ac   : > { %v2326_v15 = vmul.f32 %v6247_v32, %v2308_v19  ;;  %v1671_v7 = vadd.f32 %v1643_v56, %v6106_v21  ;;  %v1869_v28 = vpop.f32.mrf.mxu3  ;;  %4651 = vmatmul.msk.bf16.gmra.mxu0 %vm444_vm4, %v2691_v1 }
 0x1ad   : > { %v2654_v1 = vsel %vm5337_vm3, %v2652_v16, %v2653_v46 }
 0x1ae   : > { %v2344_v25 = vadd.f32 %v6260_v13, %v2326_v15  ;;  %v1897_v43 = vadd.f32 %v1869_v28, %v1671_v7  ;;  %4659 = vmatmul.msk.bf16.gmra.mxu1 %vm444_vm4, %v2799_v17  ;;  %v2682_v56 = vunpack.c.l.b16 %v2654_v1  ;;  %v2789_v17 = vunpack.c.h.b16 %v6371_v47 }
 0x1b0   : > { %v2103_v6 = vadd.f32 %v2075_v31, %v1897_v43  ;;  %v2360_v24 = vmax.f32 %v2344_v25, 0.0  ;;  %v2681_v31 = vunpack.c.l.b16 %v2651_v20  ;;  %v2800_v43 = vpack.c.b16 %v2790_v58, %v2789_v17 }
 0x1b1   : > { %v2077_v55 = vpop.f32.mrf.mxu0 }
 0x1b2   : > { %v2372_v21 = vpack.c.bf16 %v2360_v24, %v2359_v14  ;;  %v2309_v22 = vadd.f32 %v2281_v26, %v2103_v6  ;;  %v2692_v26 = vpack.c.b16 %v2682_v56, %v2681_v31 }
 0x1b3   : > { %v1645_v5 = vpop.f32.mrf.mxu2  ;;  %v2283_v34 = vpop.f32.mrf.mxu1 }
 0x1b4   : > { %v1672_v37 = vadd.f32 %v1645_v5, %v6131_v42  ;;  %v1871_v61 = vpop.f32.mrf.mxu3  ;;  %4614 = vmatmul.msk.bf16.gmra.mxu2 %vm2393_vm11, %v2372_v21  ;;  %v2327_v42 = vmul.f32 %v6247_v32, %v2309_v22  ;;  %v2657_v5 = vrot.slane %v6389_v23, 6  ;;  %v2585_v22 = vld [vmem:[%s5334_s20 + $0x48] sm:$0xc] }
 0x1b6   : > { %v1898_v19 = vadd.f32 %v1871_v61, %v1672_v37  ;;  %v2345_v14 = vadd.f32 %v6260_v13, %v2327_v42  ;;  %v4644_v37 = vrot.slane %v2585_v22, 10  ;;  %v2659_v61 = vrot.slane %v2657_v5, 4 }
 0x1b8   : > { %v2104_v15 = vadd.f32 %v2077_v55, %v1898_v19  ;;  %v2361_v21 = vmax.f32 %v2345_v14, 0.0  ;;  %v2658_v42 = vsel %vm5337_vm3, %v4644_v37, %v2657_v5  ;;  %v2792_v14 = vunpack.c.l.b16 %v6389_v23 }
 0x1b9   : > { %v2080_v7 = vpop.f32.mrf.mxu0  ;;  %4632 = vmatmul.msk.bf16.gmra.mxu3 %vm2393_vm11, %v5800_v38 }
 0x1ba   : > { %v2310_v28 = vadd.f32 %v2283_v34, %v2104_v15  ;;  %v2586_v34 = vld [vmem:[%s5334_s20 + $0x50] sm:$0x3]  ;;  %v6399_v15 = vld [vmem:[%s5334_s20 + $0x44] sm:$0xff]  }
 0x1bb   : > { %v1648_v25 = vpop.f32.mrf.mxu2  ;;  %v2286_v24 = vpop.f32.mrf.mxu1  ;;  %v2660_v1 = vrot.slane %v2586_v34, 6  ;;  %v6417_v34 = vld [vmem:[%s5334_s20 + $0x58] sm:$0xf] }
 0x1bc   : > { %v2328_v6 = vmul.f32 %v6247_v32, %v2310_v28  ;;  %v1673_v48 = vadd.f32 %v1648_v25, %v6147_v52  ;;  %v1874_v55 = vpop.f32.mrf.mxu3  ;;  %4652 = vmatmul.msk.bf16.gmra.mxu0 %vm444_vm4, %v2692_v26 }
 0x1bd   : > { %v2661_v26 = vsel %vm5337_vm3, %v2659_v61, %v2660_v1 }
 0x1be   : > { %v2346_v63 = vadd.f32 %v6260_v13, %v2328_v6  ;;  %v1899_v38 = vadd.f32 %v1874_v55, %v1673_v48  ;;  %4660 = vmatmul.msk.bf16.gmra.mxu1 %vm444_vm4, %v2800_v43  ;;  %v2684_v25 = vunpack.c.l.b16 %v2661_v26  ;;  %v2791_v43 = vunpack.c.h.b16 %v6399_v15 }
 0x1c0   : > { %v2105_v27 = vadd.f32 %v2080_v7, %v1899_v38  ;;  %v2362_v16 = vmax.f32 %v2346_v63, 0.0  ;;  %v2683_v7 = vunpack.c.l.b16 %v2658_v42  ;;  %v2801_v38 = vpack.c.b16 %v2792_v14, %v2791_v43 }
 0x1c1   : > { %v2082_v46 = vpop.f32.mrf.mxu0 }
 0x1c2   : > { %v2373_v52 = vpack.c.bf16 %v2362_v16, %v2361_v21  ;;  %v2311_v31 = vadd.f32 %v2286_v24, %v2105_v27  ;;  %v2693_v24 = vpack.c.b16 %v2684_v25, %v2683_v7 }
 0x1c3   : > { %v1650_v20 = vpop.f32.mrf.mxu2  ;;  %v2288_v19 = vpop.f32.mrf.mxu1 }
 0x1c4   : > { %v1674_v56 = vadd.f32 %v1650_v20, %v6168_v54  ;;  %v1876_v17 = vpop.f32.mrf.mxu3  ;;  %4615 = vmatmul.msk.bf16.gmra.mxu2 %vm2393_vm11, %v2373_v52  ;;  %v2329_v54 = vmul.f32 %v6247_v32, %v2311_v31  ;;  %v2664_v20 = vrot.slane %v6417_v34, 6  ;;  %v2587_v31 = vld [vmem:[%s5334_s20 + $0x54] sm:$0xc] }
 0x1c6   : > { %v1900_v28 = vadd.f32 %v1876_v17, %v1674_v56  ;;  %v2347_v21 = vadd.f32 %v6260_v13, %v2329_v54  ;;  %v4645_v56 = vrot.slane %v2587_v31, 10  ;;  %v2666_v17 = vrot.slane %v2664_v20, 4 }
 0x1c8   : > { %v2106_v6 = vadd.f32 %v2082_v46, %v1900_v28  ;;  %v2363_v52 = vmax.f32 %v2347_v21, 0.0  ;;  %v2665_v54 = vsel %vm5337_vm3, %v4645_v56, %v2664_v20  ;;  %v2794_v21 = vunpack.c.l.b16 %v6417_v34  ;;  %v4852_v34 = vld [vmem:[%s5334_s20 + $0x78] sm:$0xc] }
 0x1c9   : > { %v2085_v48 = vpop.f32.mrf.mxu0  ;;  %4633 = vmatmul.msk.bf16.gmra.mxu3 %vm2393_vm11, %v5850_v9 }
 0x1ca   : > { %v2312_v55 = vadd.f32 %v2288_v19, %v2106_v6  ;;  %v2588_v19 = vld [vmem:[%s5334_s20 + $0x5c] sm:$0x3]  ;;  %v6427_v6 = vld [vmem:[%s5334_s20 + $0x50] sm:$0xff]  }
 0x1cb   : > { %v1653_v63 = vpop.f32.mrf.mxu2  ;;  %v2291_v16 = vpop.f32.mrf.mxu1  ;;  %v2667_v26 = vrot.slane %v2588_v19, 6 }
 0x1cc   : > { %v2330_v27 = vmul.f32 %v6247_v32, %v2312_v55  ;;  %v1675_v5 = vadd.f32 %v1653_v63, %v6188_v3  ;;  %v1879_v46 = vpop.f32.mrf.mxu3  ;;  %4653 = vmatmul.msk.bf16.gmra.mxu0 %vm444_vm4, %v2693_v24 }
 0x1cd   : > { %v2668_v24 = vsel %vm5337_vm3, %v2666_v17, %v2667_v26 }
 0x1ce   : > { %v2348_v22 = vadd.f32 %v6260_v13, %v2330_v27  ;;  %v1901_v9 = vadd.f32 %v1879_v46, %v1675_v5  ;;  %4661 = vmatmul.msk.bf16.gmra.mxu1 %vm444_vm4, %v2801_v38  ;;  %v2686_v63 = vunpack.c.l.b16 %v2668_v24  ;;  %v2793_v38 = vunpack.c.h.b16 %v6427_v6  ;;  %v4964_v24 = vld [vmem:[%s5334_s20 + $0x30] sm:$0xff] }
 0x1d0   : > { %v2107_v37 = vadd.f32 %v2085_v48, %v1901_v9  ;;  %v2364_v61 = vmax.f32 %v2348_v22, 0.0  ;;  %v2685_v48 = vunpack.c.l.b16 %v2665_v54  ;;  %v2802_v9 = vpack.c.b16 %v2794_v21, %v2793_v38  ;;  %v4878_v54 = vld [vmem:[%s7028_s3 + $0x40] sm:$0xf] }
 0x1d1   : > { %v2087_v1 = vpop.f32.mrf.mxu0 }
 0x1d2   : > { %v2374_v3 = vpack.c.bf16 %v2364_v61, %v2363_v52  ;;  %v2313_v7 = vadd.f32 %v2291_v16, %v2107_v37  ;;  %v2694_v16 = vpack.c.b16 %v2686_v63, %v2685_v48 }
 0x1d3   : > { %v1655_v42 = vpop.f32.mrf.mxu2  ;;  %v2293_v28 = vpop.f32.mrf.mxu1 }
 0x1d4   : > { %v1676_v25 = vadd.f32 %v1655_v42, %v6197_v40  ;;  %v1881_v43 = vpop.f32.mrf.mxu3  ;;  %4616 = vmatmul.msk.bf16.gmra.mxu2 %vm2393_vm11, %v2374_v3  ;;  %v2331_v40 = vmul.f32 %v6247_v32, %v2313_v7 }
 0x1d6   : > { %v1902_v55 = vadd.f32 %v1881_v43, %v1676_v25  ;;  %v2349_v52 = vadd.f32 %v6260_v13, %v2331_v40  ;;  %v4805_v43 = vld [vmem:[%s7028_s3 + $0x3c] sm:$0xf]  ;;  %v4746_v40 = vld [vmem:[%s7028_s3 + $0x38] sm:$0xf] }
 0x1d7   : > { %v3446_v48 = vsel %vm469_vm0, %v4805_v43, 0 }
 0x1d8   : > { %v2108_v27 = vadd.f32 %v2087_v1, %v1902_v55  ;;  %v3668_v55 = vsel %vm469_vm0, %v4878_v54, 0  ;;  %3455 = vmatpush.bf16.msrb.mxu2 %v3446_v48  ;;  %v4973_v54 = vld [vmem:[%s5334_s20 + $0x40] sm:$0xff] }
 0x1d9   : > { %v2090_v5 = vpop.f32.mrf.mxu0  ;;  %4634 = vmatmul.msk.bf16.gmra.mxu3 %vm2393_vm11, %v5911_v10  ;;  %v2365_v10 = vmax.f32 %v2349_v52, 0.0 }
 0x1da   : > { %v2314_v46 = vadd.f32 %v2293_v28, %v2108_v27  ;;  %3677 = vmatpush.bf16.msrb.mxu3 %v3668_v55 }
 0x1db   : > { %v1658_v22 = vpop.f32.mrf.mxu2  ;;  %v2296_v61 = vpop.f32.mrf.mxu1 }
 0x1dc   : > { %v2332_v37 = vmul.f32 %v6247_v32, %v2314_v46  ;;  %v1677_v20 = vadd.f32 %v1658_v22, %v6208_v2  ;;  %v1884_v31 = vpop.f32.mrf.mxu3  ;;  %4654 = vmatmul.msk.bf16.gmra.mxu0 %vm444_vm4, %v2694_v16  ;;  %v3292_v16 = vsel %vm469_vm0, %v4746_v40, 0 }
 0x1dd   : > { %3301 = vmatpush.bf16.msra.mxu1 %v3292_v16 }
 0x1de   : > { %v2350_v1 = vadd.f32 %v6260_v13, %v2332_v37  ;;  %v1903_v19 = vadd.f32 %v1884_v31, %v1677_v20  ;;  %4662 = vmatmul.msk.bf16.gmra.mxu1 %vm444_vm4, %v2802_v9  ;;  %v4895_v37 = vld [vmem:[%s7028_s3 + $0x44] sm:$0xf] }
 0x1df   : > { %v3802_v20 = vsel %vm469_vm0, %v4895_v37, 0 }
 0x1e0   : > { %v2109_v3 = vadd.f32 %v2090_v5, %v1903_v19  ;;  %v2366_v56 = vmax.f32 %v2350_v1, 0.0  ;;  %3811 = vmatpush.bf16.msrb.mxu0 %v3802_v20  ;;  %v4972_v19 = vld [vmem:[%s5334_s20 + $0x34] sm:$0xff] }
 0x1e1   : > { %v2092_v17 = vpop.f32.mrf.mxu0 }
 0x1e2   : > { %v2375_v42 = vpack.c.bf16 %v2366_v56, %v2365_v10  ;;  %v2315_v7 = vadd.f32 %v2296_v61, %v2109_v3 }
 0x1e3   : > { %v1660_v26 = vpop.f32.mrf.mxu2  ;;  %v2298_v28 = vpop.f32.mrf.mxu1 }
 0x1e4   : > { %v1678_v25 = vadd.f32 %v1660_v26, %v6223_v30  ;;  %v1886_v2 = vpop.f32.mrf.mxu3  ;;  %4617 = vmatmul.msk.bf16.gmra.mxu2 %vm2393_vm11, %v2375_v42  ;;  %v2333_v30 = vmul.f32 %v6247_v32, %v2315_v7  ;;  %v4965_v42 = vld [vmem:[%s5334_s20 + $0x3c] sm:$0xff]  ;;  %v2879_v26 = vld [vmem:[%s5334_s20 + $0x8] sm:$0xf] }
 0x1e6   : > { %v1904_v63 = vadd.f32 %v1886_v2, %v1678_v25  ;;  %v2351_v46 = vadd.f32 %v6260_v13, %v2333_v30  ;;  %v4966_v30 = vld [vmem:[%s5334_s20 + $0x48] sm:$0xff] }
 0x1e8   : > { %v2110_v38 = vadd.f32 %v2092_v17, %v1904_v63  ;;  %v2367_v1 = vmax.f32 %v2351_v46, 0.0 }
 0x1e9   : > { %4721 = vmatmul.msk.bf16.vlgmr.msra.gmra.mxu3 %vm444_vm4, %v4964_v24  ;;  %v2731_v27 = vpop.f32.mrf.mxu0 }
 0x1ea   : > { %v2316_v5 = vadd.f32 %v2298_v28, %v2110_v38  ;;  %v2897_v28 = vunpack.c.l.b16 %v2879_v26 }
 0x1eb   : > { %v2839_v52 = vpop.f32.mrf.mxu1 }
 0x1ec   : > { %v2334_v22 = vmul.f32 %v6247_v32, %v2316_v5  ;;  %v2512_v9 = vpop.f32.mrf.mxu3  ;;  %4730 = vmatmul.msk.bf16.vlgmr.msra.gmra.mxu0 %vm444_vm4, %v5397_v4  ;;  %v6468_v61 = vadd.f32 %v2839_v52, %v2731_v27  ;;  %v2905_v43 = vpack.c.b16 %v2897_v28, %v2780_v57  ;;  %v2898_v57 = vunpack.c.l.b16 %v6287_v50 }
 0x1ee   : > { %v2352_v31 = vadd.f32 %v6260_v13, %v2334_v22  ;;  %4779 = vmatmul.msk.bf16.vlgmr.msra.gmra.mxu1 %vm444_vm4, %v4972_v19  ;;  %v2906_v22 = vpack.c.b16 %v2898_v57, %v2782_v44  ;;  %v2899_v44 = vunpack.c.l.b16 %v6315_v51 }
 0x1f0   : > { %v2368_v32 = vmax.f32 %v2352_v31, 0.0 }
 0x1f1   : > { %v2733_v10 = vpop.f32.mrf.mxu0 }
 0x1f2   : > { %v2376_v3 = vpack.c.bf16 %v2368_v32, %v2367_v1 }
 0x1f3   : > { %v2841_v56 = vpop.f32.mrf.mxu1 }
 0x1f4   : > { %v2514_v4 = vpop.f32.mrf.mxu3  ;;  %4618 = vmatmul.msk.bf16.gmra.mxu2 %vm2393_vm11, %v2376_v3  ;;  %v6475_v17 = vadd.f32 %v2841_v56, %v2733_v10  ;;  %v2907_v56 = vpack.c.b16 %v2899_v44, %v2784_v62 }
 0x1f9   : > { %4722 = vmatmul.msk.bf16.gmra.mxu3 %vm444_vm4, %v4965_v42  ;;  %v2736_v13 = vpop.f32.mrf.mxu0  ;;  %v4975_v42 = vld [vmem:[%s5334_s20 + $0x58] sm:$0xff] }
 0x1fb   : > { %v2844_v25 = vpop.f32.mrf.mxu1 }
 0x1fc   : > { %v2517_v7 = vpop.f32.mrf.mxu3  ;;  %4731 = vmatmul.msk.bf16.gmra.mxu0 %vm444_vm4, %v5450_v60  ;;  %v6482_v2 = vadd.f32 %v2844_v25, %v2736_v13 }
 0x1fe   : > { %4780 = vmatmul.msk.bf16.gmra.mxu1 %vm444_vm4, %v4973_v54 }
 0x201   : > { %v2738_v24 = vpop.f32.mrf.mxu0 }
 0x203   : > { %v2846_v55 = vpop.f32.mrf.mxu1 }
 0x204   : > { %v2519_v48 = vpop.f32.mrf.mxu3  ;;  %4664 = vmatmul.msk.bf16.vlgmr.msra.gmra.mxu2 %vm444_vm4, %v2905_v43  ;;  %v6489_v63 = vadd.f32 %v2846_v55, %v2738_v24  ;;  %v2900_v43 = vunpack.c.l.b16 %v6343_v39 }
 0x207   : > { %v2427_v38 = vpop.f32.mrf.mxu2 }
 0x208   : > { %v6492_v40 = vadd.f32 %v2512_v9, %v2427_v38  ;;  %v4974_v9 = vld [vmem:[%s5334_s20 + $0x4c] sm:$0xff]  ;;  %v4976_v38 = vld [vmem:[%s5334_s20 + $0x64] sm:$0xff] }
 0x209   : > { %4723 = vmatmul.msk.bf16.gmra.mxu3 %vm444_vm4, %v4966_v30  ;;  %v2741_v60 = vpop.f32.mrf.mxu0  ;;  %v2908_v30 = vpack.c.b16 %v2900_v43, %v2786_v8 }
 0x20b   : > { %v2849_v27 = vpop.f32.mrf.mxu1 }
 0x20c   : > { %v2522_v33 = vpop.f32.mrf.mxu3  ;;  %4732 = vmatmul.msk.bf16.gmra.mxu0 %vm444_vm4, %v5500_v59  ;;  %v6498_v16 = vadd.f32 %v2849_v27, %v2741_v60  ;;  %v4967_v59 = vld [vmem:[%s5334_s20 + $0x54] sm:$0xff] }
 0x20e   : > { %4781 = vmatmul.msk.bf16.gmra.mxu1 %vm444_vm4, %v4974_v9 }
 0x20f   : > { %v2429_v5 = vpop.f32.mrf.mxu2 }
 0x210   : > { %v6500_v46 = vadd.f32 %v2514_v4, %v2429_v5  ;;  %v2901_v5 = vunpack.c.l.b16 %v6371_v47 }
 0x211   : > { %v2743_v52 = vpop.f32.mrf.mxu0 }
 0x213   : > { %v2851_v50 = vpop.f32.mrf.mxu1 }
 0x214   : > { %v2524_v37 = vpop.f32.mrf.mxu3  ;;  %4665 = vmatmul.msk.bf16.gmra.mxu2 %vm444_vm4, %v2906_v22  ;;  %v6507_v20 = vadd.f32 %v2851_v50, %v2743_v52  ;;  %v2909_v50 = vpack.c.b16 %v2901_v5, %v2788_v36  ;;  %v7043_v5 = vld [vmem:[#allocation5_spill] sm:$0xff] }
 0x217   : > { %v2432_v31 = vpop.f32.mrf.mxu2 }
 0x218   : > { %v6510_v1 = vadd.f32 %v2517_v7, %v2432_v31 }
 0x219   : > { %4724 = vmatmul.msk.bf16.gmra.mxu3 %vm444_vm4, %v4967_v59  ;;  %v2746_v32 = vpop.f32.mrf.mxu0  ;;  %v4977_v59 = vld [vmem:[%s5334_s20 + $0x70] sm:$0xff] }
 0x21b   : > { %v2854_v19 = vpop.f32.mrf.mxu1 }
 0x21c   : > { %v2527_v0 = vpop.f32.mrf.mxu3  ;;  %4733 = vmatmul.msk.bf16.gmra.mxu0 %vm444_vm4, %v5557_v11  ;;  %v6516_v10 = vadd.f32 %v2854_v19, %v2746_v32  ;;  %v4968_v11 = vld [vmem:[%s5334_s20 + $0x60] sm:$0xff]  ;;  %v2902_v19 = vunpack.c.l.b16 %v6399_v15 }
 0x21e   : > { %4782 = vmatmul.msk.bf16.gmra.mxu1 %vm444_vm4, %v4975_v42 }
 0x21f   : > { %v2434_v3 = vpop.f32.mrf.mxu2 }
 0x220   : > { %v6518_v4 = vadd.f32 %v2519_v48, %v2434_v3 }
 0x221   : > { %v2748_v26 = vpop.f32.mrf.mxu0 }
 0x223   : > { %v2856_v51 = vpop.f32.mrf.mxu1 }
 0x224   : > { %v2529_v13 = vpop.f32.mrf.mxu3  ;;  %4666 = vmatmul.msk.bf16.gmra.mxu2 %vm444_vm4, %v2907_v56  ;;  %v6525_v7 = vadd.f32 %v2856_v51, %v2748_v26  ;;  %v4978_v51 = vld [vmem:[%s5334_s20 + $0x7c] sm:$0xff] }
 0x227   : > { %v2437_v28 = vpop.f32.mrf.mxu2 }
 0x228   : > { %v6528_v25 = vadd.f32 %v2522_v33, %v2437_v28 }
 0x229   : > { %4725 = vmatmul.msk.bf16.gmra.mxu3 %vm444_vm4, %v4968_v11  ;;  %v2751_v29 = vpop.f32.mrf.mxu0 }
 0x22b   : > { %v2859_v54 = vpop.f32.mrf.mxu1 }
 0x22c   : > { %v2532_v62 = vpop.f32.mrf.mxu3  ;;  %4734 = vmatmul.msk.bf16.gmra.mxu0 %vm444_vm4, %v5378_v49  ;;  %v6534_v24 = vadd.f32 %v2859_v54, %v2751_v29  ;;  %v4969_v49 = vld [vmem:[%s5334_s20 + $0x6c] sm:$0xff]  ;;  %v4846_v54 = vld [vmem:[%s5334_s20 + $0x60] sm:$0xc] }
 0x22e   : > { %4783 = vmatmul.msk.bf16.gmra.mxu1 %vm444_vm4, %v4976_v38 }
 0x22f   : > { %v2439_v48 = vpop.f32.mrf.mxu2 }
 0x230   : > { %v6536_v55 = vadd.f32 %v2524_v37, %v2439_v48  ;;  %v4848_v48 = vld [vmem:[%s5334_s20 + $0x68] sm:$0x3] }
 0x231   : > { %v6541_v60 = vpop.f32.mrf.mxu0 }
 0x233   : > { %v6545_v39 = vpop.f32.mrf.mxu1 }
 0x234   : > { %v2534_v33 = vpop.f32.mrf.mxu3  ;;  %4667 = vmatmul.msk.bf16.gmra.mxu2 %vm444_vm4, %v2908_v30 }
 0x237   : > { %v2442_v57 = vpop.f32.mrf.mxu2 }
 0x238   : > { %v6548_v27 = vadd.f32 %v2527_v0, %v2442_v57  ;;  %v2903_v57 = vunpack.c.l.b16 %v6427_v6 }
 0x239   : > { %4726 = vmatmul.msk.bf16.gmra.mxu3 %vm444_vm4, %v4969_v49  ;;  %v2756_v18 = vpop.f32.mrf.mxu0 }
 0x23a   : > { %v2911_v6 = vpack.c.b16 %v2903_v57, %v2792_v14  ;;  %v2886_v14 = vld [vmem:[%s5334_s20 + $0x5c] sm:$0xf] }
 0x23b   : > { %v2864_v22 = vpop.f32.mrf.mxu1 }
 0x23c   : > { %v2537_v8 = vpop.f32.mrf.mxu3  ;;  %4735 = vmatmul.msk.bf16.gmra.mxu0 %vm444_vm4, %v5430_v41  ;;  %v6554_v9 = vadd.f32 %v2864_v22, %v2756_v18  ;;  %v4970_v41 = vld [vmem:[%s5334_s20 + $0x78] sm:$0xff] }
 0x23e   : > { %4784 = vmatmul.msk.bf16.gmra.mxu1 %vm444_vm4, %v4977_v59 }
 0x23f   : > { %v2444_v52 = vpop.f32.mrf.mxu2 }
 0x240   : > { %v6556_v37 = vadd.f32 %v2529_v13, %v2444_v52  ;;  %v2910_v13 = vpack.c.b16 %v2902_v19, %v2790_v58  ;;  %v4870_v58 = vrot.slane %v4846_v54, 10  ;;  %v4851_v54 = vld [vmem:[%s5334_s20 + $0x74] sm:$0x3] }
 0x241   : > { %v6561_v31 = vpop.f32.mrf.mxu0 }
 0x243   : > { %v6565_v47 = vpop.f32.mrf.mxu1 }
 0x244   : > { %v2539_v32 = vpop.f32.mrf.mxu3  ;;  %4668 = vmatmul.msk.bf16.gmra.mxu2 %vm444_vm4, %v2909_v50 }
 0x247   : > { %v2447_v0 = vpop.f32.mrf.mxu2 }
 0x248   : > { %v6568_v44 = vadd.f32 %v2532_v62, %v2447_v0  ;;  %v4847_v62 = vld [vmem:[%s5334_s20 + $0x64] sm:$0xf] }
 0x249   : > { %4727 = vmatmul.msk.bf16.gmra.mxu3 %vm444_vm4, %v4970_v41  ;;  %v2761_v45 = vpop.f32.mrf.mxu0  ;;  %v3563_v30 = vrot.slane %v4847_v62, 6  ;;  %v4979_v41 = vld [vmem:[%s5334_s20 + $0x88] sm:$0xff] }
 0x24a   : > { %v4849_v62 = vld [vmem:[%s5334_s20 + $0x6c] sm:$0xc] }
 0x24b   : > { %v2869_v3 = vpop.f32.mrf.mxu1  ;;  %v3565_v38 = vrot.slane %v3563_v30, 4  ;;  %v3564_v22 = vsel %vm5337_vm3, %v4870_v58, %v3563_v30  ;;  %v2904_v58 = vunpack.c.l.b16 %v2886_v14 }
 0x24c   : > { %v2542_v36 = vpop.f32.mrf.mxu3  ;;  %4736 = vmatmul.msk.bf16.gmra.mxu0 %vm444_vm4, %v5480_v35  ;;  %v6574_v56 = vadd.f32 %v2869_v3, %v2761_v45  ;;  %v4971_v35 = vld [vmem:[%s5334_s20 + $0x84] sm:$0xff]  ;;  %v3619_v45 = vunpack.c.l.b16 %v3564_v22 }
 0x24e   : > { %4785 = vmatmul.msk.bf16.gmra.mxu1 %vm444_vm4, %v4978_v51  ;;  %v4850_v51 = vld [vmem:[%s5334_s20 + $0x70] sm:$0xf] }
 0x24f   : > { %v2449_v42 = vpop.f32.mrf.mxu2  ;;  %v3570_v23 = vrot.slane %v4850_v51, 6 }
 0x250   : > { %v6576_v26 = vadd.f32 %v2534_v33, %v2449_v42  ;;  %v3566_v33 = vrot.slane %v4848_v48, 6  ;;  %v4871_v48 = vrot.slane %v4849_v62, 10 }
 0x251   : > { %v6581_v11 = vpop.f32.mrf.mxu0  ;;  %v3572_v30 = vrot.slane %v3570_v23, 4 }
 0x252   : > { %v3567_v52 = vsel %vm5337_vm3, %v3565_v38, %v3566_v33 }
 0x253   : > { %v6585_v28 = vpop.f32.mrf.mxu1  ;;  %v3620_v19 = vunpack.c.l.b16 %v3567_v52 }
 0x254   : > { %v2544_v15 = vpop.f32.mrf.mxu3  ;;  %4669 = vmatmul.msk.bf16.gmra.mxu2 %vm444_vm4, %v2910_v13 }
 0x255   : > { %v3635_v42 = vpack.c.b16 %v3620_v19, %v3619_v45  ;;  %v4853_v19 = vld [vmem:[%s5334_s20 + $0x7c] sm:$0xf] }
 0x256   : > { %v3577_v51 = vrot.slane %v4853_v19, 6  ;;  %v4990_v19 = vld [vmem:[%s5334_s20 + $0x7c] sm:$0xff] }
 0x257   : > { %v2452_v29 = vpop.f32.mrf.mxu2 }
 0x258   : > { %v6589_v43 = vadd.f32 %v2537_v8, %v2452_v29 }
 0x259   : > { %4728 = vmatmul.msk.bf16.gmra.mxu3 %vm444_vm4, %v4971_v35  ;;  %v2766_v53 = vpop.f32.mrf.mxu0  ;;  %v4988_v35 = vld [vmem:[%s5334_s20 + $0x64] sm:$0xff] }
 0x25b   : > { %v2874_v18 = vpop.f32.mrf.mxu1 }
 0x25c   : > { %v2547_v49 = vpop.f32.mrf.mxu3  ;;  %4737 = vmatmul.msk.bf16.gmra.mxu0 %vm444_vm4, %v7043_v5  ;;  %v6597_v8 = vadd.f32 %v2874_v18, %v2766_v53  ;;  %v3573_v53 = vrot.slane %v4851_v54, 6  ;;  %v2912_v5 = vpack.c.b16 %v2904_v58, %v2794_v21  ;;  %v4854_v21 = vld [vmem:[%s5334_s20 + $0x80] sm:$0x3] }
 0x25d   : > { %v3580_v14 = vrot.slane %v4854_v21, 6  ;;  %v4980_v58 = vld [vmem:[%s5334_s20 + $0x60] sm:$0xff] }
 0x25e   : > { %4786 = vmatmul.msk.bf16.gmra.mxu1 %vm444_vm4, %v4979_v41  ;;  %v3574_v33 = vsel %vm5337_vm3, %v3572_v30, %v3573_v53 }
 0x25f   : > { %v2454_v50 = vpop.f32.mrf.mxu2 }
 0x260   : > { %v6603_v59 = vadd.f32 %v2539_v32, %v2454_v50  ;;  %v3622_v50 = vunpack.c.l.b16 %v3574_v33 }
 0x261   : > { %v6608_v0 = vpop.f32.mrf.mxu0 }
 0x264   : > { %v2549_v3 = vpop.f32.mrf.mxu3  ;;  %4670 = vmatmul.msk.bf16.gmra.mxu2 %vm444_vm4, %v2911_v6 }
 0x267   : > { %v2457_v13 = vpop.f32.mrf.mxu2 }
 0x268   : > { %v6613_v32 = vadd.f32 %v2542_v36, %v2457_v13  ;;  %v3571_v36 = vsel %vm5337_vm3, %v4871_v48, %v3570_v23  ;;  %v4989_v13 = vld [vmem:[%s5334_s20 + $0x70] sm:$0xff]  ;;  %v3579_v23 = vrot.slane %v3577_v51, 4  ;;  %v4997_v48 = vld [vmem:[%s7029_s4 + $0x28] sm:$0xff] }
 0x269   : > { %4879 = vmatmul.msk.bf16.vlgmr.msrb.gmra.mxu3 %vm444_vm4, %v3635_v42  ;;  %v3169_v29 = vpop.f32.mrf.mxu0  ;;  %v3621_v52 = vunpack.c.l.b16 %v3571_v36  ;;  %3975 = vmatpush.bf16.msrb.mxu1 %v4997_v48 }
 0x26a   : > { %v3581_v54 = vsel %vm5337_vm3, %v3579_v23, %v3580_v14 }
 0x26b   : > { %v3636_v41 = vpack.c.b16 %v3622_v50, %v3621_v52 }
 0x26c   : > { %v3099_v38 = vpop.f32.mrf.mxu3  ;;  %4928 = vmatmul.msk.bf16.vlgmr.msrb.gmra.mxu0 %vm444_vm4, %v4988_v35  ;;  %v4872_v35 = vrot.slane %v4852_v34, 10  ;;  %v4857_v34 = vld [vmem:[%s5334_s20 + $0x8c] sm:$0x3] }
 0x26d   : > { %v3587_v14 = vrot.slane %v4857_v34, 6  ;;  %v4991_v34 = vld [vmem:[%s5334_s20 + $0x88] sm:$0xff] }
 0x26f   : > { %v2459_v57 = vpop.f32.mrf.mxu2 }
 0x270   : > { %v6625_v18 = vadd.f32 %v2544_v15, %v2459_v57  ;;  %v3624_v57 = vunpack.c.l.b16 %v3581_v54 }
 0x271   : > { %v3171_v22 = vpop.f32.mrf.mxu0 }
 0x274   : > { %4671 = vmatmul.msk.bf16.gmra.mxu2 %vm444_vm4, %v2912_v5  ;;  %v3101_v6 = vpop.f32.mrf.mxu3 }
 0x277   : > { %v2462_v45 = vpop.f32.mrf.mxu2 }
 0x278   : > { %v6631_v42 = vadd.f32 %v2547_v49, %v2462_v45  ;;  %v3578_v49 = vsel %vm5337_vm3, %v4872_v35, %v3577_v51  ;;  %v4855_v51 = vld [vmem:[%s5334_s20 + $0x84] sm:$0xc] }
 0x279   : > { %4880 = vmatmul.msk.bf16.gmra.mxu3 %vm444_vm4, %v3636_v41  ;;  %v6635_v15 = vpop.f32.mrf.mxu0  ;;  %v3623_v33 = vunpack.c.l.b16 %v3578_v49  ;;  %v4856_v41 = vld [vmem:[%s5334_s20 + $0x88] sm:$0xf]  ;;  %v4873_v35 = vrot.slane %v4855_v51, 10 }
 0x27b   : > { %v3637_v52 = vpack.c.b16 %v3624_v57, %v3623_v33 }
 0x27c   : > { %v3104_v62 = vpop.f32.mrf.mxu3  ;;  %4929 = vmatmul.msk.bf16.gmra.mxu0 %vm444_vm4, %v4989_v13  ;;  %v3584_v13 = vrot.slane %v4856_v41, 6 }
 0x27e   : > { %v3586_v23 = vrot.slane %v3584_v13, 4 }
 0x27f   : > { %v2464_v30 = vpop.f32.mrf.mxu2 }
 0x280   : > { %v6647_v53 = vadd.f32 %v2549_v3, %v2464_v30  ;;  %v3588_v48 = vsel %vm5337_vm3, %v3586_v23, %v3587_v14  ;;  %v4860_v23 = vld [vmem:[%s5334_s20 + $0x98] sm:$0x3] }
 0x281   : > { %v3176_v36 = vpop.f32.mrf.mxu0  ;;  %v3626_v57 = vunpack.c.l.b16 %v3588_v48 }
 0x284   : > { %4838 = vmatmul.msk.bf16.vlgmr.msrb.gmra.mxu2 %vm444_vm4, %v4980_v58  ;;  %v3106_v5 = vpop.f32.mrf.mxu3 }
 0x287   : > { %v2949_v50 = vpop.f32.mrf.mxu2 }
 0x288   : > { %v2989_v45 = vadd.f32 %v2949_v50, %v6468_v61  ;;  %v3585_v61 = vsel %vm5337_vm3, %v4873_v35, %v3584_v13  ;;  %v4859_v13 = vld [vmem:[%s5334_s20 + $0x94] sm:$0xf]  ;;  %v4858_v35 = vld [vmem:[%s5334_s20 + $0x90] sm:$0xc] }
 0x289   : > { %4881 = vmatmul.msk.bf16.gmra.mxu3 %vm444_vm4, %v3637_v52  ;;  %v6655_v3 = vpop.f32.mrf.mxu0  ;;  %v4874_v14 = vrot.slane %v4858_v35, 10 }
 0x28a   : > { %v3139_v21 = vadd.f32 %v3099_v38, %v2989_v45  ;;  %v4981_v38 = vld [vmem:[%s5334_s20 + $0x6c] sm:$0xff] }
 0x28c   : > { %v6659_v49 = vadd.f32 %v3169_v29, %v3139_v21  ;;  %v3109_v54 = vpop.f32.mrf.mxu3  ;;  %4930 = vmatmul.msk.bf16.gmra.mxu0 %vm444_vm4, %v4990_v19  ;;  %v3625_v29 = vunpack.c.l.b16 %v3585_v61 }
 0x28e   : > { %v3638_v45 = vpack.c.b16 %v3626_v57, %v3625_v29  ;;  %v4982_v29 = vld [vmem:[%s5334_s20 + $0x78] sm:$0xff] }
 0x28f   : > { %v2951_v30 = vpop.f32.mrf.mxu2 }
 0x290   : > { %v2990_v58 = vadd.f32 %v2951_v30, %v6475_v17  ;;  %v3591_v17 = vrot.slane %v4859_v13, 6 }
 0x291   : > { %v6668_v33 = vpop.f32.mrf.mxu0 }
 0x292   : > { %v3140_v52 = vadd.f32 %v3101_v6, %v2990_v58  ;;  %v3593_v61 = vrot.slane %v3591_v17, 4 }
 0x294   : > { %4839 = vmatmul.msk.bf16.gmra.mxu2 %vm444_vm4, %v4981_v38  ;;  %v6671_v50 = vadd.f32 %v3171_v22, %v3140_v52  ;;  %v3111_v41 = vpop.f32.mrf.mxu3  ;;  %v3594_v22 = vrot.slane %v4860_v23, 6  ;;  %v4992_v23 = vld [vmem:[%s5334_s20 + $0x94] sm:$0xff] }
 0x296   : > { %v3595_v58 = vsel %vm5337_vm3, %v3593_v61, %v3594_v22  ;;  %v4863_v61 = vld [vmem:[%s5334_s20 + $0xa4] sm:$0x3] }
 0x297   : > { %v2954_v19 = vpop.f32.mrf.mxu2  ;;  %v3628_v52 = vunpack.c.l.b16 %v3595_v58 }
 0x298   : > { %v2991_v51 = vadd.f32 %v2954_v19, %v6482_v2  ;;  %v3592_v2 = vsel %vm5337_vm3, %v4874_v14, %v3591_v17  ;;  %v4862_v17 = vld [vmem:[%s5334_s20 + $0xa0] sm:$0xf]  ;;  %v4861_v14 = vld [vmem:[%s5334_s20 + $0x9c] sm:$0xc] }
 0x299   : > { %4882 = vmatmul.msk.bf16.gmra.mxu3 %vm444_vm4, %v3638_v45  ;;  %v6677_v21 = vpop.f32.mrf.mxu0  ;;  %v4875_v22 = vrot.slane %v4861_v14, 10 }
 0x29a   : > { %v3141_v6 = vadd.f32 %v3104_v62, %v2991_v51 }
 0x29c   : > { %v6682_v48 = vadd.f32 %v6635_v15, %v3141_v6  ;;  %v3114_v30 = vpop.f32.mrf.mxu3  ;;  %4931 = vmatmul.msk.bf16.gmra.mxu0 %vm444_vm4, %v4991_v34  ;;  %v3627_v15 = vunpack.c.l.b16 %v3592_v2 }
 0x29e   : > { %v3639_v51 = vpack.c.b16 %v3628_v52, %v3627_v15  ;;  %v4983_v15 = vld [vmem:[%s5334_s20 + $0x84] sm:$0xff] }
 0x29f   : > { %v2956_v38 = vpop.f32.mrf.mxu2 }
 0x2a0   : > { %v2992_v62 = vadd.f32 %v2956_v38, %v6489_v63  ;;  %v3598_v63 = vrot.slane %v4862_v17, 6 }
 0x2a1   : > { %v6691_v57 = vpop.f32.mrf.mxu0 }
 0x2a2   : > { %v3142_v45 = vadd.f32 %v3106_v5, %v2992_v62  ;;  %v3600_v2 = vrot.slane %v3598_v63, 4 }
 0x2a4   : > { %4840 = vmatmul.msk.bf16.gmra.mxu2 %vm444_vm4, %v4982_v29  ;;  %v6694_v19 = vadd.f32 %v3176_v36, %v3142_v45  ;;  %v3116_v13 = vpop.f32.mrf.mxu3  ;;  %v3601_v36 = vrot.slane %v4863_v61, 6 }
 0x2a6   : > { %v3602_v62 = vsel %vm5337_vm3, %v3600_v2, %v3601_v36  ;;  %v4866_v2 = vld [vmem:[%s5334_s20 + $0xb0] sm:$0x3] }
 0x2a7   : > { %v2959_v34 = vpop.f32.mrf.mxu2  ;;  %v3630_v45 = vunpack.c.l.b16 %v3602_v62  ;;  %v3608_v62 = vrot.slane %v4866_v2, 6 }
 0x2a8   : > { %v2993_v35 = vadd.f32 %v2959_v34, %v6498_v16  ;;  %v3599_v16 = vsel %vm5337_vm3, %v4875_v22, %v3598_v63  ;;  %v4865_v63 = vld [vmem:[%s5334_s20 + $0xac] sm:$0xf]  ;;  %v4864_v22 = vld [vmem:[%s5334_s20 + $0xa8] sm:$0xc] }
 0x2a9   : > { %4883 = vmatmul.msk.bf16.gmra.mxu3 %vm444_vm4, %v3639_v51  ;;  %v6700_v6 = vpop.f32.mrf.mxu0  ;;  %v3605_v61 = vrot.slane %v4865_v63, 6  ;;  %v4876_v36 = vrot.slane %v4864_v22, 10  ;;  %v4868_v22 = vld [vmem:[%s5334_s20 + $0xb8] sm:$0xf] }
 0x2aa   : > { %v3143_v5 = vadd.f32 %v3109_v54, %v2993_v35 }
 0x2ac   : > { %v6705_v58 = vadd.f32 %v6655_v3, %v3143_v5  ;;  %v3119_v38 = vpop.f32.mrf.mxu3  ;;  %4932 = vmatmul.msk.bf16.gmra.mxu0 %vm444_vm4, %v4992_v23  ;;  %v3629_v3 = vunpack.c.l.b16 %v3599_v16  ;;  %v3607_v16 = vrot.slane %v3605_v61, 4 }
 0x2ae   : > { %v3640_v35 = vpack.c.b16 %v3630_v45, %v3629_v3 }
 0x2af   : > { %v2961_v29 = vpop.f32.mrf.mxu2 }
 0x2b0   : > { %v2994_v54 = vadd.f32 %v2961_v29, %v6507_v20  ;;  %v4993_v20 = vld [vmem:[%s5334_s20 + $0xa0] sm:$0xff] }
 0x2b1   : > { %v6714_v52 = vpop.f32.mrf.mxu0 }
 0x2b2   : > { %v3144_v51 = vadd.f32 %v3111_v41, %v2994_v54  ;;  %v3609_v54 = vsel %vm5337_vm3, %v3607_v16, %v3608_v62  ;;  %v4867_v16 = vld [vmem:[%s5334_s20 + $0xb4] sm:$0xc]  ;;  %v4869_v62 = vld [vmem:[%s5334_s20 + $0xbc] sm:$0x3] }
 0x2b4   : > { %4841 = vmatmul.msk.bf16.gmra.mxu2 %vm444_vm4, %v4983_v15  ;;  %v6718_v34 = vadd.f32 %v6668_v33, %v3144_v51  ;;  %v3121_v17 = vpop.f32.mrf.mxu3 }
 0x2b7   : > { %v2964_v23 = vpop.f32.mrf.mxu2 }
 0x2b8   : > { %v2995_v14 = vadd.f32 %v2964_v23, %v6516_v10  ;;  %v3606_v10 = vsel %vm5337_vm3, %v4876_v36, %v3605_v61 }
 0x2b9   : > { %4884 = vmatmul.msk.bf16.gmra.mxu3 %vm444_vm4, %v3640_v35  ;;  %v3194_v5 = vpop.f32.mrf.mxu0  ;;  %v3631_v51 = vunpack.c.l.b16 %v3606_v10  ;;  %v3632_v35 = vunpack.c.l.b16 %v3609_v54  ;;  %v4877_v10 = vrot.slane %v4867_v16, 10 }
 0x2ba   : > { %v3145_v41 = vadd.f32 %v3114_v30, %v2995_v14  ;;  %v4996_v30 = vld [vmem:[%s7029_s4 + $0x20] sm:$0xff] }
 0x2bb   : > { %3976 = vmatpush.bf16.msrb.mxu1 %v4996_v30  ;;  %v3615_v30 = vrot.slane %v4869_v62, 6 }
 0x2bc   : > { %v6727_v33 = vadd.f32 %v6677_v21, %v3145_v41  ;;  %v3124_v29 = vpop.f32.mrf.mxu3  ;;  %4933 = vmatmul.msk.bf16.gmra.mxu0 %vm444_vm4, %v4993_v20  ;;  %v4984_v21 = vld [vmem:[%s5334_s20 + $0x90] sm:$0xff]  ;;  %v3641_v20 = vpack.c.b16 %v3632_v35, %v3631_v51  ;;  %v3612_v41 = vrot.slane %v4868_v22, 6  ;;  %v4985_v35 = vld [vmem:[%s5334_s20 + $0x9c] sm:$0xff] }
 0x2be   : > { %v3614_v54 = vrot.slane %v3612_v41, 4 }
 0x2bf   : > { %v2966_v15 = vpop.f32.mrf.mxu2 }
 0x2c0   : > { %v2996_v3 = vadd.f32 %v2966_v15, %v6525_v7  ;;  %v4994_v7 = vld [vmem:[%s5334_s20 + $0xac] sm:$0xff] }
 0x2c1   : > { %v3196_v45 = vpop.f32.mrf.mxu0 }
 0x2c2   : > { %v3146_v23 = vadd.f32 %v3116_v13, %v2996_v3  ;;  %v3613_v3 = vsel %vm5337_vm3, %v4877_v10, %v3612_v41 }
 0x2c4   : > { %4842 = vmatmul.msk.bf16.gmra.mxu2 %vm444_vm4, %v4984_v21  ;;  %v6741_v63 = vadd.f32 %v6691_v57, %v3146_v23  ;;  %v3126_v14 = vpop.f32.mrf.mxu3  ;;  %v3616_v21 = vsel %vm5337_vm3, %v3614_v54, %v3615_v30  ;;  %v4986_v30 = vld [vmem:[%s5334_s20 + $0xa8] sm:$0xff] }
 0x2c7   : > { %v2969_v61 = vpop.f32.mrf.mxu2 }
 0x2c8   : > { %v2997_v2 = vadd.f32 %v2969_v61, %v6534_v24  ;;  %v2862_v24 = vadd.f32 %v6545_v39, %v6541_v60 }
 0x2c9   : > { %4885 = vmatmul.msk.bf16.gmra.mxu3 %vm444_vm4, %v3641_v20  ;;  %v3199_v36 = vpop.f32.mrf.mxu0  ;;  %v3633_v20 = vunpack.c.l.b16 %v3613_v3 }
 0x2ca   : > { %v3147_v13 = vadd.f32 %v3119_v38, %v2997_v2 }
 0x2cc   : > { %v6750_v57 = vadd.f32 %v6700_v6, %v3147_v13  ;;  %v3129_v15 = vpop.f32.mrf.mxu3  ;;  %4934 = vmatmul.msk.bf16.gmra.mxu0 %vm444_vm4, %v4994_v7  ;;  %v3634_v6 = vunpack.c.l.b16 %v3616_v21 }
 0x2ce   : > { %v3642_v39 = vpack.c.b16 %v3634_v6, %v3633_v20 }
 0x2cf   : > { %v2971_v38 = vpop.f32.mrf.mxu2 }
 0x2d0   : > { %v2998_v51 = vadd.f32 %v2971_v38, %v2862_v24 }
 0x2d1   : > { %v3201_v23 = vpop.f32.mrf.mxu0 }
 0x2d2   : > { %v3148_v61 = vadd.f32 %v3121_v17, %v2998_v51  ;;  %v2876_v17 = vpop.f32.mrf.mxu1 }
 0x2d4   : > { %4843 = vmatmul.msk.bf16.gmra.mxu2 %vm444_vm4, %v4985_v35  ;;  %v6762_v22 = vadd.f32 %v6714_v52, %v3148_v61  ;;  %v3131_v60 = vpop.f32.mrf.mxu3  ;;  %v2867_v52 = vadd.f32 %v6565_v47, %v6561_v31  ;;  %v2872_v47 = vadd.f32 %v6585_v28, %v6581_v11  ;;  %v2877_v11 = vadd.f32 %v2876_v17, %v6608_v0  ;;  %v6796_v17 = vld [vmem:[%s7030_s5 + $0x2] ss:$0 sm:$0xff] }
 0x2d7   : > { %v2974_v2 = vpop.f32.mrf.mxu2 }
 0x2d8   : > { %v2999_v7 = vadd.f32 %v2974_v2, %v6554_v9 }
 0x2d9   : > { %4886 = vmatmul.msk.bf16.gmra.mxu3 %vm444_vm4, %v3642_v39  ;;  %v3204_v41 = vpop.f32.mrf.mxu0  ;;  %v4987_v39 = vld [vmem:[%s5334_s20 + $0xb4] sm:$0xff]  ;;  %s4956_s20 = sshll.u32 %s4152_s16, 2 }
 0x2da   : > { %v3149_v16 = vadd.f32 %v3124_v29, %v2999_v7  ;;  %s4154_s17 = scalar_lea.hbm %s7032_s7, %s4956_s20 }
 0x2db   : > { %s4157_s9 = sshll.u32 %s4154_s17, 4  ;;  %s4158_s9 = int_to_ptr.hbm [resolvable:$true] %s4157_s9 }
 0x2dc   : > { %v6767_v62 = vadd.f32 %v3194_v5, %v3149_v16  ;;  %v3134_v13 = vpop.f32.mrf.mxu3  ;;  %4935 = vmatmul.msk.bf16.gmra.mxu0 %vm444_vm4, %v4995_v12  ;;  %v3303_v5 = vpop.f32.mrf.mxu1  ;;  %s5106_s23 = sshra.s32 %s4158_s9, 4  ;;  %s5107_s23 = int_to_ptr.hbm [resolvable:$true] %s5106_s23 }
 0x2dd   : > { %s5108_s13 = scalar_lea.hbm %s5107_s23, 64  ;;  %p5113_p2 = scmp.lt.s32.totalorder %s5107_s23, %s7032_s7 }
 0x2de   : > { %p5109_p13 = scmp.ne.s32.totalorder %s5107_s23, %s5108_s13  ;;  %p5114_p4 = scmp.lt.s32.totalorder %s5112_s27, %s5108_s13 }
 0x2df   : > { %v2976_v10 = vpop.f32.mrf.mxu2 }
 0x2e0   : > { %v3000_v54 = vadd.f32 %v2976_v10, %v2867_v52  ;;  %p5110_p0 = pnand %p5109_p13, %p5281_p3  ;;  %p5115_p5 = por %p5114_p4, %p5113_p2 }
 0x2e1   : > { %v3206_v9 = vpop.f32.mrf.mxu0 }
 0x2e2   : > { %v3150_v24 = vadd.f32 %v3126_v14, %v3000_v54  ;;  %p5111_p1 = pneg %p5110_p0 }
 0x2e4   : > { %4844 = vmatmul.msk.bf16.gmra.mxu2 %vm444_vm4, %v4986_v30  ;;  %v6774_v3 = vadd.f32 %v3196_v45, %v3150_v24  ;;  %v3136_v29 = vpop.f32.mrf.mxu3  ;;  %v3305_v14 = vpop.f32.mrf.mxu1  ;;  %p5116_p6 = pnand %p5115_p5, %p5111_p1 }
 0x2e7   : > { %v2979_v21 = vpop.f32.mrf.mxu2 }
 0x2e8   : > { %v3001_v38 = vadd.f32 %v2979_v21, %v6574_v56  ;;  %v3343_v21 = vadd.f32 %v3303_v5, %v6659_v49  ;;  %v6806_v5 = vld [vmem:[%s7031_s6 + $0x2] ss:$0 sm:$0xff] }
 0x2e9   : > { %v3813_v31 = vpop.f32.mrf.mxu0 }
 0x2ea   : > { %v3151_v51 = vadd.f32 %v3129_v15, %v3001_v38 }
 0x2ec   : > { %v6777_v35 = vadd.f32 %v3199_v36, %v3151_v51  ;;  %v3679_v20 = vpop.f32.mrf.mxu3  ;;  %v3308_v15 = vpop.f32.mrf.mxu1 }
 0x2ef   : > { %v2981_v6 = vpop.f32.mrf.mxu2 }
 0x2f0   : > { %v3002_v61 = vadd.f32 %v2981_v6, %v2872_v47  ;;  %v3344_v6 = vadd.f32 %v3305_v14, %v6671_v50 }
 0x2f1   : > { %v3815_v56 = vpop.f32.mrf.mxu0 }
 0x2f2   : > { %v3152_v2 = vadd.f32 %v3131_v60, %v3002_v61  ;;  %v3345_v61 = vadd.f32 %v3308_v15, %v6682_v48 }
 0x2f4   : > { %4845 = vmatmul.msk.bf16.gmra.mxu2 %vm444_vm4, %v4987_v39  ;;  %v6783_v45 = vadd.f32 %v3201_v23, %v3152_v2  ;;  %v3681_v7 = vpop.f32.mrf.mxu3  ;;  %v3310_v24 = vpop.f32.mrf.mxu1 }
 0x2f7   : > { %v2984_v12 = vpop.f32.mrf.mxu2 }
 0x2f8   : > { %v3003_v36 = vadd.f32 %v2984_v12, %v6597_v8 }
 0x2f9   : > { %v3818_v60 = vpop.f32.mrf.mxu0 }
 0x2fa   : > { %v3153_v16 = vadd.f32 %v3134_v13, %v3003_v36 }
 0x2fc   : > { %v6786_v52 = vadd.f32 %v3204_v41, %v3153_v16  ;;  %v3684_v10 = vpop.f32.mrf.mxu3  ;;  %v3313_v41 = vpop.f32.mrf.mxu1 }
 0x2ff   : > { %v2986_v28 = vpop.f32.mrf.mxu2 }
 0x300   : > { %v3004_v54 = vadd.f32 %v2986_v28, %v2877_v11 }
 0x301   : > { %v3820_v13 = vpop.f32.mrf.mxu0 }
 0x302   : > { %v3154_v30 = vadd.f32 %v3136_v29, %v3004_v54 }
 0x304   : > { %v6789_v23 = vadd.f32 %v3206_v9, %v3154_v30  ;;  %v3686_v8 = vpop.f32.mrf.mxu3  ;;  %v3315_v12 = vpop.f32.mrf.mxu1 }
 0x307   : > { %v3457_v38 = vpop.f32.mrf.mxu2 }
 0x308   : > { %v3497_v51 = vadd.f32 %v3457_v38, %v3343_v21 }
 0x309   : > { %v3823_v14 = vpop.f32.mrf.mxu0 }
 0x30a   : > { %v3719_v47 = vadd.f32 %v3679_v20, %v3497_v51 }
 0x30c   : > { %v3853_v0 = vadd.f32 %v3813_v31, %v3719_v47  ;;  %v3689_v20 = vpop.f32.mrf.mxu3  ;;  %v3318_v47 = vpop.f32.mrf.mxu1 }
 0x30e   : > { %v3871_v29 = vmul.f32 %v6796_v17, %v3853_v0 }
 0x30f   : > { %v3459_v9 = vpop.f32.mrf.mxu2 }
 0x310   : > { %v3498_v49 = vadd.f32 %v3459_v9, %v3344_v6  ;;  %v3889_v39 = vadd.f32 %v6806_v5, %v3871_v29 }
 0x311   : > { %v3825_v15 = vpop.f32.mrf.mxu0 }
 0x312   : > { %v3720_v50 = vadd.f32 %v3681_v7, %v3498_v49  ;;  %v3905_v28 = vmax.f32 %v3889_v39, 0.0  ;;  %v3346_v7 = vadd.f32 %v3310_v24, %v6694_v19  ;;  %v3347_v49 = vadd.f32 %v3313_v41, %v6705_v58 }
 0x314   : > { %v3854_v31 = vadd.f32 %v3815_v56, %v3720_v50  ;;  %v3691_v38 = vpop.f32.mrf.mxu3 }
 0x316   : > { %v3872_v2 = vmul.f32 %v6796_v17, %v3854_v31 }
 0x317   : > { %v3462_v36 = vpop.f32.mrf.mxu2 }
 0x318   : > { %v3890_v16 = vadd.f32 %v6806_v5, %v3872_v2  ;;  %v3499_v11 = vadd.f32 %v3462_v36, %v3345_v61  ;;  %v3320_v36 = vpop.f32.mrf.mxu1 }
 0x319   : > { %v3828_v24 = vpop.f32.mrf.mxu0 }
 0x31a   : > { %v3906_v54 = vmax.f32 %v3890_v16, 0.0  ;;  %v3721_v30 = vadd.f32 %v3684_v10, %v3499_v11 }
 0x31c   : > { %v3921_v21 = vpack.c.bf16 %v3906_v54, %v3905_v28  ;;  %v3855_v56 = vadd.f32 %v3818_v60, %v3721_v30  ;;  %v3694_v31 = vpop.f32.mrf.mxu3 }
 0x31e   : > { %4944 = vmatmul.msk.bf16.vlgmr.msrb.gmra.mxu1 %vm2393_vm11, %v3921_v21  ;;  %v3873_v6 = vmul.f32 %v6796_v17, %v3855_v56  ;;  %v3349_v56 = vadd.f32 %v3318_v47, %v6727_v33 }
 0x31f   : > { %v3464_v48 = vpop.f32.mrf.mxu2 }
 0x320   : > { %v3500_v51 = vadd.f32 %v3464_v48, %v3346_v7  ;;  %v3891_v29 = vadd.f32 %v6806_v5, %v3873_v6  ;;  %v3323_v7 = vpop.f32.mrf.mxu1 }
 0x321   : > { %v3830_v30 = vpop.f32.mrf.mxu0 }
 0x322   : > { %v3722_v0 = vadd.f32 %v3686_v8, %v3500_v51  ;;  %v3907_v61 = vmax.f32 %v3891_v29, 0.0  ;;  %v3348_v8 = vadd.f32 %v3315_v12, %v6718_v34 }
 0x324   : > { %v3856_v9 = vadd.f32 %v3820_v13, %v3722_v0  ;;  %v3696_v11 = vpop.f32.mrf.mxu3 }
 0x326   : > { %v3874_v10 = vmul.f32 %v6796_v17, %v3856_v9 }
 0x327   : > { %v3467_v50 = vpop.f32.mrf.mxu2 }
 0x328   : > { %v3892_v19 = vadd.f32 %v6806_v5, %v3874_v10  ;;  %v3501_v60 = vadd.f32 %v3467_v50, %v3347_v49  ;;  %v3325_v33 = vpop.f32.mrf.mxu1 }
 0x329   : > { %v3833_v29 = vpop.f32.mrf.mxu0 }
 0x32a   : > { %v3908_v39 = vmax.f32 %v3892_v19, 0.0  ;;  %v3723_v2 = vadd.f32 %v3689_v20, %v3501_v60 }
 0x32c   : > { %v3922_v16 = vpack.c.bf16 %v3908_v39, %v3907_v61  ;;  %v3857_v13 = vadd.f32 %v3823_v14, %v3723_v2  ;;  %v3699_v9 = vpop.f32.mrf.mxu3  ;;  %v3351_v39 = vadd.f32 %v3323_v7, %v6750_v57 }
 0x32e   : > { %4945 = vmatmul.msk.bf16.gmra.mxu1 %vm2393_vm11, %v3922_v16  ;;  %v3875_v28 = vmul.f32 %v6796_v17, %v3857_v13 }
 0x32f   : > { %v3469_v58 = vpop.f32.mrf.mxu2 }
 0x330   : > { %v3502_v41 = vadd.f32 %v3469_v58, %v3348_v8  ;;  %v3893_v20 = vadd.f32 %v6806_v5, %v3875_v28 }
 0x331   : > { %v3835_v8 = vpop.f32.mrf.mxu0 }
 0x332   : > { %v3724_v54 = vadd.f32 %v3691_v38, %v3502_v41  ;;  %v3909_v12 = vmax.f32 %v3893_v20, 0.0  ;;  %v3350_v38 = vadd.f32 %v3320_v36, %v6741_v63  ;;  %v3328_v36 = vpop.f32.mrf.mxu1 }
 0x334   : > { %v3858_v21 = vadd.f32 %v3825_v15, %v3724_v54  ;;  %v3701_v61 = vpop.f32.mrf.mxu3 }
 0x336   : > { %v3876_v48 = vmul.f32 %v6796_v17, %v3858_v21 }
 0x337   : > { %v3472_v51 = vpop.f32.mrf.mxu2 }
 0x338   : > { %v3894_v34 = vadd.f32 %v6806_v5, %v3876_v48  ;;  %v3503_v14 = vadd.f32 %v3472_v51, %v3349_v56 }
 0x339   : > { %v3838_v7 = vpop.f32.mrf.mxu0 }
 0x33a   : > { %v3910_v6 = vmax.f32 %v3894_v34, 0.0  ;;  %v3725_v0 = vadd.f32 %v3694_v31, %v3503_v14  ;;  %v3330_v48 = vpop.f32.mrf.mxu1  ;;  %v3353_v34 = vadd.f32 %v3328_v36, %v6767_v62 }
 0x33c   : > { %v3923_v49 = vpack.c.bf16 %v3910_v6, %v3909_v12  ;;  %v3859_v15 = vadd.f32 %v3828_v24, %v3725_v0 }
 0x33e   : > { %4946 = vmatmul.msk.bf16.gmra.mxu1 %vm2393_vm11, %v3923_v49  ;;  %v3877_v50 = vmul.f32 %v6796_v17, %v3859_v15 }
 0x33f   : > { %v3474_v47 = vpop.f32.mrf.mxu2 }
 0x340   : > { %v3504_v10 = vadd.f32 %v3474_v47, %v3350_v38  ;;  %v3895_v31 = vadd.f32 %v6806_v5, %v3877_v50 }
 0x341   : > { %v3840_v15 = vpop.f32.mrf.mxu0 }
 0x342   : > { %v3726_v19 = vadd.f32 %v3696_v11, %v3504_v10  ;;  %v3911_v13 = vmax.f32 %v3895_v31, 0.0  ;;  %v3352_v11 = vadd.f32 %v3325_v33, %v6762_v22  ;;  %v3333_v47 = vpop.f32.mrf.mxu1  ;;  %v3354_v10 = vadd.f32 %v3330_v48, %v6774_v3 }
 0x344   : > { %v3860_v60 = vadd.f32 %v3830_v30, %v3726_v19  ;;  %v3704_v30 = vpop.f32.mrf.mxu3 }
 0x346   : > { %v3878_v2 = vmul.f32 %v6796_v17, %v3860_v60 }
 0x347   : > { %v3477_v16 = vpop.f32.mrf.mxu2 }
 0x348   : > { %v3896_v63 = vadd.f32 %v6806_v5, %v3878_v2  ;;  %v3505_v24 = vadd.f32 %v3477_v16, %v3351_v39  ;;  %v3355_v16 = vadd.f32 %v3333_v47, %v6777_v35 }
 0x349   : > { %v3843_v2 = vpop.f32.mrf.mxu0 }
 0x34a   : > { %v3912_v58 = vmax.f32 %v3896_v63, 0.0  ;;  %v3727_v41 = vadd.f32 %v3699_v9, %v3505_v24  ;;  %v3335_v24 = vpop.f32.mrf.mxu1 }
 0x34c   : > { %v3924_v28 = vpack.c.bf16 %v3912_v58, %v3911_v13  ;;  %v3861_v54 = vadd.f32 %v3833_v29, %v3727_v41  ;;  %v3706_v9 = vpop.f32.mrf.mxu3 }
 0x34e   : > { %4947 = vmatmul.msk.bf16.gmra.mxu1 %vm2393_vm11, %v3924_v28  ;;  %v3879_v56 = vmul.f32 %v6796_v17, %v3861_v54 }
 0x34f   : > { %v3479_v57 = vpop.f32.mrf.mxu2 }
 0x350   : > { %v3506_v21 = vadd.f32 %v3479_v57, %v3352_v11  ;;  %v3897_v14 = vadd.f32 %v6806_v5, %v3879_v56  ;;  %v3356_v57 = vadd.f32 %v3335_v24, %v6783_v45  ;;  %v6866_v24 = vld [vmem:[%s299_s21] ss:$0 sm:$0xff]  ;;  %s6887_s21 = scalar_lea.vmem [#allocation2], %s4266_s10  ;;  %s4140_s10 = scalar_lea.sflag [#allocation3], %s294_s22 }
 0x351   : > { %v3845_v35 = vpop.f32.mrf.mxu0  ;;  %s4155_s18 = sshll.u32 %s6887_s21, 4  ;;  %s4156_s18 = int_to_ptr.vmem [resolvable:$true] %s4155_s18 }
 0x352   : > { %v3728_v20 = vadd.f32 %v3701_v61, %v3506_v21  ;;  %v3913_v49 = vmax.f32 %v3897_v14, 0.0  ;;  %v3338_v56 = vpop.f32.mrf.mxu1 }
 0x354   : > { %v3862_v51 = vadd.f32 %v3835_v8, %v3728_v20  ;;  %v3709_v39 = vpop.f32.mrf.mxu3 }
 0x356   : > { %v3880_v12 = vmul.f32 %v6796_v17, %v3862_v51 }
 0x357   : > { %v3482_v6 = vpop.f32.mrf.mxu2 }
 0x358   : > { %v3898_v22 = vadd.f32 %v6806_v5, %v3880_v12  ;;  %v3507_v0 = vadd.f32 %v3482_v6, %v3353_v34  ;;  %v3357_v34 = vadd.f32 %v3338_v56, %v6786_v52 }
 0x35a   : > { %v3914_v29 = vmax.f32 %v3898_v22, 0.0  ;;  %v3729_v38 = vadd.f32 %v3704_v30, %v3507_v0 }
 0x35c   : > { %v3925_v33 = vpack.c.bf16 %v3914_v29, %v3913_v49  ;;  %v3863_v50 = vadd.f32 %v3838_v7, %v3729_v38  ;;  %v3711_v54 = vpop.f32.mrf.mxu3 }
 0x35e   : > { %4948 = vmatmul.msk.bf16.gmra.mxu1 %vm2393_vm11, %v3925_v33  ;;  %v3881_v60 = vmul.f32 %v6796_v17, %v3863_v50 }
 0x35f   : > { %v3484_v62 = vpop.f32.mrf.mxu2 }
 0x360   : > { %v3508_v19 = vadd.f32 %v3484_v62, %v3354_v10  ;;  %v3899_v8 = vadd.f32 %v6806_v5, %v3881_v60 }
 0x362   : > { %v3730_v61 = vadd.f32 %v3706_v9, %v3508_v19  ;;  %v3915_v58 = vmax.f32 %v3899_v8, 0.0  ;;  %v3848_v9 = vpop.f32.mrf.mxu0 }
 0x364   : > { %v3864_v31 = vadd.f32 %v3840_v15, %v3730_v61  ;;  %v3714_v6 = vpop.f32.mrf.mxu3  ;;  %v3340_v15 = vpop.f32.mrf.mxu1 }
 0x365   : > { %v3358_v47 = vadd.f32 %v3340_v15, %v6789_v23 }
 0x366   : > { %v3882_v63 = vmul.f32 %v6796_v17, %v3864_v31 }
 0x367   : > { %v3487_v36 = vpop.f32.mrf.mxu2 }
 0x368   : > { %v3900_v3 = vadd.f32 %v6806_v5, %v3882_v63  ;;  %v3509_v13 = vadd.f32 %v3487_v36, %v3355_v16 }
 0x36a   : > { %v3916_v41 = vmax.f32 %v3900_v3, 0.0  ;;  %v3731_v28 = vadd.f32 %v3709_v39, %v3509_v13  ;;  %v3850_v61 = vpop.f32.mrf.mxu0  ;;  %v6878_v13 = vld [vmem:[%s7031_s6 + $0x3] ss:$0 sm:$0xff] }
 0x36c   : > { %v3926_v11 = vpack.c.bf16 %v3916_v41, %v3915_v58  ;;  %v3865_v30 = vadd.f32 %v3843_v2, %v3731_v28  ;;  %v3716_v62 = vpop.f32.mrf.mxu3 }
 0x36e   : > { %4949 = vmatmul.msk.bf16.gmra.mxu1 %vm2393_vm11, %v3926_v11  ;;  %v3883_v20 = vmul.f32 %v6796_v17, %v3865_v30 }
 0x36f   : > { %v3489_v21 = vpop.f32.mrf.mxu2 }
 0x370   : > { %v3510_v7 = vadd.f32 %v3489_v21, %v3356_v57  ;;  %v3901_v14 = vadd.f32 %v6806_v5, %v3883_v20 }
 0x372   : > { %v3732_v48 = vadd.f32 %v3711_v54, %v3510_v7  ;;  %v3917_v49 = vmax.f32 %v3901_v14, 0.0 }
 0x374   : > { %v3866_v51 = vadd.f32 %v3845_v35, %v3732_v48 }
 0x376   : > { %v3884_v12 = vmul.f32 %v6796_v17, %v3866_v51 }
 0x377   : > { %v3492_v22 = vpop.f32.mrf.mxu2 }
 0x378   : > { %v3902_v45 = vadd.f32 %v6806_v5, %v3884_v12  ;;  %v3511_v0 = vadd.f32 %v3492_v22, %v3357_v34 }
 0x37a   : > { %v3918_v29 = vmax.f32 %v3902_v45, 0.0  ;;  %v3733_v38 = vadd.f32 %v3714_v6, %v3511_v0 }
 0x37c   : > { %v3927_v33 = vpack.c.bf16 %v3918_v29, %v3917_v49  ;;  %v3867_v10 = vadd.f32 %v3848_v9, %v3733_v38 }
 0x37e   : > { %4950 = vmatmul.msk.bf16.gmra.mxu1 %vm2393_vm11, %v3927_v33  ;;  %v3885_v19 = vmul.f32 %v6796_v17, %v3867_v10 }
 0x37f   : > { %v3494_v52 = vpop.f32.mrf.mxu2 }
 0x380   : > { %v3512_v50 = vadd.f32 %v3494_v52, %v3358_v47  ;;  %v3903_v31 = vadd.f32 %v6806_v5, %v3885_v19 }
 0x382   : > { %v3734_v60 = vadd.f32 %v3716_v62, %v3512_v50  ;;  %v3919_v16 = vmax.f32 %v3903_v31, 0.0 }
 0x384   : > { %v3868_v39 = vadd.f32 %v3850_v61, %v3734_v60 }
 0x386   : > { %v3886_v2 = vmul.f32 %v6796_v17, %v3868_v39  ;;  %v6872_v17 = vld [vmem:[%s7030_s5 + $0x3] ss:$0 sm:$0xff] }
 0x388   : > { %v3904_v23 = vadd.f32 %v6806_v5, %v3886_v2 }
 0x38a   : > { %v3920_v8 = vmax.f32 %v3904_v23, 0.0 }
 0x38c   : > { %v3928_v63 = vpack.c.bf16 %v3920_v8, %v3919_v16 }
 0x38e   : > { %4951 = vmatmul.msk.bf16.gmra.mxu1 %vm2393_vm11, %v3928_v63 }
 0x39b   : > { %v3978_v36 = vpop.f32.mrf.mxu1 }
 0x39c   : > { %v4018_v3 = vadd.f32 %v3978_v36, %v6492_v40 }
 0x39e   : > { %v4038_v5 = vadd.f32 %v6866_v24, %v4018_v3 }
 0x3a0   : > { %v4056_v58 = vmul.f32 %v6872_v17, %v4038_v5 }
 0x3a2   : > { %v4074_v41 = vadd.f32 %v6878_v13, %v4056_v58 }
 0x3a3   : > { %v3980_v40 = vpop.f32.mrf.mxu1 }
 0x3a4   : > { %v4090_v28 = vmax.f32 %v4074_v41, 0.0  ;;  %v4019_v11 = vadd.f32 %v3980_v40, %v6500_v46 }
 0x3a6   : > { %v4106_v54 = vpack.c.bf16 %v4090_v28, %v4090_v28  ;;  %v4039_v57 = vadd.f32 %v6866_v24, %v4019_v11 }
 0x3a8   : > { %4123 = vst.msk [vmem:[%s6887_s21] sm:$0xf] %vm4122_vm12, %v4106_v54  ;;  %v4057_v30 = vmul.f32 %v6872_v17, %v4039_v57 }
 0x3aa   : > { %v4075_v35 = vadd.f32 %v6878_v13, %v4057_v30 }
 0x3ab   : > { %v3983_v21 = vpop.f32.mrf.mxu1 }
 0x3ac   : > { %v4091_v7 = vmax.f32 %v4075_v35, 0.0  ;;  %v4020_v56 = vadd.f32 %v3983_v21, %v6510_v1 }
 0x3ae   : > { %v4107_v46 = vpack.c.bf16 %v4091_v7, %v4091_v7  ;;  %v4040_v20 = vadd.f32 %v6866_v24, %v4020_v56 }
 0x3b0   : > { %4124 = vst.msk [vmem:[%s6887_s21 + $0x4] sm:$0xf] %vm4122_vm12, %v4107_v46  ;;  %v4058_v48 = vmul.f32 %v6872_v17, %v4040_v20 }
 0x3b2   : > { %v4076_v51 = vadd.f32 %v6878_v13, %v4058_v48 }
 0x3b3   : > { %v3985_v34 = vpop.f32.mrf.mxu1 }
 0x3b4   : > { %v4092_v14 = vmax.f32 %v4076_v51, 0.0  ;;  %v4021_v12 = vadd.f32 %v3985_v34, %v6518_v4 }
 0x3b6   : > { %v4108_v6 = vpack.c.bf16 %v4092_v14, %v4092_v14  ;;  %v4041_v22 = vadd.f32 %v6866_v24, %v4021_v12 }
 0x3b8   : > { %4125 = vst.msk [vmem:[%s6887_s21 + $0x8] sm:$0xf] %vm4122_vm12, %v4108_v6  ;;  %v4059_v1 = vmul.f32 %v6872_v17, %v4041_v22 }
 0x3ba   : > { %v4077_v45 = vadd.f32 %v6878_v13, %v4059_v1 }
 0x3bb   : > { %v3988_v0 = vpop.f32.mrf.mxu1 }
 0x3bc   : > { %v4093_v9 = vmax.f32 %v4077_v45, 0.0  ;;  %v4022_v49 = vadd.f32 %v3988_v0, %v6528_v25 }
 0x3be   : > { %v4109_v29 = vpack.c.bf16 %v4093_v9, %v4093_v9  ;;  %v4042_v38 = vadd.f32 %v6866_v24, %v4022_v49 }
 0x3c0   : > { %4126 = vst.msk [vmem:[%s6887_s21 + $0xc] sm:$0xf] %vm4122_vm12, %v4109_v29  ;;  %v4060_v4 = vmul.f32 %v6872_v17, %v4042_v38 }
 0x3c2   : > { %v4078_v15 = vadd.f32 %v6878_v13, %v4060_v4 }
 0x3c3   : > { %v3990_v33 = vpop.f32.mrf.mxu1 }
 0x3c4   : > { %v4094_v47 = vmax.f32 %v4078_v15, 0.0  ;;  %v4023_v10 = vadd.f32 %v3990_v33, %v6536_v55 }
 0x3c6   : > { %v4110_v52 = vpack.c.bf16 %v4094_v47, %v4094_v47  ;;  %v4043_v50 = vadd.f32 %v6866_v24, %v4023_v10 }
 0x3c8   : > { %4127 = vst.msk [vmem:[%s6887_s21 + $0x10] sm:$0xf] %vm4122_vm12, %v4110_v52  ;;  %v4061_v25 = vmul.f32 %v6872_v17, %v4043_v50 }
 0x3ca   : > { %v4079_v62 = vadd.f32 %v6878_v13, %v4061_v25 }
 0x3cb   : > { %v3993_v19 = vpop.f32.mrf.mxu1 }
 0x3cc   : > { %v4095_v60 = vmax.f32 %v4079_v62, 0.0  ;;  %v4024_v61 = vadd.f32 %v3993_v19, %v6548_v27 }
 0x3ce   : > { %v4111_v39 = vpack.c.bf16 %v4095_v60, %v4095_v60  ;;  %v4044_v31 = vadd.f32 %v6866_v24, %v4024_v61 }
 0x3d0   : > { %4128 = vst.msk [vmem:[%s6887_s21 + $0x14] sm:$0xf] %vm4122_vm12, %v4111_v39  ;;  %v4062_v55 = vmul.f32 %v6872_v17, %v4044_v31 }
 0x3d2   : > { %v4080_v2 = vadd.f32 %v6878_v13, %v4062_v55 }
 0x3d3   : > { %v3995_v23 = vpop.f32.mrf.mxu1 }
 0x3d4   : > { %v4096_v16 = vmax.f32 %v4080_v2, 0.0  ;;  %v4025_v8 = vadd.f32 %v3995_v23, %v6556_v37 }
 0x3d6   : > { %v4112_v63 = vpack.c.bf16 %v4096_v16, %v4096_v16  ;;  %v4045_v36 = vadd.f32 %v6866_v24, %v4025_v8 }
 0x3d8   : > { %4129 = vst.msk [vmem:[%s6887_s21 + $0x18] sm:$0xf] %vm4122_vm12, %v4112_v63  ;;  %v4063_v27 = vmul.f32 %v6872_v17, %v4045_v36 }
 0x3da   : > { %v4081_v3 = vadd.f32 %v6878_v13, %v4063_v27 }
 0x3db   : > { %v3998_v5 = vpop.f32.mrf.mxu1 }
 0x3dc   : > { %v4097_v58 = vmax.f32 %v4081_v3, 0.0  ;;  %v4026_v41 = vadd.f32 %v3998_v5, %v6568_v44 }
 0x3de   : > { %v4113_v40 = vpack.c.bf16 %v4097_v58, %v4097_v58  ;;  %v4046_v28 = vadd.f32 %v6866_v24, %v4026_v41 }
 0x3e0   : > { %4130 = vst.msk [vmem:[%s6887_s21 + $0x1c] sm:$0xf] %vm4122_vm12, %v4113_v40  ;;  %v4064_v37 = vmul.f32 %v6872_v17, %v4046_v28 }
 0x3e2   : > { %v4082_v11 = vadd.f32 %v6878_v13, %v4064_v37 }
 0x3e3   : > { %v4000_v54 = vpop.f32.mrf.mxu1 }
 0x3e4   : > { %v4098_v57 = vmax.f32 %v4082_v11, 0.0  ;;  %v4027_v30 = vadd.f32 %v4000_v54, %v6576_v26 }
 0x3e6   : > { %v4114_v35 = vpack.c.bf16 %v4098_v57, %v4098_v57  ;;  %v4047_v21 = vadd.f32 %v6866_v24, %v4027_v30 }
 0x3e8   : > { %4131 = vst.msk [vmem:[%s6887_s21 + $0x20] sm:$0xf] %vm4122_vm12, %v4114_v35  ;;  %v4065_v44 = vmul.f32 %v6872_v17, %v4047_v21 }
 0x3ea   : > { %v4083_v7 = vadd.f32 %v6878_v13, %v4065_v44 }
 0x3eb   : > { %v4003_v56 = vpop.f32.mrf.mxu1 }
 0x3ec   : > { %v4099_v46 = vmax.f32 %v4083_v7, 0.0  ;;  %v4028_v20 = vadd.f32 %v4003_v56, %v6589_v43 }
 0x3ee   : > { %v4115_v48 = vpack.c.bf16 %v4099_v46, %v4099_v46  ;;  %v4048_v51 = vadd.f32 %v6866_v24, %v4028_v20 }
 0x3f0   : > { %4132 = vst.msk [vmem:[%s6887_s21 + $0x24] sm:$0xf] %vm4122_vm12, %v4115_v48  ;;  %v4066_v26 = vmul.f32 %v6872_v17, %v4048_v51 }
 0x3f2   : > { %v4084_v34 = vadd.f32 %v6878_v13, %v4066_v26 }
 0x3f3   : > { %v4005_v14 = vpop.f32.mrf.mxu1 }
 0x3f4   : > { %v4100_v12 = vmax.f32 %v4084_v34, 0.0  ;;  %v4029_v6 = vadd.f32 %v4005_v14, %v6603_v59 }
 0x3f6   : > { %v4116_v22 = vpack.c.bf16 %v4100_v12, %v4100_v12  ;;  %v4049_v1 = vadd.f32 %v6866_v24, %v4029_v6 }
 0x3f8   : > { %4133 = vst.msk [vmem:[%s6887_s21 + $0x28] sm:$0xf] %vm4122_vm12, %v4116_v22  ;;  %v4067_v43 = vmul.f32 %v6872_v17, %v4049_v1 }
 0x3fa   : > { %v4085_v45 = vadd.f32 %v6878_v13, %v4067_v43 }
 0x3fb   : > { %v4008_v0 = vpop.f32.mrf.mxu1 }
 0x3fc   : > { %v4101_v9 = vmax.f32 %v4085_v45, 0.0  ;;  %v4030_v49 = vadd.f32 %v4008_v0, %v6613_v32 }
 0x3fe   : > { %v4117_v29 = vpack.c.bf16 %v4101_v9, %v4101_v9  ;;  %v4050_v38 = vadd.f32 %v6866_v24, %v4030_v49 }
 0x400   : > { %4134 = vst.msk [vmem:[%s6887_s21 + $0x2c] sm:$0xf] %vm4122_vm12, %v4117_v29  ;;  %v4068_v59 = vmul.f32 %v6872_v17, %v4050_v38 }
 0x402   : > { %v4086_v4 = vadd.f32 %v6878_v13, %v4068_v59 }
 0x403   : > { %v4010_v15 = vpop.f32.mrf.mxu1 }
 0x404   : > { %v4102_v33 = vmax.f32 %v4086_v4, 0.0  ;;  %v4031_v47 = vadd.f32 %v4010_v15, %v6625_v18 }
 0x406   : > { %v4118_v10 = vpack.c.bf16 %v4102_v33, %v4102_v33  ;;  %v4051_v52 = vadd.f32 %v6866_v24, %v4031_v47 }
 0x408   : > { %4135 = vst.msk [vmem:[%s6887_s21 + $0x30] sm:$0xf] %vm4122_vm12, %v4118_v10  ;;  %v4069_v32 = vmul.f32 %v6872_v17, %v4051_v52 }
 0x40a   : > { %v4087_v50 = vadd.f32 %v6878_v13, %v4069_v32 }
 0x40b   : > { %v4013_v25 = vpop.f32.mrf.mxu1 }
 0x40c   : > { %v4103_v62 = vmax.f32 %v4087_v50, 0.0  ;;  %v4032_v19 = vadd.f32 %v4013_v25, %v6631_v42 }
 0x40e   : > { %v4119_v60 = vpack.c.bf16 %v4103_v62, %v4103_v62  ;;  %v4052_v61 = vadd.f32 %v6866_v24, %v4032_v19 }
 0x410   : > { %4136 = vst.msk [vmem:[%s6887_s21 + $0x34] sm:$0xf] %vm4122_vm12, %v4119_v60  ;;  %v4070_v18 = vmul.f32 %v6872_v17, %v4052_v61 }
 0x412   : > { %v4088_v39 = vadd.f32 %v6878_v13, %v4070_v18 }
 0x413   : > { %v4015_v31 = vpop.f32.mrf.mxu1 }
 0x414   : > { %v4104_v55 = vmax.f32 %v4088_v39, 0.0  ;;  %v4033_v2 = vadd.f32 %v4015_v31, %v6647_v53 }
 0x416   : > { %v4120_v42 = vpack.c.bf16 %v4104_v55, %v4104_v55  ;;  %v4053_v23 = vadd.f32 %v6866_v24, %v4033_v2 }
 0x418   : > { %4137 = vst.msk [vmem:[%s6887_s21 + $0x38] sm:$0xf] %vm4122_vm12, %v4120_v42  ;;  %v4071_v16 = vmul.f32 %v6872_v17, %v4053_v23 }
 0x41a   : > { %v4089_v8 = vadd.f32 %v6878_v13, %v4071_v16 }
 0x41c   : > { %v4105_v63 = vmax.f32 %v4089_v8, 0.0 }
 0x41e   : > { %v4121_v53 = vpack.c.bf16 %v4105_v63, %v4105_v63 }
 0x420   : > { %4138 = vst.msk [vmem:[%s6887_s21 + $0x3c] sm:$0xf] %vm4122_vm12, %v4121_v53 }
 0x421   : > { %5119 = shalt.err (!%p5116_p6)
}
 0x422   : > { %s5188_s22 = smov 64   ;;  %s5189_s21 = smov 4  }
 0x423   : > { %5002 = dma.vmem_to_hbm [thread:$0]  (%p5281_p3), %s4156_s18, 1024, %s4158_s9, %s4140_s10, %s5188_s22, %s5188_s22, %s5189_s21  }
 0x424 PF: > { %p5008_p7 = scmp.ge.s32.totalorder %s5186_s8, 2  ;;  %s4172_s16 = sand.u32 1, %s5158_s24  }
 0x425   : > { %s4173_s20 = scalar_lea.sflag [#allocation3], %s4172_s16 }
 0x426   : > { %p5005_p9 = pnand %p5008_p7, %p5290_p8 }
 0x428   : > { %p5006_p10 = pneg %p5005_p9 }
 0x42a   : > { %5153 = dma.done.wait (%p5006_p10), %s4173_s20, 1024  }
 0x42b   : > { %5155 = vsyncadd (%p5006_p10), %s4173_s20, 4294966272  ;;  %s20_s8 = sadd.s32 1, %s5186_s8   ;;  %s7044_s24 = smov %s5162_s25 }
 0x42c   : > { %p17_p11 = scmp.ge.s32.totalorder %s20_s8, 10   ;;  %s7045_s25 = smov %s5166_s26 }
 0x42d   : > { %s7046_s26 = smov %s5299_s19  ;;  %s7047_s27 = smov %s5178_s29 }
 0x42e   : > { %s7048_s28 = smov %s5182_s30  ;;  %s7049_s29 = smov %s7052_s11 }
 0x42f   : > { %s7050_s30 = smov %s7056_s12  ;;  %19 = sbr.rel (!%p17_p11) target bundleno = 5 (0x5), region = 108 }
 0x434   :  { %4179 = vsyncpa [#allocation3], 1 }
 0x435   :  { %4181 = vsyncpa [#allocation3 + $0x1], 1 }

</bundles_post_ra>
